<compile_context>
chip_gen: v5e
topology: v5e:2x2
jax: 0.10.0
libtpu: 0.0.40
codegen_flags: <defaults>
</compile_context>

<pallas_src>
import functools

import jax
import jax.numpy as jnp
from jax.experimental import pallas as pl
from jax.experimental.pallas import tpu as pltpu

HP = 128          # per-gate lane padding: each gate owns one full lane block
G = 3 * HP        # lanes per (r, z, n) gate triple


def _sigmoid(x):
    # logistic-as-tanh: guaranteed single EUP op (no exp + divide).
    return 0.5 * jnp.tanh(0.5 * x) + 0.5


def _gru_head_kernel(num_layers, seq_len, x_ref, w_ref, b_ref, out_ref, gi_ref):
    """Stacked GRU + MLP head for one batch tile.

    x_ref  : (T*BT, 128)   bf16  time-major input, lanes >= input_dim are zero
    w_ref  : (128, Kw)     bf16  [wih_0 | whh_0 | ... | wih_{L-1} | whh_{L-1} | w1 | w2]
    b_ref  : (1, Kb)       f32   [bihf_0 | bhhn_0 | ... | b1 | b2]
    out_ref: (BT, 128)     f32   padded head output
    gi_ref : (T*BT, 3*128) f32   scratch: hoisted layer-0 input projection
    """
    T = seq_len
    BT = x_ref.shape[0] // T

    # Static lane offsets into the coalesced weight / bias slabs.
    w_ih, w_hh = [], []
    off = 0
    for _ in range(num_layers):
        w_ih.append(off); off += G
        w_hh.append(off); off += G
    w1_off = off
    w2_off = off + HP

    b_ihf, b_hhn = [], []
    boff = 0
    for _ in range(num_layers):
        b_ihf.append(boff); boff += G
        b_hhn.append(boff); boff += HP
    b1_off = boff
    b2_off = boff + HP

    # Hoisted layer-0 input projection for the whole sequence (one batched
    # MXU matmul, off the recurrent critical path).  Bias already folded in.
    gi_ref[...] = (
        jnp.dot(x_ref[...], w_ref[:, w_ih[0]:w_ih[0] + G],
                preferred_element_type=jnp.float32)
        + b_ref[:, b_ihf[0]:b_ihf[0] + G])

    # Hoisted bias broadcasts (a handful of vregs; JAX does not CSE
    # broadcast_in_dim inside the unrolled loop).
    bihf = [None] * num_layers
    bhhn = [None] * num_layers
    for l in range(num_layers):
        if l > 0:
            o = b_ihf[l]
            bihf[l] = jnp.broadcast_to(b_ref[:, o:o + G], (BT, G))
        o = b_hhn[l]
        bhhn[l] = jnp.broadcast_to(b_ref[:, o:o + HP], (BT, HP))

    # Wavefront recurrence: one fully-unrolled timestep loop drives all
    # layers, so layer l+1 step t overlaps layer 0 step t+1 in the scheduler.
    # Weights are re-read from VMEM inside each dot (short live ranges; the
    # vld hides under the MXU push -> no vreg pinning / spills).
    h = [jnp.zeros((BT, HP), jnp.float32) for _ in range(num_layers)]
    for t in range(T):
        for l in range(num_layers):
            if l == 0:
                gi = gi_ref[pl.ds(t * BT, BT), :]
            else:
                gi = jnp.dot(h[l - 1].astype(jnp.bfloat16),
                             w_ref[:, w_ih[l]:w_ih[l] + G],
                             preferred_element_type=jnp.float32) + bihf[l]
            if t == 0:
                # h == 0  =>  recurrent contribution is zero: skip the matmul.
                r = _sigmoid(gi[:, 0:HP])
                z = _sigmoid(gi[:, HP:2 * HP])
                n = jnp.tanh(gi[:, 2 * HP:G] + r * bhhn[l])
                h[l] = (1.0 - z) * n
            else:
                gh = jnp.dot(h[l].astype(jnp.bfloat16),
                             w_ref[:, w_hh[l]:w_hh[l] + G],
                             preferred_element_type=jnp.float32)
                r = _sigmoid(gi[:, 0:HP] + gh[:, 0:HP])
                z = _sigmoid(gi[:, HP:2 * HP] + gh[:, HP:2 * HP])
                n = jnp.tanh(gi[:, 2 * HP:G] + r * (gh[:, 2 * HP:G] + bhhn[l]))
                h[l] = (1.0 - z) * n + z * h[l]

    # Head: lin1 -> relu -> lin2 on the last layer's final hidden state.
    y = (jnp.dot(h[-1].astype(jnp.bfloat16), w_ref[:, w1_off:w1_off + HP],
                 preferred_element_type=jnp.float32)
         + b_ref[:, b1_off:b1_off + HP])
    y = jnp.maximum(y, 0.0)
    y = (jnp.dot(y.astype(jnp.bfloat16), w_ref[:, w2_off:w2_off + HP],
                 preferred_element_type=jnp.float32)
         + b_ref[:, b2_off:b2_off + HP])
    out_ref[...] = y


def prepare_params(params, *, input_dim, hidden_dim, num_layers):
    """One-time packing: transpose, per-gate 128-lane padding, b_hh r/z bias
    folding, bf16 cast, and coalescing into one weight slab + one bias slab."""
    H = hidden_dim
    assert H <= HP and input_dim <= HP, "single-lane-block packing assumed"

    def pad_gates(w_t, rows_real):
        out = jnp.zeros((HP, G), jnp.float32)
        for g in range(3):
            out = out.at[:rows_real, g * HP:g * HP + H].set(
                w_t[:, g * H:(g + 1) * H])
        return out

    w_cols, b_cols = [], []
    for l in range(num_layers):
        d_in = input_dim if l == 0 else H
        wih_t = params[f"wih{l}"].T            # (d_in, 3H)
        whh_t = params[f"whh{l}"].T            # (H, 3H)
        bih = params[f"bih{l}"]
        bhh = params[f"bhh{l}"]
        bih_fold = bih.at[:2 * H].add(bhh[:2 * H])   # fold b_hr, b_hz
        w_cols += [pad_gates(wih_t, d_in), pad_gates(whh_t, H)]
        bvec = jnp.zeros((G,), jnp.float32)
        for g in range(3):
            bvec = bvec.at[g * HP:g * HP + H].set(bih_fold[g * H:(g + 1) * H])
        b_cols += [bvec,
                   jnp.zeros((HP,), jnp.float32).at[:H].set(bhh[2 * H:])]

    head_w = params["w1"].shape[0]             # 64
    class_num = params["w2"].shape[0]
    assert head_w <= HP and class_num <= HP
    w1_pad = jnp.zeros((HP, HP), jnp.float32).at[:H, :head_w].set(params["w1"].T)
    w2_pad = jnp.zeros((HP, HP), jnp.float32).at[:head_w, :class_num].set(
        params["w2"].T)
    w_cols += [w1_pad, w2_pad]
    b_cols += [jnp.zeros((HP,), jnp.float32).at[:head_w].set(params["b1"]),
               jnp.zeros((HP,), jnp.float32).at[:class_num].set(params["b2"])]

    return {
        "w_all": jnp.concatenate(w_cols, axis=1).astype(jnp.bfloat16),
        "b_all": jnp.concatenate(b_cols, axis=0)[None, :].astype(jnp.float32),
    }


def gru_model_forward(x, prepped, *, num_layers, class_num):
    """x: (B, T, D) batch-first, like the PyTorch module. Returns (B, class_num)."""
    B, T, D = x.shape
    BP8 = -(-B // 8) * 8                      # pad batch to the 8-sublane tile
    BT = BP8 if BP8 <= 128 else 128           # rows per batch tile / grid step
    BP = -(-BP8 // BT) * BT
    n_tiles = BP // BT

    # Layout rows as (tile, time, batch-in-tile); pad lanes to 128; bf16 input.
    x_p = jnp.zeros((BP, T, HP), jnp.float32).at[:B, :, :D].set(
        x.astype(jnp.float32))
    x_rows = (x_p.reshape(n_tiles, BT, T, HP)
              .transpose(0, 2, 1, 3)
              .reshape(n_tiles * T * BT, HP)
              .astype(jnp.bfloat16))

    w_all, b_all = prepped["w_all"], prepped["b_all"]

    # Explicit VMEM budget (double-buffered inputs/outputs + scratch) with
    # headroom; stays far under v7x's 64 MiB at these sizes.
    est = (2 * T * BT * HP * x_rows.dtype.itemsize
           + 2 * w_all.size * w_all.dtype.itemsize
           + 2 * b_all.size * b_all.dtype.itemsize
           + 2 * BT * HP * 4
           + T * BT * G * 4)
    vmem_limit = int(min(max(4 * est, 8 * 1024 * 1024), 48 * 1024 * 1024))

    kernel = functools.partial(_gru_head_kernel, num_layers, T)
    out_p = pl.pallas_call(
        kernel,
        out_shape=jax.ShapeDtypeStruct((BP, HP), jnp.float32),
        grid=(n_tiles,),
        in_specs=[
            pl.BlockSpec((T * BT, HP), lambda i: (i, 0)),
            pl.BlockSpec(w_all.shape, lambda i: (0, 0)),
            pl.BlockSpec(b_all.shape, lambda i: (0, 0)),
        ],
        out_specs=pl.BlockSpec((BT, HP), lambda i: (i, 0)),
        scratch_shapes=[pltpu.VMEM((T * BT, G), jnp.float32)],
        compiler_params=pltpu.CompilerParams(
            dimension_semantics=("parallel",),   # shards batch tiles over v7x TCs
            vmem_limit_bytes=vmem_limit),
    )(x_rows, w_all, b_all)
    return out_p[:B, :class_num]


def init_params(key, *, input_dim, hidden_dim, num_layers, class_num):
    """Deterministic PyTorch-style uniform(-1/sqrt(fan), 1/sqrt(fan)) init."""
    params = {}
    keys = iter(jax.random.split(key, 4 * num_layers + 4))

    def unif(k, shape, bound):
        return jax.random.uniform(k, shape, jnp.float32, -bound, bound)

    g_bound = hidden_dim ** -0.5
    for l in range(num_layers):
        d_in = input_dim if l == 0 else hidden_dim
        params[f"wih{l}"] = unif(next(keys), (3 * hidden_dim, d_in), g_bound)
        params[f"whh{l}"] = unif(next(keys), (3 * hidden_dim, hidden_dim), g_bound)
        params[f"bih{l}"] = unif(next(keys), (3 * hidden_dim,), g_bound)
        params[f"bhh{l}"] = unif(next(keys), (3 * hidden_dim,), g_bound)

    params["w1"] = unif(next(keys), (64, hidden_dim), hidden_dim ** -0.5)
    params["b1"] = unif(next(keys), (64,), hidden_dim ** -0.5)
    params["w2"] = unif(next(keys), (class_num, 64), 64 ** -0.5)
    params["b2"] = unif(next(keys), (class_num,), 64 ** -0.5)
    return params


def reference_forward(x, params, *, num_layers, hidden_dim,
                      matmul_dtype=jnp.float32):
    """Pure-JAX reference mirroring torch.nn.GRU + head.  matmul_dtype=bf16
    reproduces the kernel's MXU operand precision (f32 accumulation)."""
    B, T, _ = x.shape
    H = hidden_dim

    def mm(a, b):
        return jnp.dot(a.astype(matmul_dtype), b.astype(matmul_dtype),
                       preferred_element_type=jnp.float32)

    seq = x.astype(jnp.float32)
    h = None
    for l in range(num_layers):
        wih, whh = params[f"wih{l}"], params[f"whh{l}"]
        bih, bhh = params[f"bih{l}"], params[f"bhh{l}"]
        h = jnp.zeros((B, H), jnp.float32)
        outs = []
        for t in range(T):
            x_t = seq[:, t, :]
            gi = mm(x_t, wih.T) + bih
            gh = mm(h, whh.T) + bhh
            r = jax.nn.sigmoid(gi[:, :H] + gh[:, :H])
            z = jax.nn.sigmoid(gi[:, H:2 * H] + gh[:, H:2 * H])
            n = jnp.tanh(gi[:, 2 * H:] + r * gh[:, 2 * H:])
            h = (1.0 - z) * n + z * h
            outs.append(h)
        seq = jnp.stack(outs, axis=1)
    y = jnp.maximum(mm(h, params["w1"].T) + params["b1"], 0.0)
    return mm(y, params["w2"].T) + params["b2"]


if __name__ == "__main__":
    # Small shapes consistent with the module's forward:
    # input_batch: (batch, seq, input_dim); hidden_dim=32; num_layers=2; class_num=5.
    B, T, D = 4, 8, 16
    HIDDEN, LAYERS, CLASSES = 32, 2, 5

    key = jax.random.PRNGKey(0)
    k_x, k_p = jax.random.split(key)
    x = jax.random.normal(k_x, (B, T, D), jnp.float32)
    params = init_params(k_p, input_dim=D, hidden_dim=HIDDEN,
                         num_layers=LAYERS, class_num=CLASSES)
    prepped = prepare_params(params, input_dim=D, hidden_dim=HIDDEN,
                             num_layers=LAYERS)

    out = gru_model_forward(x, prepped, num_layers=LAYERS, class_num=CLASSES)
    out = jax.block_until_ready(out)
    assert out.shape == (B, CLASSES)

    # Tight check against a reference with matching bf16 MXU operand precision.
    ref_bf16 = reference_forward(x, params, num_layers=LAYERS,
                                 hidden_dim=HIDDEN, matmul_dtype=jnp.bfloat16)
    err_b = jnp.max(jnp.abs(out - ref_bf16))
    assert jnp.allclose(out, ref_bf16, atol=2e-3, rtol=2e-3), \
        f"bf16-matched max abs err {err_b}"

    # Loose sanity check against the full-f32 reference (bf16 MXU rounding).
    ref_f32 = reference_forward(x, params, num_layers=LAYERS,
                                hidden_dim=HIDDEN, matmul_dtype=jnp.float32)
    err_f = jnp.max(jnp.abs(out - ref_f32))
    assert jnp.allclose(out, ref_f32, atol=0.25, rtol=0.25), \
        f"f32 max abs err {err_f}"

    print("KERNEL_OK")
</pallas_src>

<mosaic_0001>
module attributes {stable_mosaic.version = 11 : i64} {
  func.func @_gru_head_kernel(%arg0: i32, %arg1: memref<64x128xbf16, #tpu.memory_space<vmem>>, %arg2: memref<128x1792xbf16, #tpu.memory_space<vmem>>, %arg3: memref<1x1280xf32, #tpu.memory_space<vmem>>, %arg4: memref<8x128xf32, #tpu.memory_space<vmem>>, %arg5: memref<64x384xf32, #tpu.memory_space<vmem>>) attributes {dimension_semantics = [#tpu.dimension_semantics<parallel>], iteration_bounds = array<i64: 1>, scalar_prefetch = 0 : i64, scratch_operands = 1 : i64, tpu.core_type = #tpu.core_type<tc>, window_params = [{transform_indices = @transform_0, window_bounds = array<i64: 64, 128>}, {pipeline_mode = #tpu.pipeline_mode<synchronous>, transform_indices = @transform_1, window_bounds = array<i64: 128, 1792>}, {pipeline_mode = #tpu.pipeline_mode<synchronous>, transform_indices = @transform_2, window_bounds = array<i64: 1, 1280>}, {transform_indices = @transform_3, window_bounds = array<i64: 8, 128>}]} {
    %c0 = arith.constant 0 : index
    %c0_0 = arith.constant 0 : index
    %0 = vector.load %arg1[%c0, %c0_0] : memref<64x128xbf16, #tpu.memory_space<vmem>>, vector<64x128xbf16>
    %c0_1 = arith.constant 0 : index
    %c0_2 = arith.constant 0 : index
    %1 = vector.load %arg2[%c0_1, %c0_2] : memref<128x1792xbf16, #tpu.memory_space<vmem>>, vector<128x384xbf16>
    %cst = arith.constant dense<0.000000e+00> : vector<64x384xf32>
    %2 = tpu.matmul %0, %1, %cst {dimension_numbers = #tpu.dot_dimension_numbers<[1], [0], [0], [1], [0, 0, 1, 1], [], []>} : vector<64x128xbf16>, vector<128x384xbf16>, vector<64x384xf32> -> vector<64x384xf32>
    %c0_3 = arith.constant 0 : index
    %c0_4 = arith.constant 0 : index
    %3 = vector.load %arg3[%c0_3, %c0_4] : memref<1x1280xf32, #tpu.memory_space<vmem>>, vector<1x384xf32>
    %4 = vector.broadcast %3 : vector<1x384xf32> to vector<64x384xf32>
    %5 = arith.addf %2, %4 : vector<64x384xf32>
    %c0_5 = arith.constant 0 : index
    %c0_6 = arith.constant 0 : index
    %6 = vector.load %arg5[%c0_5, %c0_6] : memref<64x384xf32, #tpu.memory_space<vmem>>, vector<64x384xf32>
    tpu.vector_store %arg5[%c0_5, %c0_6], %5 {strides = array<i32>} : memref<64x384xf32, #tpu.memory_space<vmem>>, vector<64x384xf32>,
    %c0_7 = arith.constant 0 : index
    %c384 = arith.constant 384 : index
    %7 = vector.load %arg3[%c0_7, %c384] : memref<1x1280xf32, #tpu.memory_space<vmem>>, vector<1x128xf32>
    %8 = vector.shape_cast %7 : vector<1x128xf32> to vector<1x128xf32>
    %9 = vector.broadcast %8 : vector<1x128xf32> to vector<8x128xf32>
    %c0_8 = arith.constant 0 : index
    %c512 = arith.constant 512 : index
    %10 = vector.load %arg3[%c0_8, %c512] : memref<1x1280xf32, #tpu.memory_space<vmem>>, vector<1x384xf32>
    %11 = vector.shape_cast %10 : vector<1x384xf32> to vector<1x384xf32>
    %12 = vector.broadcast %11 : vector<1x384xf32> to vector<8x384xf32>
    %c0_9 = arith.constant 0 : index
    %c896 = arith.constant 896 : index
    %13 = vector.load %arg3[%c0_9, %c896] : memref<1x1280xf32, #tpu.memory_space<vmem>>, vector<1x128xf32>
    %14 = vector.shape_cast %13 : vector<1x128xf32> to vector<1x128xf32>
    %15 = vector.broadcast %14 : vector<1x128xf32> to vector<8x128xf32>
    %c0_10 = arith.constant 0 : index
    %c0_11 = arith.constant 0 : index
    %16 = vector.load %arg5[%c0_10, %c0_11] : memref<64x384xf32, #tpu.memory_space<vmem>>, vector<8x384xf32>
    %17 = vector.extract_strided_slice %16 {offsets = [0, 0], sizes = [8, 128], strides = [1, 1]} : vector<8x384xf32> to vector<8x128xf32>
    %cst_12 = arith.constant 5.000000e-01 : f32
    %18 = vector.broadcast %cst_12 : f32 to vector<8x128xf32>
    %19 = arith.mulf %18, %17 : vector<8x128xf32>
    %20 = math.tanh %19 : vector<8x128xf32>
    %cst_13 = arith.constant 5.000000e-01 : f32
    %21 = vector.broadcast %cst_13 : f32 to vector<8x128xf32>
    %22 = arith.mulf %21, %20 : vector<8x128xf32>
    %cst_14 = arith.constant 5.000000e-01 : f32
    %23 = vector.broadcast %cst_14 : f32 to vector<8x128xf32>
    %24 = arith.addf %22, %23 : vector<8x128xf32>
    %25 = vector.extract_strided_slice %16 {offsets = [0, 128], sizes = [8, 128], strides = [1, 1]} : vector<8x384xf32> to vector<8x128xf32>
    %cst_15 = arith.constant 5.000000e-01 : f32
    %26 = vector.broadcast %cst_15 : f32 to vector<8x128xf32>
    %27 = arith.mulf %26, %25 : vector<8x128xf32>
    %28 = math.tanh %27 : vector<8x128xf32>
    %cst_16 = arith.constant 5.000000e-01 : f32
    %29 = vector.broadcast %cst_16 : f32 to vector<8x128xf32>
    %30 = arith.mulf %29, %28 : vector<8x128xf32>
    %cst_17 = arith.constant 5.000000e-01 : f32
    %31 = vector.broadcast %cst_17 : f32 to vector<8x128xf32>
    %32 = arith.addf %30, %31 : vector<8x128xf32>
    %33 = vector.extract_strided_slice %16 {offsets = [0, 256], sizes = [8, 128], strides = [1, 1]} : vector<8x384xf32> to vector<8x128xf32>
    %34 = arith.mulf %24, %9 : vector<8x128xf32>
    %35 = arith.addf %33, %34 : vector<8x128xf32>
    %36 = math.tanh %35 : vector<8x128xf32>
    %cst_18 = arith.constant 1.000000e+00 : f32
    %37 = vector.broadcast %cst_18 : f32 to vector<8x128xf32>
    %38 = arith.subf %37, %32 : vector<8x128xf32>
    %39 = arith.mulf %38, %36 : vector<8x128xf32>
    %40 = arith.truncf %39 : vector<8x128xf32> to vector<8x128xbf16>
    %c0_19 = arith.constant 0 : index
    %c768 = arith.constant 768 : index
    %41 = vector.load %arg2[%c0_19, %c768] : memref<128x1792xbf16, #tpu.memory_space<vmem>>, vector<128x384xbf16>
    %cst_20 = arith.constant dense<0.000000e+00> : vector<8x384xf32>
    %42 = tpu.matmul %40, %41, %cst_20 {dimension_numbers = #tpu.dot_dimension_numbers<[1], [0], [0], [1], [0, 0, 1, 1], [], []>} : vector<8x128xbf16>, vector<128x384xbf16>, vector<8x384xf32> -> vector<8x384xf32>
    %43 = arith.addf %42, %12 : vector<8x384xf32>
    %44 = vector.extract_strided_slice %43 {offsets = [0, 0], sizes = [8, 128], strides = [1, 1]} : vector<8x384xf32> to vector<8x128xf32>
    %cst_21 = arith.constant 5.000000e-01 : f32
    %45 = vector.broadcast %cst_21 : f32 to vector<8x128xf32>
    %46 = arith.mulf %45, %44 : vector<8x128xf32>
    %47 = math.tanh %46 : vector<8x128xf32>
    %cst_22 = arith.constant 5.000000e-01 : f32
    %48 = vector.broadcast %cst_22 : f32 to vector<8x128xf32>
    %49 = arith.mulf %48, %47 : vector<8x128xf32>
    %cst_23 = arith.constant 5.000000e-01 : f32
    %50 = vector.broadcast %cst_23 : f32 to vector<8x128xf32>
    %51 = arith.addf %49, %50 : vector<8x128xf32>
    %52 = vector.extract_strided_slice %43 {offsets = [0, 128], sizes = [8, 128], strides = [1, 1]} : vector<8x384xf32> to vector<8x128xf32>
    %cst_24 = arith.constant 5.000000e-01 : f32
    %53 = vector.broadcast %cst_24 : f32 to vector<8x128xf32>
    %54 = arith.mulf %53, %52 : vector<8x128xf32>
    %55 = math.tanh %54 : vector<8x128xf32>
    %cst_25 = arith.constant 5.000000e-01 : f32
    %56 = vector.broadcast %cst_25 : f32 to vector<8x128xf32>
    %57 = arith.mulf %56, %55 : vector<8x128xf32>
    %cst_26 = arith.constant 5.000000e-01 : f32
    %58 = vector.broadcast %cst_26 : f32 to vector<8x128xf32>
    %59 = arith.addf %57, %58 : vector<8x128xf32>
    %60 = vector.extract_strided_slice %43 {offsets = [0, 256], sizes = [8, 128], strides = [1, 1]} : vector<8x384xf32> to vector<8x128xf32>
    %61 = arith.mulf %51, %15 : vector<8x128xf32>
    %62 = arith.addf %60, %61 : vector<8x128xf32>
    %63 = math.tanh %62 : vector<8x128xf32>
    %cst_27 = arith.constant 1.000000e+00 : f32
    %64 = vector.broadcast %cst_27 : f32 to vector<8x128xf32>
    %65 = arith.subf %64, %59 : vector<8x128xf32>
    %66 = arith.mulf %65, %63 : vector<8x128xf32>
    %c8 = arith.constant 8 : index
    %c0_28 = arith.constant 0 : index
    %67 = vector.load %arg5[%c8, %c0_28] : memref<64x384xf32, #tpu.memory_space<vmem>>, vector<8x384xf32>
    %68 = arith.truncf %39 : vector<8x128xf32> to vector<8x128xbf16>
    %c0_29 = arith.constant 0 : index
    %c384_30 = arith.constant 384 : index
    %69 = vector.load %arg2[%c0_29, %c384_30] : memref<128x1792xbf16, #tpu.memory_space<vmem>>, vector<128x384xbf16>
    %cst_31 = arith.constant dense<0.000000e+00> : vector<8x384xf32>
    %70 = tpu.matmul %68, %69, %cst_31 {dimension_numbers = #tpu.dot_dimension_numbers<[1], [0], [0], [1], [0, 0, 1, 1], [], []>} : vector<8x128xbf16>, vector<128x384xbf16>, vector<8x384xf32> -> vector<8x384xf32>
    %71 = vector.extract_strided_slice %67 {offsets = [0, 0], sizes = [8, 128], strides = [1, 1]} : vector<8x384xf32> to vector<8x128xf32>
    %72 = vector.extract_strided_slice %70 {offsets = [0, 0], sizes = [8, 128], strides = [1, 1]} : vector<8x384xf32> to vector<8x128xf32>
    %73 = arith.addf %71, %72 : vector<8x128xf32>
    %cst_32 = arith.constant 5.000000e-01 : f32
    %74 = vector.broadcast %cst_32 : f32 to vector<8x128xf32>
    %75 = arith.mulf %74, %73 : vector<8x128xf32>
    %76 = math.tanh %75 : vector<8x128xf32>
    %cst_33 = arith.constant 5.000000e-01 : f32
    %77 = vector.broadcast %cst_33 : f32 to vector<8x128xf32>
    %78 = arith.mulf %77, %76 : vector<8x128xf32>
    %cst_34 = arith.constant 5.000000e-01 : f32
    %79 = vector.broadcast %cst_34 : f32 to vector<8x128xf32>
    %80 = arith.addf %78, %79 : vector<8x128xf32>
    %81 = vector.extract_strided_slice %67 {offsets = [0, 128], sizes = [8, 128], strides = [1, 1]} : vector<8x384xf32> to vector<8x128xf32>
    %82 = vector.extract_strided_slice %70 {offsets = [0, 128], sizes = [8, 128], strides = [1, 1]} : vector<8x384xf32> to vector<8x128xf32>
    %83 = arith.addf %81, %82 : vector<8x128xf32>
    %cst_35 = arith.constant 5.000000e-01 : f32
    %84 = vector.broadcast %cst_35 : f32 to vector<8x128xf32>
    %85 = arith.mulf %84, %83 : vector<8x128xf32>
    %86 = math.tanh %85 : vector<8x128xf32>
    %cst_36 = arith.constant 5.000000e-01 : f32
    %87 = vector.broadcast %cst_36 : f32 to vector<8x128xf32>
    %88 = arith.mulf %87, %86 : vector<8x128xf32>
    %cst_37 = arith.constant 5.000000e-01 : f32
    %89 = vector.broadcast %cst_37 : f32 to vector<8x128xf32>
    %90 = arith.addf %88, %89 : vector<8x128xf32>
    %91 = vector.extract_strided_slice %67 {offsets = [0, 256], sizes = [8, 128], strides = [1, 1]} : vector<8x384xf32> to vector<8x128xf32>
    %92 = vector.extract_strided_slice %70 {offsets = [0, 256], sizes = [8, 128], strides = [1, 1]} : vector<8x384xf32> to vector<8x128xf32>
    %93 = arith.addf %92, %9 : vector<8x128xf32>
    %94 = arith.mulf %80, %93 : vector<8x128xf32>
    %95 = arith.addf %91, %94 : vector<8x128xf32>
    %96 = math.tanh %95 : vector<8x128xf32>
    %cst_38 = arith.constant 1.000000e+00 : f32
    %97 = vector.broadcast %cst_38 : f32 to vector<8x128xf32>
    %98 = arith.subf %97, %90 : vector<8x128xf32>
    %99 = arith.mulf %98, %96 : vector<8x128xf32>
    %100 = arith.mulf %90, %39 : vector<8x128xf32>
    %101 = arith.addf %99, %100 : vector<8x128xf32>
    %102 = arith.truncf %101 : vector<8x128xf32> to vector<8x128xbf16>
    %c0_39 = arith.constant 0 : index
    %c768_40 = arith.constant 768 : index
    %103 = vector.load %arg2[%c0_39, %c768_40] : memref<128x1792xbf16, #tpu.memory_space<vmem>>, vector<128x384xbf16>
    %cst_41 = arith.constant dense<0.000000e+00> : vector<8x384xf32>
    %104 = tpu.matmul %102, %103, %cst_41 {dimension_numbers = #tpu.dot_dimension_numbers<[1], [0], [0], [1], [0, 0, 1, 1], [], []>} : vector<8x128xbf16>, vector<128x384xbf16>, vector<8x384xf32> -> vector<8x384xf32>
    %105 = arith.addf %104, %12 : vector<8x384xf32>
    %106 = arith.truncf %66 : vector<8x128xf32> to vector<8x128xbf16>
    %c0_42 = arith.constant 0 : index
    %c1152 = arith.constant 1152 : index
    %107 = vector.load %arg2[%c0_42, %c1152] : memref<128x1792xbf16, #tpu.memory_space<vmem>>, vector<128x384xbf16>
    %cst_43 = arith.constant dense<0.000000e+00> : vector<8x384xf32>
    %108 = tpu.matmul %106, %107, %cst_43 {dimension_numbers = #tpu.dot_dimension_numbers<[1], [0], [0], [1], [0, 0, 1, 1], [], []>} : vector<8x128xbf16>, vector<128x384xbf16>, vector<8x384xf32> -> vector<8x384xf32>
    %109 = vector.extract_strided_slice %105 {offsets = [0, 0], sizes = [8, 128], strides = [1, 1]} : vector<8x384xf32> to vector<8x128xf32>
    %110 = vector.extract_strided_slice %108 {offsets = [0, 0], sizes = [8, 128], strides = [1, 1]} : vector<8x384xf32> to vector<8x128xf32>
    %111 = arith.addf %109, %110 : vector<8x128xf32>
    %cst_44 = arith.constant 5.000000e-01 : f32
    %112 = vector.broadcast %cst_44 : f32 to vector<8x128xf32>
    %113 = arith.mulf %112, %111 : vector<8x128xf32>
    %114 = math.tanh %113 : vector<8x128xf32>
    %cst_45 = arith.constant 5.000000e-01 : f32
    %115 = vector.broadcast %cst_45 : f32 to vector<8x128xf32>
    %116 = arith.mulf %115, %114 : vector<8x128xf32>
    %cst_46 = arith.constant 5.000000e-01 : f32
    %117 = vector.broadcast %cst_46 : f32 to vector<8x128xf32>
    %118 = arith.addf %116, %117 : vector<8x128xf32>
    %119 = vector.extract_strided_slice %105 {offsets = [0, 128], sizes = [8, 128], strides = [1, 1]} : vector<8x384xf32> to vector<8x128xf32>
    %120 = vector.extract_strided_slice %108 {offsets = [0, 128], sizes = [8, 128], strides = [1, 1]} : vector<8x384xf32> to vector<8x128xf32>
    %121 = arith.addf %119, %120 : vector<8x128xf32>
    %cst_47 = arith.constant 5.000000e-01 : f32
    %122 = vector.broadcast %cst_47 : f32 to vector<8x128xf32>
    %123 = arith.mulf %122, %121 : vector<8x128xf32>
    %124 = math.tanh %123 : vector<8x128xf32>
    %cst_48 = arith.constant 5.000000e-01 : f32
    %125 = vector.broadcast %cst_48 : f32 to vector<8x128xf32>
    %126 = arith.mulf %125, %124 : vector<8x128xf32>
    %cst_49 = arith.constant 5.000000e-01 : f32
    %127 = vector.broadcast %cst_49 : f32 to vector<8x128xf32>
    %128 = arith.addf %126, %127 : vector<8x128xf32>
    %129 = vector.extract_strided_slice %105 {offsets = [0, 256], sizes = [8, 128], strides = [1, 1]} : vector<8x384xf32> to vector<8x128xf32>
    %130 = vector.extract_strided_slice %108 {offsets = [0, 256], sizes = [8, 128], strides = [1, 1]} : vector<8x384xf32> to vector<8x128xf32>
    %131 = arith.addf %130, %15 : vector<8x128xf32>
    %132 = arith.mulf %118, %131 : vector<8x128xf32>
    %133 = arith.addf %129, %132 : vector<8x128xf32>
    %134 = math.tanh %133 : vector<8x128xf32>
    %cst_50 = arith.constant 1.000000e+00 : f32
    %135 = vector.broadcast %cst_50 : f32 to vector<8x128xf32>
    %136 = arith.subf %135, %128 : vector<8x128xf32>
    %137 = arith.mulf %136, %134 : vector<8x128xf32>
    %138 = arith.mulf %128, %66 : vector<8x128xf32>
    %139 = arith.addf %137, %138 : vector<8x128xf32>
    %c16 = arith.constant 16 : index
    %c0_51 = arith.constant 0 : index
    %140 = vector.load %arg5[%c16, %c0_51] : memref<64x384xf32, #tpu.memory_space<vmem>>, vector<8x384xf32>
    %141 = arith.truncf %101 : vector<8x128xf32> to vector<8x128xbf16>
    %c0_52 = arith.constant 0 : index
    %c384_53 = arith.constant 384 : index
    %142 = vector.load %arg2[%c0_52, %c384_53] : memref<128x1792xbf16, #tpu.memory_space<vmem>>, vector<128x384xbf16>
    %cst_54 = arith.constant dense<0.000000e+00> : vector<8x384xf32>
    %143 = tpu.matmul %141, %142, %cst_54 {dimension_numbers = #tpu.dot_dimension_numbers<[1], [0], [0], [1], [0, 0, 1, 1], [], []>} : vector<8x128xbf16>, vector<128x384xbf16>, vector<8x384xf32> -> vector<8x384xf32>
    %144 = vector.extract_strided_slice %140 {offsets = [0, 0], sizes = [8, 128], strides = [1, 1]} : vector<8x384xf32> to vector<8x128xf32>
    %145 = vector.extract_strided_slice %143 {offsets = [0, 0], sizes = [8, 128], strides = [1, 1]} : vector<8x384xf32> to vector<8x128xf32>
    %146 = arith.addf %144, %145 : vector<8x128xf32>
    %cst_55 = arith.constant 5.000000e-01 : f32
    %147 = vector.broadcast %cst_55 : f32 to vector<8x128xf32>
    %148 = arith.mulf %147, %146 : vector<8x128xf32>
    %149 = math.tanh %148 : vector<8x128xf32>
    %cst_56 = arith.constant 5.000000e-01 : f32
    %150 = vector.broadcast %cst_56 : f32 to vector<8x128xf32>
    %151 = arith.mulf %150, %149 : vector<8x128xf32>
    %cst_57 = arith.constant 5.000000e-01 : f32
    %152 = vector.broadcast %cst_57 : f32 to vector<8x128xf32>
    %153 = arith.addf %151, %152 : vector<8x128xf32>
    %154 = vector.extract_strided_slice %140 {offsets = [0, 128], sizes = [8, 128], strides = [1, 1]} : vector<8x384xf32> to vector<8x128xf32>
    %155 = vector.extract_strided_slice %143 {offsets = [0, 128], sizes = [8, 128], strides = [1, 1]} : vector<8x384xf32> to vector<8x128xf32>
    %156 = arith.addf %154, %155 : vector<8x128xf32>
    %cst_58 = arith.constant 5.000000e-01 : f32
    %157 = vector.broadcast %cst_58 : f32 to vector<8x128xf32>
    %158 = arith.mulf %157, %156 : vector<8x128xf32>
    %159 = math.tanh %158 : vector<8x128xf32>
    %cst_59 = arith.constant 5.000000e-01 : f32
    %160 = vector.broadcast %cst_59 : f32 to vector<8x128xf32>
    %161 = arith.mulf %160, %159 : vector<8x128xf32>
    %cst_60 = arith.constant 5.000000e-01 : f32
    %162 = vector.broadcast %cst_60 : f32 to vector<8x128xf32>
    %163 = arith.addf %161, %162 : vector<8x128xf32>
    %164 = vector.extract_strided_slice %140 {offsets = [0, 256], sizes = [8, 128], strides = [1, 1]} : vector<8x384xf32> to vector<8x128xf32>
    %165 = vector.extract_strided_slice %143 {offsets = [0, 256], sizes = [8, 128], strides = [1, 1]} : vector<8x384xf32> to vector<8x128xf32>
    %166 = arith.addf %165, %9 : vector<8x128xf32>
    %167 = arith.mulf %153, %166 : vector<8x128xf32>
    %168 = arith.addf %164, %167 : vector<8x128xf32>
    %169 = math.tanh %168 : vector<8x128xf32>
    %cst_61 = arith.constant 1.000000e+00 : f32
    %170 = vector.broadcast %cst_61 : f32 to vector<8x128xf32>
    %171 = arith.subf %170, %163 : vector<8x128xf32>
    %172 = arith.mulf %171, %169 : vector<8x128xf32>
    %173 = arith.mulf %163, %101 : vector<8x128xf32>
    %174 = arith.addf %172, %173 : vector<8x128xf32>
    %175 = arith.truncf %174 : vector<8x128xf32> to vector<8x128xbf16>
    %c0_62 = arith.constant 0 : index
    %c768_63 = arith.constant 768 : index
    %176 = vector.load %arg2[%c0_62, %c768_63] : memref<128x1792xbf16, #tpu.memory_space<vmem>>, vector<128x384xbf16>
    %cst_64 = arith.constant dense<0.000000e+00> : vector<8x384xf32>
    %177 = tpu.matmul %175, %176, %cst_64 {dimension_numbers = #tpu.dot_dimension_numbers<[1], [0], [0], [1], [0, 0, 1, 1], [], []>} : vector<8x128xbf16>, vector<128x384xbf16>, vector<8x384xf32> -> vector<8x384xf32>
    %178 = arith.addf %177, %12 : vector<8x384xf32>
    %179 = arith.truncf %139 : vector<8x128xf32> to vector<8x128xbf16>
    %c0_65 = arith.constant 0 : index
    %c1152_66 = arith.constant 1152 : index
    %180 = vector.load %arg2[%c0_65, %c1152_66] : memref<128x1792xbf16, #tpu.memory_space<vmem>>, vector<128x384xbf16>
    %cst_67 = arith.constant dense<0.000000e+00> : vector<8x384xf32>
    %181 = tpu.matmul %179, %180, %cst_67 {dimension_numbers = #tpu.dot_dimension_numbers<[1], [0], [0], [1], [0, 0, 1, 1], [], []>} : vector<8x128xbf16>, vector<128x384xbf16>, vector<8x384xf32> -> vector<8x384xf32>
    %182 = vector.extract_strided_slice %178 {offsets = [0, 0], sizes = [8, 128], strides = [1, 1]} : vector<8x384xf32> to vector<8x128xf32>
    %183 = vector.extract_strided_slice %181 {offsets = [0, 0], sizes = [8, 128], strides = [1, 1]} : vector<8x384xf32> to vector<8x128xf32>
    %184 = arith.addf %182, %183 : vector<8x128xf32>
    %cst_68 = arith.constant 5.000000e-01 : f32
    %185 = vector.broadcast %cst_68 : f32 to vector<8x128xf32>
    %186 = arith.mulf %185, %184 : vector<8x128xf32>
    %187 = math.tanh %186 : vector<8x128xf32>
    %cst_69 = arith.constant 5.000000e-01 : f32
    %188 = vector.broadcast %cst_69 : f32 to vector<8x128xf32>
    %189 = arith.mulf %188, %187 : vector<8x128xf32>
    %cst_70 = arith.constant 5.000000e-01 : f32
    %190 = vector.broadcast %cst_70 : f32 to vector<8x128xf32>
    %191 = arith.addf %189, %190 : vector<8x128xf32>
    %192 = vector.extract_strided_slice %178 {offsets = [0, 128], sizes = [8, 128], strides = [1, 1]} : vector<8x384xf32> to vector<8x128xf32>
    %193 = vector.extract_strided_slice %181 {offsets = [0, 128], sizes = [8, 128], strides = [1, 1]} : vector<8x384xf32> to vector<8x128xf32>
    %194 = arith.addf %192, %193 : vector<8x128xf32>
    %cst_71 = arith.constant 5.000000e-01 : f32
    %195 = vector.broadcast %cst_71 : f32 to vector<8x128xf32>
    %196 = arith.mulf %195, %194 : vector<8x128xf32>
    %197 = math.tanh %196 : vector<8x128xf32>
    %cst_72 = arith.constant 5.000000e-01 : f32
    %198 = vector.broadcast %cst_72 : f32 to vector<8x128xf32>
    %199 = arith.mulf %198, %197 : vector<8x128xf32>
    %cst_73 = arith.constant 5.000000e-01 : f32
    %200 = vector.broadcast %cst_73 : f32 to vector<8x128xf32>
    %201 = arith.addf %199, %200 : vector<8x128xf32>
    %202 = vector.extract_strided_slice %178 {offsets = [0, 256], sizes = [8, 128], strides = [1, 1]} : vector<8x384xf32> to vector<8x128xf32>
    %203 = vector.extract_strided_slice %181 {offsets = [0, 256], sizes = [8, 128], strides = [1, 1]} : vector<8x384xf32> to vector<8x128xf32>
    %204 = arith.addf %203, %15 : vector<8x128xf32>
    %205 = arith.mulf %191, %204 : vector<8x128xf32>
    %206 = arith.addf %202, %205 : vector<8x128xf32>
    %207 = math.tanh %206 : vector<8x128xf32>
    %cst_74 = arith.constant 1.000000e+00 : f32
    %208 = vector.broadcast %cst_74 : f32 to vector<8x128xf32>
    %209 = arith.subf %208, %201 : vector<8x128xf32>
    %210 = arith.mulf %209, %207 : vector<8x128xf32>
    %211 = arith.mulf %201, %139 : vector<8x128xf32>
    %212 = arith.addf %210, %211 : vector<8x128xf32>
    %c24 = arith.constant 24 : index
    %c0_75 = arith.constant 0 : index
    %213 = vector.load %arg5[%c24, %c0_75] : memref<64x384xf32, #tpu.memory_space<vmem>>, vector<8x384xf32>
    %214 = arith.truncf %174 : vector<8x128xf32> to vector<8x128xbf16>
    %c0_76 = arith.constant 0 : index
    %c384_77 = arith.constant 384 : index
    %215 = vector.load %arg2[%c0_76, %c384_77] : memref<128x1792xbf16, #tpu.memory_space<vmem>>, vector<128x384xbf16>
    %cst_78 = arith.constant dense<0.000000e+00> : vector<8x384xf32>
    %216 = tpu.matmul %214, %215, %cst_78 {dimension_numbers = #tpu.dot_dimension_numbers<[1], [0], [0], [1], [0, 0, 1, 1], [], []>} : vector<8x128xbf16>, vector<128x384xbf16>, vector<8x384xf32> -> vector<8x384xf32>
    %217 = vector.extract_strided_slice %213 {offsets = [0, 0], sizes = [8, 128], strides = [1, 1]} : vector<8x384xf32> to vector<8x128xf32>
    %218 = vector.extract_strided_slice %216 {offsets = [0, 0], sizes = [8, 128], strides = [1, 1]} : vector<8x384xf32> to vector<8x128xf32>
    %219 = arith.addf %217, %218 : vector<8x128xf32>
    %cst_79 = arith.constant 5.000000e-01 : f32
    %220 = vector.broadcast %cst_79 : f32 to vector<8x128xf32>
    %221 = arith.mulf %220, %219 : vector<8x128xf32>
    %222 = math.tanh %221 : vector<8x128xf32>
    %cst_80 = arith.constant 5.000000e-01 : f32
    %223 = vector.broadcast %cst_80 : f32 to vector<8x128xf32>
    %224 = arith.mulf %223, %222 : vector<8x128xf32>
    %cst_81 = arith.constant 5.000000e-01 : f32
    %225 = vector.broadcast %cst_81 : f32 to vector<8x128xf32>
    %226 = arith.addf %224, %225 : vector<8x128xf32>
    %227 = vector.extract_strided_slice %213 {offsets = [0, 128], sizes = [8, 128], strides = [1, 1]} : vector<8x384xf32> to vector<8x128xf32>
    %228 = vector.extract_strided_slice %216 {offsets = [0, 128], sizes = [8, 128], strides = [1, 1]} : vector<8x384xf32> to vector<8x128xf32>
    %229 = arith.addf %227, %228 : vector<8x128xf32>
    %cst_82 = arith.constant 5.000000e-01 : f32
    %230 = vector.broadcast %cst_82 : f32 to vector<8x128xf32>
    %231 = arith.mulf %230, %229 : vector<8x128xf32>
    %232 = math.tanh %231 : vector<8x128xf32>
    %cst_83 = arith.constant 5.000000e-01 : f32
    %233 = vector.broadcast %cst_83 : f32 to vector<8x128xf32>
    %234 = arith.mulf %233, %232 : vector<8x128xf32>
    %cst_84 = arith.constant 5.000000e-01 : f32
    %235 = vector.broadcast %cst_84 : f32 to vector<8x128xf32>
    %236 = arith.addf %234, %235 : vector<8x128xf32>
    %237 = vector.extract_strided_slice %213 {offsets = [0, 256], sizes = [8, 128], strides = [1, 1]} : vector<8x384xf32> to vector<8x128xf32>
    %238 = vector.extract_strided_slice %216 {offsets = [0, 256], sizes = [8, 128], strides = [1, 1]} : vector<8x384xf32> to vector<8x128xf32>
    %239 = arith.addf %238, %9 : vector<8x128xf32>
    %240 = arith.mulf %226, %239 : vector<8x128xf32>
    %241 = arith.addf %237, %240 : vector<8x128xf32>
    %242 = math.tanh %241 : vector<8x128xf32>
    %cst_85 = arith.constant 1.000000e+00 : f32
    %243 = vector.broadcast %cst_85 : f32 to vector<8x128xf32>
    %244 = arith.subf %243, %236 : vector<8x128xf32>
    %245 = arith.mulf %244, %242 : vector<8x128xf32>
    %246 = arith.mulf %236, %174 : vector<8x128xf32>
    %247 = arith.addf %245, %246 : vector<8x128xf32>
    %248 = arith.truncf %247 : vector<8x128xf32> to vector<8x128xbf16>
    %c0_86 = arith.constant 0 : index
    %c768_87 = arith.constant 768 : index
    %249 = vector.load %arg2[%c0_86, %c768_87] : memref<128x1792xbf16, #tpu.memory_space<vmem>>, vector<128x384xbf16>
    %cst_88 = arith.constant dense<0.000000e+00> : vector<8x384xf32>
    %250 = tpu.matmul %248, %249, %cst_88 {dimension_numbers = #tpu.dot_dimension_numbers<[1], [0], [0], [1], [0, 0, 1, 1], [], []>} : vector<8x128xbf16>, vector<128x384xbf16>, vector<8x384xf32> -> vector<8x384xf32>
    %251 = arith.addf %250, %12 : vector<8x384xf32>
    %252 = arith.truncf %212 : vector<8x128xf32> to vector<8x128xbf16>
    %c0_89 = arith.constant 0 : index
    %c1152_90 = arith.constant 1152 : index
    %253 = vector.load %arg2[%c0_89, %c1152_90] : memref<128x1792xbf16, #tpu.memory_space<vmem>>, vector<128x384xbf16>
    %cst_91 = arith.constant dense<0.000000e+00> : vector<8x384xf32>
    %254 = tpu.matmul %252, %253, %cst_91 {dimension_numbers = #tpu.dot_dimension_numbers<[1], [0], [0], [1], [0, 0, 1, 1], [], []>} : vector<8x128xbf16>, vector<128x384xbf16>, vector<8x384xf32> -> vector<8x384xf32>
    %255 = vector.extract_strided_slice %251 {offsets = [0, 0], sizes = [8, 128], strides = [1, 1]} : vector<8x384xf32> to vector<8x128xf32>
    %256 = vector.extract_strided_slice %254 {offsets = [0, 0], sizes = [8, 128], strides = [1, 1]} : vector<8x384xf32> to vector<8x128xf32>
    %257 = arith.addf %255, %256 : vector<8x128xf32>
    %cst_92 = arith.constant 5.000000e-01 : f32
    %258 = vector.broadcast %cst_92 : f32 to vector<8x128xf32>
    %259 = arith.mulf %258, %257 : vector<8x128xf32>
    %260 = math.tanh %259 : vector<8x128xf32>
    %cst_93 = arith.constant 5.000000e-01 : f32
    %261 = vector.broadcast %cst_93 : f32 to vector<8x128xf32>
    %262 = arith.mulf %261, %260 : vector<8x128xf32>
    %cst_94 = arith.constant 5.000000e-01 : f32
    %263 = vector.broadcast %cst_94 : f32 to vector<8x128xf32>
    %264 = arith.addf %262, %263 : vector<8x128xf32>
    %265 = vector.extract_strided_slice %251 {offsets = [0, 128], sizes = [8, 128], strides = [1, 1]} : vector<8x384xf32> to vector<8x128xf32>
    %266 = vector.extract_strided_slice %254 {offsets = [0, 128], sizes = [8, 128], strides = [1, 1]} : vector<8x384xf32> to vector<8x128xf32>
    %267 = arith.addf %265, %266 : vector<8x128xf32>
    %cst_95 = arith.constant 5.000000e-01 : f32
    %268 = vector.broadcast %cst_95 : f32 to vector<8x128xf32>
    %269 = arith.mulf %268, %267 : vector<8x128xf32>
    %270 = math.tanh %269 : vector<8x128xf32>
    %cst_96 = arith.constant 5.000000e-01 : f32
    %271 = vector.broadcast %cst_96 : f32 to vector<8x128xf32>
    %272 = arith.mulf %271, %270 : vector<8x128xf32>
    %cst_97 = arith.constant 5.000000e-01 : f32
    %273 = vector.broadcast %cst_97 : f32 to vector<8x128xf32>
    %274 = arith.addf %272, %273 : vector<8x128xf32>
    %275 = vector.extract_strided_slice %251 {offsets = [0, 256], sizes = [8, 128], strides = [1, 1]} : vector<8x384xf32> to vector<8x128xf32>
    %276 = vector.extract_strided_slice %254 {offsets = [0, 256], sizes = [8, 128], strides = [1, 1]} : vector<8x384xf32> to vector<8x128xf32>
    %277 = arith.addf %276, %15 : vector<8x128xf32>
    %278 = arith.mulf %264, %277 : vector<8x128xf32>
    %279 = arith.addf %275, %278 : vector<8x128xf32>
    %280 = math.tanh %279 : vector<8x128xf32>
    %cst_98 = arith.constant 1.000000e+00 : f32
    %281 = vector.broadcast %cst_98 : f32 to vector<8x128xf32>
    %282 = arith.subf %281, %274 : vector<8x128xf32>
    %283 = arith.mulf %282, %280 : vector<8x128xf32>
    %284 = arith.mulf %274, %212 : vector<8x128xf32>
    %285 = arith.addf %283, %284 : vector<8x128xf32>
    %c32 = arith.constant 32 : index
    %c0_99 = arith.constant 0 : index
    %286 = vector.load %arg5[%c32, %c0_99] : memref<64x384xf32, #tpu.memory_space<vmem>>, vector<8x384xf32>
    %287 = arith.truncf %247 : vector<8x128xf32> to vector<8x128xbf16>
    %c0_100 = arith.constant 0 : index
    %c384_101 = arith.constant 384 : index
    %288 = vector.load %arg2[%c0_100, %c384_101] : memref<128x1792xbf16, #tpu.memory_space<vmem>>, vector<128x384xbf16>
    %cst_102 = arith.constant dense<0.000000e+00> : vector<8x384xf32>
    %289 = tpu.matmul %287, %288, %cst_102 {dimension_numbers = #tpu.dot_dimension_numbers<[1], [0], [0], [1], [0, 0, 1, 1], [], []>} : vector<8x128xbf16>, vector<128x384xbf16>, vector<8x384xf32> -> vector<8x384xf32>
    %290 = vector.extract_strided_slice %286 {offsets = [0, 0], sizes = [8, 128], strides = [1, 1]} : vector<8x384xf32> to vector<8x128xf32>
    %291 = vector.extract_strided_slice %289 {offsets = [0, 0], sizes = [8, 128], strides = [1, 1]} : vector<8x384xf32> to vector<8x128xf32>
    %292 = arith.addf %290, %291 : vector<8x128xf32>
    %cst_103 = arith.constant 5.000000e-01 : f32
    %293 = vector.broadcast %cst_103 : f32 to vector<8x128xf32>
    %294 = arith.mulf %293, %292 : vector<8x128xf32>
    %295 = math.tanh %294 : vector<8x128xf32>
    %cst_104 = arith.constant 5.000000e-01 : f32
    %296 = vector.broadcast %cst_104 : f32 to vector<8x128xf32>
    %297 = arith.mulf %296, %295 : vector<8x128xf32>
    %cst_105 = arith.constant 5.000000e-01 : f32
    %298 = vector.broadcast %cst_105 : f32 to vector<8x128xf32>
    %299 = arith.addf %297, %298 : vector<8x128xf32>
    %300 = vector.extract_strided_slice %286 {offsets = [0, 128], sizes = [8, 128], strides = [1, 1]} : vector<8x384xf32> to vector<8x128xf32>
    %301 = vector.extract_strided_slice %289 {offsets = [0, 128], sizes = [8, 128], strides = [1, 1]} : vector<8x384xf32> to vector<8x128xf32>
    %302 = arith.addf %300, %301 : vector<8x128xf32>
    %cst_106 = arith.constant 5.000000e-01 : f32
    %303 = vector.broadcast %cst_106 : f32 to vector<8x128xf32>
    %304 = arith.mulf %303, %302 : vector<8x128xf32>
    %305 = math.tanh %304 : vector<8x128xf32>
    %cst_107 = arith.constant 5.000000e-01 : f32
    %306 = vector.broadcast %cst_107 : f32 to vector<8x128xf32>
    %307 = arith.mulf %306, %305 : vector<8x128xf32>
    %cst_108 = arith.constant 5.000000e-01 : f32
    %308 = vector.broadcast %cst_108 : f32 to vector<8x128xf32>
    %309 = arith.addf %307, %308 : vector<8x128xf32>
    %310 = vector.extract_strided_slice %286 {offsets = [0, 256], sizes = [8, 128], strides = [1, 1]} : vector<8x384xf32> to vector<8x128xf32>
    %311 = vector.extract_strided_slice %289 {offsets = [0, 256], sizes = [8, 128], strides = [1, 1]} : vector<8x384xf32> to vector<8x128xf32>
    %312 = arith.addf %311, %9 : vector<8x128xf32>
    %313 = arith.mulf %299, %312 : vector<8x128xf32>
    %314 = arith.addf %310, %313 : vector<8x128xf32>
    %315 = math.tanh %314 : vector<8x128xf32>
    %cst_109 = arith.constant 1.000000e+00 : f32
    %316 = vector.broadcast %cst_109 : f32 to vector<8x128xf32>
    %317 = arith.subf %316, %309 : vector<8x128xf32>
    %318 = arith.mulf %317, %315 : vector<8x128xf32>
    %319 = arith.mulf %309, %247 : vector<8x128xf32>
    %320 = arith.addf %318, %319 : vector<8x128xf32>
    %321 = arith.truncf %320 : vector<8x128xf32> to vector<8x128xbf16>
    %c0_110 = arith.constant 0 : index
    %c768_111 = arith.constant 768 : index
    %322 = vector.load %arg2[%c0_110, %c768_111] : memref<128x1792xbf16, #tpu.memory_space<vmem>>, vector<128x384xbf16>
    %cst_112 = arith.constant dense<0.000000e+00> : vector<8x384xf32>
    %323 = tpu.matmul %321, %322, %cst_112 {dimension_numbers = #tpu.dot_dimension_numbers<[1], [0], [0], [1], [0, 0, 1, 1], [], []>} : vector<8x128xbf16>, vector<128x384xbf16>, vector<8x384xf32> -> vector<8x384xf32>
    %324 = arith.addf %323, %12 : vector<8x384xf32>
    %325 = arith.truncf %285 : vector<8x128xf32> to vector<8x128xbf16>
    %c0_113 = arith.constant 0 : index
    %c1152_114 = arith.constant 1152 : index
    %326 = vector.load %arg2[%c0_113, %c1152_114] : memref<128x1792xbf16, #tpu.memory_space<vmem>>, vector<128x384xbf16>
    %cst_115 = arith.constant dense<0.000000e+00> : vector<8x384xf32>
    %327 = tpu.matmul %325, %326, %cst_115 {dimension_numbers = #tpu.dot_dimension_numbers<[1], [0], [0], [1], [0, 0, 1, 1], [], []>} : vector<8x128xbf16>, vector<128x384xbf16>, vector<8x384xf32> -> vector<8x384xf32>
    %328 = vector.extract_strided_slice %324 {offsets = [0, 0], sizes = [8, 128], strides = [1, 1]} : vector<8x384xf32> to vector<8x128xf32>
    %329 = vector.extract_strided_slice %327 {offsets = [0, 0], sizes = [8, 128], strides = [1, 1]} : vector<8x384xf32> to vector<8x128xf32>
    %330 = arith.addf %328, %329 : vector<8x128xf32>
    %cst_116 = arith.constant 5.000000e-01 : f32
    %331 = vector.broadcast %cst_116 : f32 to vector<8x128xf32>
    %332 = arith.mulf %331, %330 : vector<8x128xf32>
    %333 = math.tanh %332 : vector<8x128xf32>
    %cst_117 = arith.constant 5.000000e-01 : f32
    %334 = vector.broadcast %cst_117 : f32 to vector<8x128xf32>
    %335 = arith.mulf %334, %333 : vector<8x128xf32>
    %cst_118 = arith.constant 5.000000e-01 : f32
    %336 = vector.broadcast %cst_118 : f32 to vector<8x128xf32>
    %337 = arith.addf %335, %336 : vector<8x128xf32>
    %338 = vector.extract_strided_slice %324 {offsets = [0, 128], sizes = [8, 128], strides = [1, 1]} : vector<8x384xf32> to vector<8x128xf32>
    %339 = vector.extract_strided_slice %327 {offsets = [0, 128], sizes = [8, 128], strides = [1, 1]} : vector<8x384xf32> to vector<8x128xf32>
    %340 = arith.addf %338, %339 : vector<8x128xf32>
    %cst_119 = arith.constant 5.000000e-01 : f32
    %341 = vector.broadcast %cst_119 : f32 to vector<8x128xf32>
    %342 = arith.mulf %341, %340 : vector<8x128xf32>
    %343 = math.tanh %342 : vector<8x128xf32>
    %cst_120 = arith.constant 5.000000e-01 : f32
    %344 = vector.broadcast %cst_120 : f32 to vector<8x128xf32>
    %345 = arith.mulf %344, %343 : vector<8x128xf32>
    %cst_121 = arith.constant 5.000000e-01 : f32
    %346 = vector.broadcast %cst_121 : f32 to vector<8x128xf32>
    %347 = arith.addf %345, %346 : vector<8x128xf32>
    %348 = vector.extract_strided_slice %324 {offsets = [0, 256], sizes = [8, 128], strides = [1, 1]} : vector<8x384xf32> to vector<8x128xf32>
    %349 = vector.extract_strided_slice %327 {offsets = [0, 256], sizes = [8, 128], strides = [1, 1]} : vector<8x384xf32> to vector<8x128xf32>
    %350 = arith.addf %349, %15 : vector<8x128xf32>
    %351 = arith.mulf %337, %350 : vector<8x128xf32>
    %352 = arith.addf %348, %351 : vector<8x128xf32>
    %353 = math.tanh %352 : vector<8x128xf32>
    %cst_122 = arith.constant 1.000000e+00 : f32
    %354 = vector.broadcast %cst_122 : f32 to vector<8x128xf32>
    %355 = arith.subf %354, %347 : vector<8x128xf32>
    %356 = arith.mulf %355, %353 : vector<8x128xf32>
    %357 = arith.mulf %347, %285 : vector<8x128xf32>
    %358 = arith.addf %356, %357 : vector<8x128xf32>
    %c40 = arith.constant 40 : index
    %c0_123 = arith.constant 0 : index
    %359 = vector.load %arg5[%c40, %c0_123] : memref<64x384xf32, #tpu.memory_space<vmem>>, vector<8x384xf32>
    %360 = arith.truncf %320 : vector<8x128xf32> to vector<8x128xbf16>
    %c0_124 = arith.constant 0 : index
    %c384_125 = arith.constant 384 : index
    %361 = vector.load %arg2[%c0_124, %c384_125] : memref<128x1792xbf16, #tpu.memory_space<vmem>>, vector<128x384xbf16>
    %cst_126 = arith.constant dense<0.000000e+00> : vector<8x384xf32>
    %362 = tpu.matmul %360, %361, %cst_126 {dimension_numbers = #tpu.dot_dimension_numbers<[1], [0], [0], [1], [0, 0, 1, 1], [], []>} : vector<8x128xbf16>, vector<128x384xbf16>, vector<8x384xf32> -> vector<8x384xf32>
    %363 = vector.extract_strided_slice %359 {offsets = [0, 0], sizes = [8, 128], strides = [1, 1]} : vector<8x384xf32> to vector<8x128xf32>
    %364 = vector.extract_strided_slice %362 {offsets = [0, 0], sizes = [8, 128], strides = [1, 1]} : vector<8x384xf32> to vector<8x128xf32>
    %365 = arith.addf %363, %364 : vector<8x128xf32>
    %cst_127 = arith.constant 5.000000e-01 : f32
    %366 = vector.broadcast %cst_127 : f32 to vector<8x128xf32>
    %367 = arith.mulf %366, %365 : vector<8x128xf32>
    %368 = math.tanh %367 : vector<8x128xf32>
    %cst_128 = arith.constant 5.000000e-01 : f32
    %369 = vector.broadcast %cst_128 : f32 to vector<8x128xf32>
    %370 = arith.mulf %369, %368 : vector<8x128xf32>
    %cst_129 = arith.constant 5.000000e-01 : f32
    %371 = vector.broadcast %cst_129 : f32 to vector<8x128xf32>
    %372 = arith.addf %370, %371 : vector<8x128xf32>
    %373 = vector.extract_strided_slice %359 {offsets = [0, 128], sizes = [8, 128], strides = [1, 1]} : vector<8x384xf32> to vector<8x128xf32>
    %374 = vector.extract_strided_slice %362 {offsets = [0, 128], sizes = [8, 128], strides = [1, 1]} : vector<8x384xf32> to vector<8x128xf32>
    %375 = arith.addf %373, %374 : vector<8x128xf32>
    %cst_130 = arith.constant 5.000000e-01 : f32
    %376 = vector.broadcast %cst_130 : f32 to vector<8x128xf32>
    %377 = arith.mulf %376, %375 : vector<8x128xf32>
    %378 = math.tanh %377 : vector<8x128xf32>
    %cst_131 = arith.constant 5.000000e-01 : f32
    %379 = vector.broadcast %cst_131 : f32 to vector<8x128xf32>
    %380 = arith.mulf %379, %378 : vector<8x128xf32>
    %cst_132 = arith.constant 5.000000e-01 : f32
    %381 = vector.broadcast %cst_132 : f32 to vector<8x128xf32>
    %382 = arith.addf %380, %381 : vector<8x128xf32>
    %383 = vector.extract_strided_slice %359 {offsets = [0, 256], sizes = [8, 128], strides = [1, 1]} : vector<8x384xf32> to vector<8x128xf32>
    %384 = vector.extract_strided_slice %362 {offsets = [0, 256], sizes = [8, 128], strides = [1, 1]} : vector<8x384xf32> to vector<8x128xf32>
    %385 = arith.addf %384, %9 : vector<8x128xf32>
    %386 = arith.mulf %372, %385 : vector<8x128xf32>
    %387 = arith.addf %383, %386 : vector<8x128xf32>
    %388 = math.tanh %387 : vector<8x128xf32>
    %cst_133 = arith.constant 1.000000e+00 : f32
    %389 = vector.broadcast %cst_133 : f32 to vector<8x128xf32>
    %390 = arith.subf %389, %382 : vector<8x128xf32>
    %391 = arith.mulf %390, %388 : vector<8x128xf32>
    %392 = arith.mulf %382, %320 : vector<8x128xf32>
    %393 = arith.addf %391, %392 : vector<8x128xf32>
    %394 = arith.truncf %393 : vector<8x128xf32> to vector<8x128xbf16>
    %c0_134 = arith.constant 0 : index
    %c768_135 = arith.constant 768 : index
    %395 = vector.load %arg2[%c0_134, %c768_135] : memref<128x1792xbf16, #tpu.memory_space<vmem>>, vector<128x384xbf16>
    %cst_136 = arith.constant dense<0.000000e+00> : vector<8x384xf32>
    %396 = tpu.matmul %394, %395, %cst_136 {dimension_numbers = #tpu.dot_dimension_numbers<[1], [0], [0], [1], [0, 0, 1, 1], [], []>} : vector<8x128xbf16>, vector<128x384xbf16>, vector<8x384xf32> -> vector<8x384xf32>
    %397 = arith.addf %396, %12 : vector<8x384xf32>
    %398 = arith.truncf %358 : vector<8x128xf32> to vector<8x128xbf16>
    %c0_137 = arith.constant 0 : index
    %c1152_138 = arith.constant 1152 : index
    %399 = vector.load %arg2[%c0_137, %c1152_138] : memref<128x1792xbf16, #tpu.memory_space<vmem>>, vector<128x384xbf16>
    %cst_139 = arith.constant dense<0.000000e+00> : vector<8x384xf32>
    %400 = tpu.matmul %398, %399, %cst_139 {dimension_numbers = #tpu.dot_dimension_numbers<[1], [0], [0], [1], [0, 0, 1, 1], [], []>} : vector<8x128xbf16>, vector<128x384xbf16>, vector<8x384xf32> -> vector<8x384xf32>
    %401 = vector.extract_strided_slice %397 {offsets = [0, 0], sizes = [8, 128], strides = [1, 1]} : vector<8x384xf32> to vector<8x128xf32>
    %402 = vector.extract_strided_slice %400 {offsets = [0, 0], sizes = [8, 128], strides = [1, 1]} : vector<8x384xf32> to vector<8x128xf32>
    %403 = arith.addf %401, %402 : vector<8x128xf32>
    %cst_140 = arith.constant 5.000000e-01 : f32
    %404 = vector.broadcast %cst_140 : f32 to vector<8x128xf32>
    %405 = arith.mulf %404, %403 : vector<8x128xf32>
    %406 = math.tanh %405 : vector<8x128xf32>
    %cst_141 = arith.constant 5.000000e-01 : f32
    %407 = vector.broadcast %cst_141 : f32 to vector<8x128xf32>
    %408 = arith.mulf %407, %406 : vector<8x128xf32>
    %cst_142 = arith.constant 5.000000e-01 : f32
    %409 = vector.broadcast %cst_142 : f32 to vector<8x128xf32>
    %410 = arith.addf %408, %409 : vector<8x128xf32>
    %411 = vector.extract_strided_slice %397 {offsets = [0, 128], sizes = [8, 128], strides = [1, 1]} : vector<8x384xf32> to vector<8x128xf32>
    %412 = vector.extract_strided_slice %400 {offsets = [0, 128], sizes = [8, 128], strides = [1, 1]} : vector<8x384xf32> to vector<8x128xf32>
    %413 = arith.addf %411, %412 : vector<8x128xf32>
    %cst_143 = arith.constant 5.000000e-01 : f32
    %414 = vector.broadcast %cst_143 : f32 to vector<8x128xf32>
    %415 = arith.mulf %414, %413 : vector<8x128xf32>
    %416 = math.tanh %415 : vector<8x128xf32>
    %cst_144 = arith.constant 5.000000e-01 : f32
    %417 = vector.broadcast %cst_144 : f32 to vector<8x128xf32>
    %418 = arith.mulf %417, %416 : vector<8x128xf32>
    %cst_145 = arith.constant 5.000000e-01 : f32
    %419 = vector.broadcast %cst_145 : f32 to vector<8x128xf32>
    %420 = arith.addf %418, %419 : vector<8x128xf32>
    %421 = vector.extract_strided_slice %397 {offsets = [0, 256], sizes = [8, 128], strides = [1, 1]} : vector<8x384xf32> to vector<8x128xf32>
    %422 = vector.extract_strided_slice %400 {offsets = [0, 256], sizes = [8, 128], strides = [1, 1]} : vector<8x384xf32> to vector<8x128xf32>
    %423 = arith.addf %422, %15 : vector<8x128xf32>
    %424 = arith.mulf %410, %423 : vector<8x128xf32>
    %425 = arith.addf %421, %424 : vector<8x128xf32>
    %426 = math.tanh %425 : vector<8x128xf32>
    %cst_146 = arith.constant 1.000000e+00 : f32
    %427 = vector.broadcast %cst_146 : f32 to vector<8x128xf32>
    %428 = arith.subf %427, %420 : vector<8x128xf32>
    %429 = arith.mulf %428, %426 : vector<8x128xf32>
    %430 = arith.mulf %420, %358 : vector<8x128xf32>
    %431 = arith.addf %429, %430 : vector<8x128xf32>
    %c48 = arith.constant 48 : index
    %c0_147 = arith.constant 0 : index
    %432 = vector.load %arg5[%c48, %c0_147] : memref<64x384xf32, #tpu.memory_space<vmem>>, vector<8x384xf32>
    %433 = arith.truncf %393 : vector<8x128xf32> to vector<8x128xbf16>
    %c0_148 = arith.constant 0 : index
    %c384_149 = arith.constant 384 : index
    %434 = vector.load %arg2[%c0_148, %c384_149] : memref<128x1792xbf16, #tpu.memory_space<vmem>>, vector<128x384xbf16>
    %cst_150 = arith.constant dense<0.000000e+00> : vector<8x384xf32>
    %435 = tpu.matmul %433, %434, %cst_150 {dimension_numbers = #tpu.dot_dimension_numbers<[1], [0], [0], [1], [0, 0, 1, 1], [], []>} : vector<8x128xbf16>, vector<128x384xbf16>, vector<8x384xf32> -> vector<8x384xf32>
    %436 = vector.extract_strided_slice %432 {offsets = [0, 0], sizes = [8, 128], strides = [1, 1]} : vector<8x384xf32> to vector<8x128xf32>
    %437 = vector.extract_strided_slice %435 {offsets = [0, 0], sizes = [8, 128], strides = [1, 1]} : vector<8x384xf32> to vector<8x128xf32>
    %438 = arith.addf %436, %437 : vector<8x128xf32>
    %cst_151 = arith.constant 5.000000e-01 : f32
    %439 = vector.broadcast %cst_151 : f32 to vector<8x128xf32>
    %440 = arith.mulf %439, %438 : vector<8x128xf32>
    %441 = math.tanh %440 : vector<8x128xf32>
    %cst_152 = arith.constant 5.000000e-01 : f32
    %442 = vector.broadcast %cst_152 : f32 to vector<8x128xf32>
    %443 = arith.mulf %442, %441 : vector<8x128xf32>
    %cst_153 = arith.constant 5.000000e-01 : f32
    %444 = vector.broadcast %cst_153 : f32 to vector<8x128xf32>
    %445 = arith.addf %443, %444 : vector<8x128xf32>
    %446 = vector.extract_strided_slice %432 {offsets = [0, 128], sizes = [8, 128], strides = [1, 1]} : vector<8x384xf32> to vector<8x128xf32>
    %447 = vector.extract_strided_slice %435 {offsets = [0, 128], sizes = [8, 128], strides = [1, 1]} : vector<8x384xf32> to vector<8x128xf32>
    %448 = arith.addf %446, %447 : vector<8x128xf32>
    %cst_154 = arith.constant 5.000000e-01 : f32
    %449 = vector.broadcast %cst_154 : f32 to vector<8x128xf32>
    %450 = arith.mulf %449, %448 : vector<8x128xf32>
    %451 = math.tanh %450 : vector<8x128xf32>
    %cst_155 = arith.constant 5.000000e-01 : f32
    %452 = vector.broadcast %cst_155 : f32 to vector<8x128xf32>
    %453 = arith.mulf %452, %451 : vector<8x128xf32>
    %cst_156 = arith.constant 5.000000e-01 : f32
    %454 = vector.broadcast %cst_156 : f32 to vector<8x128xf32>
    %455 = arith.addf %453, %454 : vector<8x128xf32>
    %456 = vector.extract_strided_slice %432 {offsets = [0, 256], sizes = [8, 128], strides = [1, 1]} : vector<8x384xf32> to vector<8x128xf32>
    %457 = vector.extract_strided_slice %435 {offsets = [0, 256], sizes = [8, 128], strides = [1, 1]} : vector<8x384xf32> to vector<8x128xf32>
    %458 = arith.addf %457, %9 : vector<8x128xf32>
    %459 = arith.mulf %445, %458 : vector<8x128xf32>
    %460 = arith.addf %456, %459 : vector<8x128xf32>
    %461 = math.tanh %460 : vector<8x128xf32>
    %cst_157 = arith.constant 1.000000e+00 : f32
    %462 = vector.broadcast %cst_157 : f32 to vector<8x128xf32>
    %463 = arith.subf %462, %455 : vector<8x128xf32>
    %464 = arith.mulf %463, %461 : vector<8x128xf32>
    %465 = arith.mulf %455, %393 : vector<8x128xf32>
    %466 = arith.addf %464, %465 : vector<8x128xf32>
    %467 = arith.truncf %466 : vector<8x128xf32> to vector<8x128xbf16>
    %c0_158 = arith.constant 0 : index
    %c768_159 = arith.constant 768 : index
    %468 = vector.load %arg2[%c0_158, %c768_159] : memref<128x1792xbf16, #tpu.memory_space<vmem>>, vector<128x384xbf16>
    %cst_160 = arith.constant dense<0.000000e+00> : vector<8x384xf32>
    %469 = tpu.matmul %467, %468, %cst_160 {dimension_numbers = #tpu.dot_dimension_numbers<[1], [0], [0], [1], [0, 0, 1, 1], [], []>} : vector<8x128xbf16>, vector<128x384xbf16>, vector<8x384xf32> -> vector<8x384xf32>
    %470 = arith.addf %469, %12 : vector<8x384xf32>
    %471 = arith.truncf %431 : vector<8x128xf32> to vector<8x128xbf16>
    %c0_161 = arith.constant 0 : index
    %c1152_162 = arith.constant 1152 : index
    %472 = vector.load %arg2[%c0_161, %c1152_162] : memref<128x1792xbf16, #tpu.memory_space<vmem>>, vector<128x384xbf16>
    %cst_163 = arith.constant dense<0.000000e+00> : vector<8x384xf32>
    %473 = tpu.matmul %471, %472, %cst_163 {dimension_numbers = #tpu.dot_dimension_numbers<[1], [0], [0], [1], [0, 0, 1, 1], [], []>} : vector<8x128xbf16>, vector<128x384xbf16>, vector<8x384xf32> -> vector<8x384xf32>
    %474 = vector.extract_strided_slice %470 {offsets = [0, 0], sizes = [8, 128], strides = [1, 1]} : vector<8x384xf32> to vector<8x128xf32>
    %475 = vector.extract_strided_slice %473 {offsets = [0, 0], sizes = [8, 128], strides = [1, 1]} : vector<8x384xf32> to vector<8x128xf32>
    %476 = arith.addf %474, %475 : vector<8x128xf32>
    %cst_164 = arith.constant 5.000000e-01 : f32
    %477 = vector.broadcast %cst_164 : f32 to vector<8x128xf32>
    %478 = arith.mulf %477, %476 : vector<8x128xf32>
    %479 = math.tanh %478 : vector<8x128xf32>
    %cst_165 = arith.constant 5.000000e-01 : f32
    %480 = vector.broadcast %cst_165 : f32 to vector<8x128xf32>
    %481 = arith.mulf %480, %479 : vector<8x128xf32>
    %cst_166 = arith.constant 5.000000e-01 : f32
    %482 = vector.broadcast %cst_166 : f32 to vector<8x128xf32>
    %483 = arith.addf %481, %482 : vector<8x128xf32>
    %484 = vector.extract_strided_slice %470 {offsets = [0, 128], sizes = [8, 128], strides = [1, 1]} : vector<8x384xf32> to vector<8x128xf32>
    %485 = vector.extract_strided_slice %473 {offsets = [0, 128], sizes = [8, 128], strides = [1, 1]} : vector<8x384xf32> to vector<8x128xf32>
    %486 = arith.addf %484, %485 : vector<8x128xf32>
    %cst_167 = arith.constant 5.000000e-01 : f32
    %487 = vector.broadcast %cst_167 : f32 to vector<8x128xf32>
    %488 = arith.mulf %487, %486 : vector<8x128xf32>
    %489 = math.tanh %488 : vector<8x128xf32>
    %cst_168 = arith.constant 5.000000e-01 : f32
    %490 = vector.broadcast %cst_168 : f32 to vector<8x128xf32>
    %491 = arith.mulf %490, %489 : vector<8x128xf32>
    %cst_169 = arith.constant 5.000000e-01 : f32
    %492 = vector.broadcast %cst_169 : f32 to vector<8x128xf32>
    %493 = arith.addf %491, %492 : vector<8x128xf32>
    %494 = vector.extract_strided_slice %470 {offsets = [0, 256], sizes = [8, 128], strides = [1, 1]} : vector<8x384xf32> to vector<8x128xf32>
    %495 = vector.extract_strided_slice %473 {offsets = [0, 256], sizes = [8, 128], strides = [1, 1]} : vector<8x384xf32> to vector<8x128xf32>
    %496 = arith.addf %495, %15 : vector<8x128xf32>
    %497 = arith.mulf %483, %496 : vector<8x128xf32>
    %498 = arith.addf %494, %497 : vector<8x128xf32>
    %499 = math.tanh %498 : vector<8x128xf32>
    %cst_170 = arith.constant 1.000000e+00 : f32
    %500 = vector.broadcast %cst_170 : f32 to vector<8x128xf32>
    %501 = arith.subf %500, %493 : vector<8x128xf32>
    %502 = arith.mulf %501, %499 : vector<8x128xf32>
    %503 = arith.mulf %493, %431 : vector<8x128xf32>
    %504 = arith.addf %502, %503 : vector<8x128xf32>
    %c56 = arith.constant 56 : index
    %c0_171 = arith.constant 0 : index
    %505 = vector.load %arg5[%c56, %c0_171] : memref<64x384xf32, #tpu.memory_space<vmem>>, vector<8x384xf32>
    %506 = arith.truncf %466 : vector<8x128xf32> to vector<8x128xbf16>
    %c0_172 = arith.constant 0 : index
    %c384_173 = arith.constant 384 : index
    %507 = vector.load %arg2[%c0_172, %c384_173] : memref<128x1792xbf16, #tpu.memory_space<vmem>>, vector<128x384xbf16>
    %cst_174 = arith.constant dense<0.000000e+00> : vector<8x384xf32>
    %508 = tpu.matmul %506, %507, %cst_174 {dimension_numbers = #tpu.dot_dimension_numbers<[1], [0], [0], [1], [0, 0, 1, 1], [], []>} : vector<8x128xbf16>, vector<128x384xbf16>, vector<8x384xf32> -> vector<8x384xf32>
    %509 = vector.extract_strided_slice %505 {offsets = [0, 0], sizes = [8, 128], strides = [1, 1]} : vector<8x384xf32> to vector<8x128xf32>
    %510 = vector.extract_strided_slice %508 {offsets = [0, 0], sizes = [8, 128], strides = [1, 1]} : vector<8x384xf32> to vector<8x128xf32>
    %511 = arith.addf %509, %510 : vector<8x128xf32>
    %cst_175 = arith.constant 5.000000e-01 : f32
    %512 = vector.broadcast %cst_175 : f32 to vector<8x128xf32>
    %513 = arith.mulf %512, %511 : vector<8x128xf32>
    %514 = math.tanh %513 : vector<8x128xf32>
    %cst_176 = arith.constant 5.000000e-01 : f32
    %515 = vector.broadcast %cst_176 : f32 to vector<8x128xf32>
    %516 = arith.mulf %515, %514 : vector<8x128xf32>
    %cst_177 = arith.constant 5.000000e-01 : f32
    %517 = vector.broadcast %cst_177 : f32 to vector<8x128xf32>
    %518 = arith.addf %516, %517 : vector<8x128xf32>
    %519 = vector.extract_strided_slice %505 {offsets = [0, 128], sizes = [8, 128], strides = [1, 1]} : vector<8x384xf32> to vector<8x128xf32>
    %520 = vector.extract_strided_slice %508 {offsets = [0, 128], sizes = [8, 128], strides = [1, 1]} : vector<8x384xf32> to vector<8x128xf32>
    %521 = arith.addf %519, %520 : vector<8x128xf32>
    %cst_178 = arith.constant 5.000000e-01 : f32
    %522 = vector.broadcast %cst_178 : f32 to vector<8x128xf32>
    %523 = arith.mulf %522, %521 : vector<8x128xf32>
    %524 = math.tanh %523 : vector<8x128xf32>
    %cst_179 = arith.constant 5.000000e-01 : f32
    %525 = vector.broadcast %cst_179 : f32 to vector<8x128xf32>
    %526 = arith.mulf %525, %524 : vector<8x128xf32>
    %cst_180 = arith.constant 5.000000e-01 : f32
    %527 = vector.broadcast %cst_180 : f32 to vector<8x128xf32>
    %528 = arith.addf %526, %527 : vector<8x128xf32>
    %529 = vector.extract_strided_slice %505 {offsets = [0, 256], sizes = [8, 128], strides = [1, 1]} : vector<8x384xf32> to vector<8x128xf32>
    %530 = vector.extract_strided_slice %508 {offsets = [0, 256], sizes = [8, 128], strides = [1, 1]} : vector<8x384xf32> to vector<8x128xf32>
    %531 = arith.addf %530, %9 : vector<8x128xf32>
    %532 = arith.mulf %518, %531 : vector<8x128xf32>
    %533 = arith.addf %529, %532 : vector<8x128xf32>
    %534 = math.tanh %533 : vector<8x128xf32>
    %cst_181 = arith.constant 1.000000e+00 : f32
    %535 = vector.broadcast %cst_181 : f32 to vector<8x128xf32>
    %536 = arith.subf %535, %528 : vector<8x128xf32>
    %537 = arith.mulf %536, %534 : vector<8x128xf32>
    %538 = arith.mulf %528, %466 : vector<8x128xf32>
    %539 = arith.addf %537, %538 : vector<8x128xf32>
    %540 = arith.truncf %539 : vector<8x128xf32> to vector<8x128xbf16>
    %c0_182 = arith.constant 0 : index
    %c768_183 = arith.constant 768 : index
    %541 = vector.load %arg2[%c0_182, %c768_183] : memref<128x1792xbf16, #tpu.memory_space<vmem>>, vector<128x384xbf16>
    %cst_184 = arith.constant dense<0.000000e+00> : vector<8x384xf32>
    %542 = tpu.matmul %540, %541, %cst_184 {dimension_numbers = #tpu.dot_dimension_numbers<[1], [0], [0], [1], [0, 0, 1, 1], [], []>} : vector<8x128xbf16>, vector<128x384xbf16>, vector<8x384xf32> -> vector<8x384xf32>
    %543 = arith.addf %542, %12 : vector<8x384xf32>
    %544 = arith.truncf %504 : vector<8x128xf32> to vector<8x128xbf16>
    %c0_185 = arith.constant 0 : index
    %c1152_186 = arith.constant 1152 : index
    %545 = vector.load %arg2[%c0_185, %c1152_186] : memref<128x1792xbf16, #tpu.memory_space<vmem>>, vector<128x384xbf16>
    %cst_187 = arith.constant dense<0.000000e+00> : vector<8x384xf32>
    %546 = tpu.matmul %544, %545, %cst_187 {dimension_numbers = #tpu.dot_dimension_numbers<[1], [0], [0], [1], [0, 0, 1, 1], [], []>} : vector<8x128xbf16>, vector<128x384xbf16>, vector<8x384xf32> -> vector<8x384xf32>
    %547 = vector.extract_strided_slice %543 {offsets = [0, 0], sizes = [8, 128], strides = [1, 1]} : vector<8x384xf32> to vector<8x128xf32>
    %548 = vector.extract_strided_slice %546 {offsets = [0, 0], sizes = [8, 128], strides = [1, 1]} : vector<8x384xf32> to vector<8x128xf32>
    %549 = arith.addf %547, %548 : vector<8x128xf32>
    %cst_188 = arith.constant 5.000000e-01 : f32
    %550 = vector.broadcast %cst_188 : f32 to vector<8x128xf32>
    %551 = arith.mulf %550, %549 : vector<8x128xf32>
    %552 = math.tanh %551 : vector<8x128xf32>
    %cst_189 = arith.constant 5.000000e-01 : f32
    %553 = vector.broadcast %cst_189 : f32 to vector<8x128xf32>
    %554 = arith.mulf %553, %552 : vector<8x128xf32>
    %cst_190 = arith.constant 5.000000e-01 : f32
    %555 = vector.broadcast %cst_190 : f32 to vector<8x128xf32>
    %556 = arith.addf %554, %555 : vector<8x128xf32>
    %557 = vector.extract_strided_slice %543 {offsets = [0, 128], sizes = [8, 128], strides = [1, 1]} : vector<8x384xf32> to vector<8x128xf32>
    %558 = vector.extract_strided_slice %546 {offsets = [0, 128], sizes = [8, 128], strides = [1, 1]} : vector<8x384xf32> to vector<8x128xf32>
    %559 = arith.addf %557, %558 : vector<8x128xf32>
    %cst_191 = arith.constant 5.000000e-01 : f32
    %560 = vector.broadcast %cst_191 : f32 to vector<8x128xf32>
    %561 = arith.mulf %560, %559 : vector<8x128xf32>
    %562 = math.tanh %561 : vector<8x128xf32>
    %cst_192 = arith.constant 5.000000e-01 : f32
    %563 = vector.broadcast %cst_192 : f32 to vector<8x128xf32>
    %564 = arith.mulf %563, %562 : vector<8x128xf32>
    %cst_193 = arith.constant 5.000000e-01 : f32
    %565 = vector.broadcast %cst_193 : f32 to vector<8x128xf32>
    %566 = arith.addf %564, %565 : vector<8x128xf32>
    %567 = vector.extract_strided_slice %543 {offsets = [0, 256], sizes = [8, 128], strides = [1, 1]} : vector<8x384xf32> to vector<8x128xf32>
    %568 = vector.extract_strided_slice %546 {offsets = [0, 256], sizes = [8, 128], strides = [1, 1]} : vector<8x384xf32> to vector<8x128xf32>
    %569 = arith.addf %568, %15 : vector<8x128xf32>
    %570 = arith.mulf %556, %569 : vector<8x128xf32>
    %571 = arith.addf %567, %570 : vector<8x128xf32>
    %572 = math.tanh %571 : vector<8x128xf32>
    %cst_194 = arith.constant 1.000000e+00 : f32
    %573 = vector.broadcast %cst_194 : f32 to vector<8x128xf32>
    %574 = arith.subf %573, %566 : vector<8x128xf32>
    %575 = arith.mulf %574, %572 : vector<8x128xf32>
    %576 = arith.mulf %566, %504 : vector<8x128xf32>
    %577 = arith.addf %575, %576 : vector<8x128xf32>
    %578 = arith.truncf %577 : vector<8x128xf32> to vector<8x128xbf16>
    %c0_195 = arith.constant 0 : index
    %c1536 = arith.constant 1536 : index
    %579 = vector.load %arg2[%c0_195, %c1536] : memref<128x1792xbf16, #tpu.memory_space<vmem>>, vector<128x128xbf16>
    %cst_196 = arith.constant dense<0.000000e+00> : vector<8x128xf32>
    %580 = tpu.matmul %578, %579, %cst_196 {dimension_numbers = #tpu.dot_dimension_numbers<[1], [0], [0], [1], [0, 0, 1, 1], [], []>} : vector<8x128xbf16>, vector<128x128xbf16>, vector<8x128xf32> -> vector<8x128xf32>
    %c0_197 = arith.constant 0 : index
    %c1024 = arith.constant 1024 : index
    %581 = vector.load %arg3[%c0_197, %c1024] : memref<1x1280xf32, #tpu.memory_space<vmem>>, vector<1x128xf32>
    %582 = vector.broadcast %581 : vector<1x128xf32> to vector<8x128xf32>
    %583 = arith.addf %580, %582 : vector<8x128xf32>
    %cst_198 = arith.constant 0.000000e+00 : f32
    %584 = vector.broadcast %cst_198 : f32 to vector<8x128xf32>
    %585 = arith.maximumf %583, %584 : vector<8x128xf32>
    %586 = arith.truncf %585 : vector<8x128xf32> to vector<8x128xbf16>
    %c0_199 = arith.constant 0 : index
    %c1664 = arith.constant 1664 : index
    %587 = vector.load %arg2[%c0_199, %c1664] : memref<128x1792xbf16, #tpu.memory_space<vmem>>, vector<128x128xbf16>
    %cst_200 = arith.constant dense<0.000000e+00> : vector<8x128xf32>
    %588 = tpu.matmul %586, %587, %cst_200 {dimension_numbers = #tpu.dot_dimension_numbers<[1], [0], [0], [1], [0, 0, 1, 1], [], []>} : vector<8x128xbf16>, vector<128x128xbf16>, vector<8x128xf32> -> vector<8x128xf32>
    %c0_201 = arith.constant 0 : index
    %c1152_202 = arith.constant 1152 : index
    %589 = vector.load %arg3[%c0_201, %c1152_202] : memref<1x1280xf32, #tpu.memory_space<vmem>>, vector<1x128xf32>
    %590 = vector.broadcast %589 : vector<1x128xf32> to vector<8x128xf32>
    %591 = arith.addf %588, %590 : vector<8x128xf32>
    %c0_203 = arith.constant 0 : index
    %c0_204 = arith.constant 0 : index
    %592 = vector.load %arg4[%c0_203, %c0_204] : memref<8x128xf32, #tpu.memory_space<vmem>>, vector<8x128xf32>
    tpu.vector_store %arg4[%c0_203, %c0_204], %591 {strides = array<i32>} : memref<8x128xf32, #tpu.memory_space<vmem>>, vector<8x128xf32>,
    return
  }
  func.func @transform_0(%arg0: i32) -> (i32, i32) {
    %c0_i32 = arith.constant 0 : i32
    %c0_i32_0 = arith.constant 0 : i32
    return %arg0, %c0_i32 : i32, i32
  }
  func.func @transform_1(%arg0: i32) -> (i32, i32) {
    %c0_i32 = arith.constant 0 : i32
    %c0_i32_0 = arith.constant 0 : i32
    %c0_i32_1 = arith.constant 0 : i32
    return %c0_i32, %c0_i32_0 : i32, i32
  }
  func.func @transform_2(%arg0: i32) -> (i32, i32) {
    %c0_i32 = arith.constant 0 : i32
    %c0_i32_0 = arith.constant 0 : i32
    %c0_i32_1 = arith.constant 0 : i32
    return %c0_i32, %c0_i32_0 : i32, i32
  }
  func.func @transform_3(%arg0: i32) -> (i32, i32) {
    %c0_i32 = arith.constant 0 : i32
    %c0_i32_0 = arith.constant 0 : i32
    return %arg0, %c0_i32 : i32, i32
  }
}

</mosaic_0001>

<bundles_post_ra>
// kernel: tpu_custom_call.1
= control target key start
LH: loop header
LB: loop body
LE: loop exit
PB: predicated region body
PF: predicated region fallthrough
CT: control target
= control target key end

     0   :  { %8 = vsyncpa [#allocation4], 0  ;;  %s3950_s0 = inlined_call_operand.hbm [shape: bf16[64,128], index: 0, kind: input, shape index: {}]   ;;  %s3951_s1 = inlined_call_operand.hbm [shape: bf16[128,1792], index: 1, kind: input, shape index: {}]   ;;  %s3952_s2 = inlined_call_operand.hbm [shape: f32[1,1280], index: 2, kind: input, shape index: {}]   ;;  %s3953_s3 = inlined_call_operand.hbm [shape: f32[8,128], index: 3, kind: output, shape index: {}]  }
   0x1   :  { %9 = vsyncpa [#allocation7], 0  ;;  %s28_s14 = sshll.u32 %s3951_s1, 4  ;;  %s29_s14 = int_to_ptr.hbm [resolvable:$true] %s28_s14 }
   0x2   :  { %10 = vsyncpa [#allocation5], 0  ;;  %s3019_s15 = smov [#allocation6]   ;;  %s15_s19 = sshll.u32 %s3950_s0, 4  ;;  %s16_s19 = int_to_ptr.hbm [resolvable:$true] %s15_s19 }
   0x3   :  { %s30_s16 = sshll.u32 %s3019_s15, 4  ;;  %s3020_s20 = smov 896   ;;  %s31_s16 = int_to_ptr.vmem [resolvable:$true] %s30_s16 }
   0x4   :  { %s3021_s21 = smov 56   ;;  %s3022_s22 = smov [#allocation3]  }
   0x5   :  { %36 = dma.hbm_to_vmem [thread:$0]  %s29_s14, 14336, %s31_s16, [#allocation7], %s3020_s20, %s3020_s20, %s3021_s21  }
   0x6   :  { %s17_s23 = sshll.u32 %s3022_s22, 4  ;;  %s3023_s24 = smov 64   ;;  %s18_s23 = int_to_ptr.vmem [resolvable:$true] %s17_s23 }
   0x7   :  { %s3024_s25 = smov 4   ;;  %s42_s27 = sshll.u32 %s3952_s2, 4  ;;  %s43_s27 = int_to_ptr.hbm [resolvable:$true] %s42_s27 }
   0x8   :  { %23 = dma.hbm_to_vmem [thread:$0]  %s16_s19, 512, %s18_s23, [#allocation4], %s3023_s24, %s3023_s24, %s3024_s25  }
   0x9   :  { %s3025_s28 = smov [#allocation8]  }
   0xa   :  { %s44_s29 = sshll.u32 %s3025_s28, 4  ;;  %s45_s29 = int_to_ptr.vmem [resolvable:$true] %s44_s29 }
   0xb   :  { %47 = dma.hbm_to_vmem [thread:$0]  %s43_s27, 160, %s45_s29, [#allocation7]  }
   0xc   :  { %3013 = dma.done.wait [#allocation4], 512  }
   0xd   :  { %3014 = vsyncadd [#allocation4], 4294966784 }
   0xe   :  { %3015 = dma.done.wait [#allocation7], 14496  }
   0xf   :  { %3016 = vsyncadd [#allocation7], 4294952800  ;;  %v2328_v0 = vld [vmem:[#allocation6 + $0x310] sm:$0xf]  ;;  %v2716_v1 = vld [vmem:[#allocation6 + $0x344] sm:$0xf0] }
  0x10   :  { %v2715_v2 = vld [vmem:[#allocation6 + $0x314] sm:$0xf]  ;;  %v2329_v3 = vor.u32 %v2716_v1, %v2328_v0  ;;  %v2330_v4 = vld [vmem:[#allocation6 + $0x348] sm:$0xf0]  ;;  %v2336_v5 = vld [vmem:[#allocation6 + $0x318] sm:$0xf] }
  0x11   :  { %v2717_v6 = vld [vmem:[#allocation6 + $0x34c] sm:$0xf0]  ;;  %v2333_v7 = vor.u32 %v2715_v2, %v2330_v4  ;;  %v2316_v9 = vld [vmem:[#allocation6 + $0x2a0] sm:$0xf]  ;;  %v2713_v10 = vld [vmem:[#allocation6 + $0x2d4] sm:$0xf0] }
  0x12   :  { %v2337_v8 = vor.u32 %v2717_v6, %v2336_v5  ;;  %v2712_v11 = vld [vmem:[#allocation6 + $0x2a4] sm:$0xf]  ;;  %260 = vmatpush.bf16.msra.mxu0 %v2329_v3  ;;  %v2317_v12 = vor.u32 %v2713_v10, %v2316_v9  ;;  %v2318_v13 = vld [vmem:[#allocation6 + $0x2d8] sm:$0xf0]  ;;  %v2324_v14 = vld [vmem:[#allocation6 + $0x2a8] sm:$0xf] }
  0x13   :  { %v2714_v15 = vld [vmem:[#allocation6 + $0x2dc] sm:$0xf0]  ;;  %289 = vmatpush.bf16.msra.mxu1 %v2333_v7  ;;  %v2321_v16 = vor.u32 %v2712_v11, %v2318_v13  ;;  %v2304_v18 = vld [vmem:[#allocation6 + $0x230] sm:$0xf]  ;;  %v2710_v19 = vld [vmem:[#allocation6 + $0x264] sm:$0xf0] }
  0x14   :  { %318 = vmatpush.bf16.msra.mxu2 %v2337_v8  ;;  %v2325_v17 = vor.u32 %v2714_v15, %v2324_v14  ;;  %v2709_v20 = vld [vmem:[#allocation6 + $0x234] sm:$0xf]  ;;  %v2306_v21 = vld [vmem:[#allocation6 + $0x268] sm:$0xf0]  ;;  %v2312_v22 = vld [vmem:[#allocation6 + $0x238] sm:$0xf]  ;;  %v2305_v24 = vor.u32 %v2710_v19, %v2304_v18 }
  0x15   :  { %v2711_v23 = vld [vmem:[#allocation6 + $0x26c] sm:$0xf0]  ;;  %v2309_v25 = vor.u32 %v2709_v20, %v2306_v21  ;;  %v2292_v27 = vld [vmem:[#allocation6 + $0x1c0] sm:$0xf]  ;;  %v2707_v28 = vld [vmem:[#allocation6 + $0x1f4] sm:$0xf0] }
  0x16   :  { %261 = vmatpush.bf16.msra.mxu0 %v2317_v12  ;;  %v2313_v26 = vor.u32 %v2711_v23, %v2312_v22  ;;  %v2706_v29 = vld [vmem:[#allocation6 + $0x1c4] sm:$0xf]  ;;  %v2294_v30 = vld [vmem:[#allocation6 + $0x1f8] sm:$0xf0]  ;;  %v2300_v31 = vld [vmem:[#allocation6 + $0x1c8] sm:$0xf]  ;;  %v2293_v33 = vor.u32 %v2707_v28, %v2292_v27 }
  0x17   :  { %290 = vmatpush.bf16.msra.mxu1 %v2321_v16  ;;  %v2708_v32 = vld [vmem:[#allocation6 + $0x1fc] sm:$0xf0]  ;;  %v2297_v34 = vor.u32 %v2706_v29, %v2294_v30  ;;  %v2280_v36 = vld [vmem:[#allocation6 + $0x150] sm:$0xf]  ;;  %v2704_v37 = vld [vmem:[#allocation6 + $0x184] sm:$0xf0] }
  0x18   :  { %319 = vmatpush.bf16.msra.mxu2 %v2325_v17  ;;  %v2301_v35 = vor.u32 %v2708_v32, %v2300_v31  ;;  %v2703_v38 = vld [vmem:[#allocation6 + $0x154] sm:$0xf]  ;;  %v2282_v39 = vld [vmem:[#allocation6 + $0x188] sm:$0xf0]  ;;  %v2288_v40 = vld [vmem:[#allocation6 + $0x158] sm:$0xf]  ;;  %v2281_v43 = vor.u32 %v2704_v37, %v2280_v36 }
  0x19   :  { %v2705_v41 = vld [vmem:[#allocation6 + $0x18c] sm:$0xf0]  ;;  %v2268_v42 = vld [vmem:[#allocation6 + $0xe0] sm:$0xf]  ;;  %v2701_v44 = vld [vmem:[#allocation6 + $0x114] sm:$0xf0]  ;;  %v2285_v47 = vor.u32 %v2703_v38, %v2282_v39 }
  0x1a   :  { %262 = vmatpush.bf16.msra.mxu0 %v2305_v24  ;;  %v2700_v45 = vld [vmem:[#allocation6 + $0xe4] sm:$0xf]  ;;  %v2270_v46 = vld [vmem:[#allocation6 + $0x118] sm:$0xf0]  ;;  %v2289_v48 = vor.u32 %v2705_v41, %v2288_v40  ;;  %v2276_v49 = vld [vmem:[#allocation6 + $0xe8] sm:$0xf]  ;;  %v2269_v56 = vor.u32 %v2701_v44, %v2268_v42 }
  0x1b   :  { %291 = vmatpush.bf16.msra.mxu1 %v2309_v25  ;;  %v2424_v50 = vld [vmem:[#allocation6 + $0x328] sm:$0xf]  ;;  %v2740_v51 = vld [vmem:[#allocation6 + $0x35c] sm:$0xf0]  ;;  %v2412_v54 = vld [vmem:[#allocation6 + $0x2b8] sm:$0xf]  ;;  %v2273_v60 = vor.u32 %v2700_v45, %v2270_v46 }
  0x1c   :  { %320 = vmatpush.bf16.msra.mxu2 %v2313_v26  ;;  %v2702_v52 = vld [vmem:[#allocation6 + $0x11c] sm:$0xf0]  ;;  %v3056_v53 = vor.u32 %v2740_v51, %v2424_v50  ;;  %v2737_v55 = vld [vmem:[#allocation6 + $0x2ec] sm:$0xf0]  ;;  %v2698_v58 = vld [vmem:[#allocation6 + $0xa4] sm:$0xf0] }
  0x1d   :  { %v2256_v57 = vld [vmem:[#allocation6 + $0x70] sm:$0xf]  ;;  %v3059_v59 = vor.u32 %v2737_v55, %v2412_v54  ;;  %v2277_v61 = vor.u32 %v2702_v52, %v2276_v49  ;;  %v2697_v62 = vld [vmem:[#allocation6 + $0x74] sm:$0xf]  ;;  %v2400_v63 = vld [vmem:[#allocation6 + $0x248] sm:$0xf] }
  0x1e   :  { %263 = vmatpush.bf16.msra.mxu0 %v2293_v33  ;;  %564 = vmatpush.bf16.msra.mxu3 %v3056_v53  ;;  %v2734_v0 = vld [vmem:[#allocation6 + $0x27c] sm:$0xf0]  ;;  %v2258_v1 = vld [vmem:[#allocation6 + $0xa8] sm:$0xf0]  ;;  %v2264_v2 = vld [vmem:[#allocation6 + $0x78] sm:$0xf]  ;;  %v2257_v6 = vor.u32 %v2698_v58, %v2256_v57 }
  0x1f   :  { %292 = vmatpush.bf16.msra.mxu1 %v2297_v34  ;;  %v2699_v3 = vld [vmem:[#allocation6 + $0xac] sm:$0xf0]  ;;  %v2244_v4 = vld [vmem:[#allocation6] sm:$0xf]  ;;  %v2695_v5 = vld [vmem:[#allocation6 + $0x34] sm:$0xf0]  ;;  %v3062_v9 = vor.u32 %v2734_v0, %v2400_v63  ;;  %v2261_v10 = vor.u32 %v2697_v62, %v2258_v1 }
  0x20   :  { %321 = vmatpush.bf16.msra.mxu2 %v2301_v35  ;;  %v2694_v7 = vld [vmem:[#allocation6 + $0x4] sm:$0xf]  ;;  %v2246_v8 = vld [vmem:[#allocation6 + $0x38] sm:$0xf0]  ;;  %v2265_v11 = vor.u32 %v2699_v3, %v2264_v2  ;;  %v2388_v12 = vld [vmem:[#allocation6 + $0x1d8] sm:$0xf]  ;;  %v2245_v20 = vor.u32 %v2695_v5, %v2244_v4 }
  0x21   :  { %v2731_v13 = vld [vmem:[#allocation6 + $0x20c] sm:$0xf0]  ;;  %v2252_v14 = vld [vmem:[#allocation6 + $0x8] sm:$0xf]  ;;  %v2696_v15 = vld [vmem:[#allocation6 + $0x3c] sm:$0xf0]  ;;  %v2249_v22 = vor.u32 %v2694_v7, %v2246_v8 }
  0x22   :  { %264 = vmatpush.bf16.msra.mxu0 %v2281_v43  ;;  %565 = vmatpush.bf16.msra.mxu3 %v3059_v59  ;;  %v2520_v16 = vld [vmem:[#allocation6 + $0x31c] sm:$0xf]  ;;  %v2764_v17 = vld [vmem:[#allocation6 + $0x350] sm:$0xf0]  ;;  %v2763_v18 = vld [vmem:[#allocation6 + $0x320] sm:$0xf]  ;;  %v3065_v21 = vor.u32 %v2731_v13, %v2388_v12  ;;  %v2253_v23 = vor.u32 %v2696_v15, %v2252_v14 }
  0x23   :  { %293 = vmatpush.bf16.msra.mxu1 %v2285_v47  ;;  %v2522_v19 = vld [vmem:[#allocation6 + $0x354] sm:$0xf0]  ;;  %v2376_v24 = vld [vmem:[#allocation6 + $0x168] sm:$0xf]  ;;  %v2728_v25 = vld [vmem:[#allocation6 + $0x19c] sm:$0xf0]  ;;  %v3067_v26 = vor.u32 %v2764_v17, %v2520_v16 }
  0x24   :  { %322 = vmatpush.bf16.msra.mxu2 %v2289_v48  ;;  %v3069_v27 = vor.u32 %v2763_v18, %v2522_v19  ;;  %v2690_v28 = vld [vmem:[#allocation3] sm:$0xff]  ;;  %v3072_v29 = vor.u32 %v2728_v25, %v2376_v24  ;;  %v2364_v30 = vld [vmem:[#allocation6 + $0xf8] sm:$0xf]  ;;  %v2725_v31 = vld [vmem:[#allocation6 + $0x12c] sm:$0xf0]  ;;  %s3026_s0 = smov [#allocation9]  }
  0x25   :  { %v3077_v32 = vor.u32 %v2725_v31, %v2364_v30  ;;  %v2352_v33 = vld [vmem:[#allocation6 + $0x88] sm:$0xf]  ;;  %v2722_v34 = vld [vmem:[#allocation6 + $0xbc] sm:$0xf0]  ;;  %v2692_v37 = vld [vmem:[#allocation3 + $0x10] sm:$0xff]  ;;  %s2213_s2 = sshll.u32 %s3026_s0, 4  ;;  %s2214_s2 = int_to_ptr.vmem [resolvable:$true] %s2213_s2 }
  0x26   :  { %265 = vmatpush.bf16.msra.mxu0 %v2269_v56  ;;  %566 = vmatpush.bf16.msra.mxu3 %v3062_v9  ;;  %4053 = vst [vmem:[#allocation13_spill] sm:$0xff] %v3069_v27  ;;  %v3080_v35 = vor.u32 %v2722_v34, %v2352_v33  ;;  %v2691_v36 = vld [vmem:[#allocation3 + $0x8] sm:$0xff]  ;;  %v2432_v38 = vld [vmem:[#allocation6 + $0x330] sm:$0xf]  ;;  %v2340_v41 = vld [vmem:[#allocation6 + $0x18] sm:$0xf] }
  0x27   :  { %294 = vmatpush.bf16.msra.mxu1 %v2273_v60  ;;  %v2741_v39 = vld [vmem:[#allocation6 + $0x364] sm:$0xf0]  ;;  %v2719_v42 = vld [vmem:[#allocation6 + $0x4c] sm:$0xf0]  ;;  %v2739_v44 = vld [vmem:[#allocation6 + $0x32c] sm:$0xf] }
  0x28   :  { %323 = vmatpush.bf16.msra.mxu2 %v2277_v61  ;;  %v3083_v40 = vor.u32 %v2741_v39, %v2432_v38  ;;  %v3086_v43 = vor.u32 %v2719_v42, %v2340_v41  ;;  %v2426_v45 = vld [vmem:[#allocation6 + $0x360] sm:$0xf0]  ;;  %v2508_v46 = vld [vmem:[#allocation6 + $0x2ac] sm:$0xf]  ;;  %v2760_v49 = vld [vmem:[#allocation6 + $0x2b0] sm:$0xf] }
  0x29   :  { %v2761_v47 = vld [vmem:[#allocation6 + $0x2e0] sm:$0xf0]  ;;  %v3088_v48 = vor.u32 %v2739_v44, %v2426_v45  ;;  %v2510_v51 = vld [vmem:[#allocation6 + $0x2e4] sm:$0xf0]  ;;  %v2420_v52 = vld [vmem:[#allocation6 + $0x2c0] sm:$0xf] }
  0x2a   :  { %266 = vmatpush.bf16.msra.mxu0 %v2257_v6  ;;  %567 = vmatpush.bf16.msra.mxu3 %v3065_v21  ;;  %4054 = vst [vmem:[#allocation14_spill] sm:$0xff] %v3086_v43  ;;  %v3090_v50 = vor.u32 %v2761_v47, %v2508_v46  ;;  %v2738_v54 = vld [vmem:[#allocation6 + $0x2f4] sm:$0xf0]  ;;  %v3094_v55 = vor.u32 %v2760_v49, %v2510_v51  ;;  %v2736_v57 = vld [vmem:[#allocation6 + $0x2bc] sm:$0xf]  ;;  %s2215_s5 = sshll.u32 %s3953_s3, 4  ;;  %s2216_s5 = int_to_ptr.hbm [resolvable:$true] %s2215_s5 }
  0x2b   :  { %295 = vmatpush.bf16.msra.mxu1 %v2261_v10  ;;  %v3096_v56 = vor.u32 %v2738_v54, %v2420_v52  ;;  %v2414_v58 = vld [vmem:[#allocation6 + $0x2f0] sm:$0xf0]  ;;  %v2408_v61 = vld [vmem:[#allocation6 + $0x250] sm:$0xf]  ;;  %v2735_v62 = vld [vmem:[#allocation6 + $0x284] sm:$0xf0] }
  0x2c   :  { %324 = vmatpush.bf16.msra.mxu2 %v2265_v11  ;;  %4055 = vst [vmem:[#allocation15_spill] sm:$0xff] %v3094_v55  ;;  %v3101_v60 = vor.u32 %v2736_v57, %v2414_v58  ;;  %v2496_v63 = vld [vmem:[#allocation6 + $0x23c] sm:$0xf]  ;;  %v3103_v0 = vor.u32 %v2735_v62, %v2408_v61  ;;  %v2758_v1 = vld [vmem:[#allocation6 + $0x270] sm:$0xf0] }
  0x2d   :  { %v2757_v2 = vld [vmem:[#allocation6 + $0x240] sm:$0xf]  ;;  %v2498_v3 = vld [vmem:[#allocation6 + $0x274] sm:$0xf0]  ;;  %v3106_v4 = vor.u32 %v2758_v1, %v2496_v63  ;;  %v2733_v6 = vld [vmem:[#allocation6 + $0x24c] sm:$0xf] }
  0x2e   :  { %267 = vmatpush.bf16.msra.mxu0 %v2245_v20  ;;  %568 = vmatpush.bf16.msra.mxu3 %v3072_v29  ;;  %v3108_v5 = vor.u32 %v2757_v2, %v2498_v3  ;;  %v2402_v7 = vld [vmem:[#allocation6 + $0x280] sm:$0xf0]  ;;  %v2396_v10 = vld [vmem:[#allocation6 + $0x1e0] sm:$0xf]  ;;  %v2732_v11 = vld [vmem:[#allocation6 + $0x214] sm:$0xf0] }
  0x2f   :  { %296 = vmatpush.bf16.msra.mxu1 %v2249_v22  ;;  %v3112_v8 = vor.u32 %v2733_v6, %v2402_v7  ;;  %v2484_v12 = vld [vmem:[#allocation6 + $0x1cc] sm:$0xf]  ;;  %v3115_v13 = vor.u32 %v2732_v11, %v2396_v10  ;;  %v2755_v14 = vld [vmem:[#allocation6 + $0x200] sm:$0xf0]  ;;  %v2754_v15 = vld [vmem:[#allocation6 + $0x1d0] sm:$0xf] }
  0x30   :  { %325 = vmatpush.bf16.msra.mxu2 %v2253_v23  ;;  %4056 = vst [vmem:[#allocation16_spill] sm:$0xff] %v3108_v5  ;;  %v2486_v16 = vld [vmem:[#allocation6 + $0x204] sm:$0xf0]  ;;  %v3118_v17 = vor.u32 %v2755_v14, %v2484_v12  ;;  %v2730_v19 = vld [vmem:[#allocation6 + $0x1dc] sm:$0xf] }
  0x31   :  { %268 = vmatmul.bf16.vlgmr.msra.gmra.mxu0 %v2690_v28  ;;  %v3120_v18 = vor.u32 %v2754_v15, %v2486_v16  ;;  %v2390_v20 = vld [vmem:[#allocation6 + $0x210] sm:$0xf0]  ;;  %v2693_v22 = vld [vmem:[#allocation3 + $0x18] sm:$0xff]  ;;  %v2384_v24 = vld [vmem:[#allocation6 + $0x170] sm:$0xf] }
  0x32   :  { %297 = vmatmul.bf16.vlgmr.msra.gmra.mxu1 %v2690_v28  ;;  %569 = vmatpush.bf16.msra.mxu3 %v3077_v32  ;;  %4057 = vst [vmem:[#allocation17_spill] sm:$0xff] %v3118_v17  ;;  %v3124_v23 = vor.u32 %v2730_v19, %v2390_v20  ;;  %v2729_v25 = vld [vmem:[#allocation6 + $0x1a4] sm:$0xf0]  ;;  %v2472_v30 = vld [vmem:[#allocation6 + $0x15c] sm:$0xf] }
  0x33   :  { %779 = vmatpush.bf16.msrb.mxu1 %v3067_v26  ;;  %326 = vmatmul.bf16.vlgmr.msra.gmra.mxu2 %v2690_v28  ;;  %4058 = vst [vmem:[#allocation18_spill] sm:$0xff] %v3120_v18  ;;  %v3127_v28 = vor.u32 %v2729_v25, %v2384_v24  ;;  %v2752_v31 = vld [vmem:[#allocation6 + $0x190] sm:$0xf0]  ;;  %v2751_v33 = vld [vmem:[#allocation6 + $0x160] sm:$0xf] }
  0x34   :  { %792 = vmatpush.bf16.msrb.mxu2 %v3069_v27  ;;  %590 = vmatpush.bf16.msrb.mxu0 %v3083_v40  ;;  %v2474_v34 = vld [vmem:[#allocation6 + $0x194] sm:$0xf0]  ;;  %v2727_v38 = vld [vmem:[#allocation6 + $0x16c] sm:$0xf]  ;;  %v2378_v39 = vld [vmem:[#allocation6 + $0x1a0] sm:$0xf0] }
  0x35   :  { %v3135_v41 = vor.u32 %v2727_v38, %v2378_v39  ;;  %v2372_v42 = vld [vmem:[#allocation6 + $0x100] sm:$0xf]  ;;  %v2726_v44 = vld [vmem:[#allocation6 + $0x134] sm:$0xf0]  ;;  %v2460_v45 = vld [vmem:[#allocation6 + $0xec] sm:$0xf] }
  0x36   :  { %570 = vmatpush.bf16.msra.mxu3 %v3080_v35  ;;  %v3139_v46 = vor.u32 %v2726_v44, %v2372_v42  ;;  %v2749_v47 = vld [vmem:[#allocation6 + $0x120] sm:$0xf0]  ;;  %v2748_v49 = vld [vmem:[#allocation6 + $0xf0] sm:$0xf]  ;;  %v2462_v51 = vld [vmem:[#allocation6 + $0x124] sm:$0xf0] }
  0x37   :  { %780 = vmatpush.bf16.msrb.mxu1 %v3090_v50  ;;  %v3141_v52 = vor.u32 %v2749_v47, %v2460_v45  ;;  %v3143_v54 = vor.u32 %v2748_v49, %v2462_v51  ;;  %v2724_v57 = vld [vmem:[#allocation6 + $0xfc] sm:$0xf]  ;;  %v2366_v58 = vld [vmem:[#allocation6 + $0x130] sm:$0xf0]  ;;  %v2360_v62 = vld [vmem:[#allocation6 + $0x90] sm:$0xf] }
  0x38   :  { %793 = vmatpush.bf16.msrb.mxu2 %v3094_v55  ;;  %591 = vmatpush.bf16.msrb.mxu0 %v3096_v56  ;;  %v3147_v61 = vor.u32 %v2724_v57, %v2366_v58  ;;  %v2723_v63 = vld [vmem:[#allocation6 + $0xc4] sm:$0xf0]  ;;  %v2448_v1 = vld [vmem:[#allocation6 + $0x7c] sm:$0xf]  ;;  %v2746_v3 = vld [vmem:[#allocation6 + $0xb0] sm:$0xf0] }
  0x39   :  { %4061 = vst [vmem:[#allocation21_spill] sm:$0xff] %v3141_v52  ;;  %v3151_v2 = vor.u32 %v2723_v63, %v2360_v62  ;;  %v2745_v6 = vld [vmem:[#allocation6 + $0x80] sm:$0xf]  ;;  %v2450_v7 = vld [vmem:[#allocation6 + $0xb4] sm:$0xf0]  ;;  %v3153_v10 = vor.u32 %v2746_v3, %v2448_v1 }
  0x3a   :  { %571 = vmatpush.bf16.msra.mxu3 %v3086_v43  ;;  %4062 = vst [vmem:[#allocation22_spill] sm:$0xff] %v3143_v54  ;;  %v3155_v11 = vor.u32 %v2745_v6, %v2450_v7  ;;  %v100_v12 = vld [vmem:[#allocation8] sm:$0x7]  ;;  %v2721_v14 = vld [vmem:[#allocation6 + $0x8c] sm:$0xf] }
  0x3b   :  { %781 = vmatpush.bf16.msrb.mxu1 %v3106_v4  ;;  %4063 = vst [vmem:[#allocation23_spill] sm:$0xff] %v3153_v10  ;;  %v2354_v15 = vld [vmem:[#allocation6 + $0xc0] sm:$0xf0]  ;;  %v2348_v19 = vld [vmem:[#allocation6 + $0x20] sm:$0xf]  ;;  %v3170_v42 = vperm.slane %v100_v12, 0 }
  0x3c   :  { %592 = vmatpush.bf16.msrb.mxu0 %v3103_v0  ;;  %794 = vmatpush.bf16.msrb.mxu2 %v3108_v5  ;;  %4064 = vst [vmem:[#allocation24_spill] sm:$0xff] %v3155_v11  ;;  %v3159_v16 = vor.u32 %v2721_v14, %v2354_v15  ;;  %v2720_v20 = vld [vmem:[#allocation6 + $0x54] sm:$0xf0]  ;;  %v2743_v25 = vld [vmem:[#allocation6 + $0x40] sm:$0xf0]  ;;  %v3175_v45 = vperm.slane %v100_v12, 1 }
  0x3d   :  { %v3163_v24 = vor.u32 %v2720_v20, %v2348_v19  ;;  %v2718_v38 = vld [vmem:[#allocation6 + $0x1c] sm:$0xf]  ;;  %v2342_v39 = vld [vmem:[#allocation6 + $0x50] sm:$0xf0]  ;;  %4067 = vst [vmem:[#allocation27_spill] sm:$0xff] %v3170_v42  ;;  %v3191_v63 = vperm.slane %v100_v12, 2 }
  0x3e   :  { %577 = vmatpush.bf16.msrb.mxu3 %v3088_v48  ;;  %v3173_v44 = vor.u32 %v2718_v38, %v2342_v39  ;;  %4069 = vst [vmem:[#allocation29_spill] sm:$0xff] %v3175_v45  ;;  %v3195_v7 = vld [vmem:[#allocation8 + $0x3] ss:$0 sm:$0xff]  ;;  %v2528_v38 = vld [vmem:[#allocation6 + $0x324] sm:$0xf] }
  0x3f   :  { %782 = vmatpush.bf16.msrb.mxu1 %v3118_v17  ;;  %v2765_v39 = vld [vmem:[#allocation6 + $0x358] sm:$0xf0] }
  0x40   :  { %593 = vmatpush.bf16.msrb.mxu0 %v3115_v13  ;;  %795 = vmatpush.bf16.msrb.mxu2 %v3120_v18  ;;  %4068 = vst [vmem:[#allocation28_spill] sm:$0xff] %v3173_v44 }
  0x41   :  { %273 = vmatmul.bf16.gmra.mxu0 %v2691_v36 }
  0x42   :  { %302 = vmatmul.bf16.gmra.mxu1 %v2691_v36  ;;  %578 = vmatpush.bf16.msrb.mxu3 %v3101_v60 }
  0x43   :  { %331 = vmatmul.bf16.gmra.mxu2 %v2691_v36  ;;  %v3130_v36 = vor.u32 %v2752_v31, %v2472_v30  ;;  %v2742_v30 = vld [vmem:[#allocation6 + $0x10] sm:$0xf]  ;;  %v2438_v31 = vld [vmem:[#allocation6 + $0x44] sm:$0xf0] }
  0x44   :  { %594 = vmatpush.bf16.msrb.mxu0 %v3127_v28 }
  0x45   :  { %4059 = vst [vmem:[#allocation19_spill] sm:$0xff] %v3130_v36  ;;  %783 = vmatpush.bf16.msrb.mxu1 %v3130_v36 }
  0x46   :  { %579 = vmatpush.bf16.msrb.mxu3 %v3112_v8 }
  0x48   :  { %595 = vmatpush.bf16.msrb.mxu0 %v3139_v46 }
  0x49   :  { %784 = vmatpush.bf16.msrb.mxu1 %v3141_v52 }
  0x4a   :  { %580 = vmatpush.bf16.msrb.mxu3 %v3124_v23 }
  0x4c   :  { %596 = vmatpush.bf16.msrb.mxu0 %v3151_v2 }
  0x4d   :  { %785 = vmatpush.bf16.msrb.mxu1 %v3153_v10 }
  0x4e   :  { %581 = vmatpush.bf16.msrb.mxu3 %v3135_v41 }
  0x50   :  { %597 = vmatpush.bf16.msrb.mxu0 %v3163_v24 }
  0x51   :  { %278 = vmatmul.bf16.gmra.mxu0 %v2692_v37 }
  0x52   :  { %307 = vmatmul.bf16.gmra.mxu1 %v2692_v37  ;;  %582 = vmatpush.bf16.msrb.mxu3 %v3147_v61 }
  0x53   :  { %336 = vmatmul.bf16.gmra.mxu2 %v2692_v37  ;;  %v3132_v37 = vor.u32 %v2751_v33, %v2474_v34  ;;  %v3167_v34 = vor.u32 %v2742_v30, %v2438_v31 }
  0x54   :  { %837 = vmatpush.bf16.msra.mxu0 %v3056_v53 }
  0x55   :  { %4060 = vst [vmem:[#allocation20_spill] sm:$0xff] %v3132_v37  ;;  %796 = vmatpush.bf16.msrb.mxu2 %v3132_v37 }
  0x56   :  { %4066 = vst [vmem:[#allocation26_spill] sm:$0xff] %v3167_v34  ;;  %583 = vmatpush.bf16.msrb.mxu3 %v3159_v16 }
  0x58   :  { %838 = vmatpush.bf16.msra.mxu0 %v3059_v59 }
  0x59   :  { %797 = vmatpush.bf16.msrb.mxu2 %v3143_v54 }
  0x5a   :  { %584 = vmatpush.bf16.msrb.mxu3 %v3173_v44 }
  0x5c   :  { %839 = vmatpush.bf16.msra.mxu0 %v3062_v9 }
  0x5d   :  { %798 = vmatpush.bf16.msrb.mxu2 %v3155_v11 }
  0x60   :  { %840 = vmatpush.bf16.msra.mxu0 %v3065_v21 }
  0x61   :  { %283 = vmatmul.bf16.gmra.mxu0 %v2693_v22  ;;  %799 = vmatpush.bf16.msrb.mxu2 %v3167_v34 }
  0x62   :  { %312 = vmatmul.bf16.gmra.mxu1 %v2693_v22 }
  0x63   :  { %341 = vmatmul.bf16.gmra.mxu2 %v2693_v22  ;;  %v2436_v22 = vld [vmem:[#allocation6 + $0xc] sm:$0xf] }
  0x64   :  { %v3165_v33 = vor.u32 %v2743_v25, %v2436_v22  ;;  %841 = vmatpush.bf16.msra.mxu0 %v3072_v29 }
  0x65   :  { %863 = vmatpush.bf16.msra.mxu2 %v3083_v40 }
  0x66   :  { %4065 = vst [vmem:[#allocation25_spill] sm:$0xff] %v3165_v33  ;;  %786 = vmatpush.bf16.msrb.mxu1 %v3165_v33 }
  0x68   :  { %842 = vmatpush.bf16.msra.mxu0 %v3077_v32 }
  0x69   :  { %864 = vmatpush.bf16.msra.mxu2 %v3096_v56 }
  0x6a   :  { %850 = vmatpush.bf16.msra.mxu1 %v3088_v48 }
  0x6c   :  { %843 = vmatpush.bf16.msra.mxu0 %v3080_v35 }
  0x6d   :  { %865 = vmatpush.bf16.msra.mxu2 %v3103_v0 }
  0x6e   :  { %851 = vmatpush.bf16.msra.mxu1 %v3101_v60 }
  0x70   :  { %844 = vmatpush.bf16.msra.mxu0 %v3086_v43 }
  0x71   :  { %866 = vmatpush.bf16.msra.mxu2 %v3115_v13 }
  0x72   :  { %852 = vmatpush.bf16.msra.mxu1 %v3112_v8 }
  0x75   :  { %867 = vmatpush.bf16.msra.mxu2 %v3127_v28 }
  0x76   :  { %853 = vmatpush.bf16.msra.mxu1 %v3124_v23 }
  0x79   :  { %868 = vmatpush.bf16.msra.mxu2 %v3139_v46 }
  0x7a   :  { %854 = vmatpush.bf16.msra.mxu1 %v3135_v41 }
  0x7d   :  { %869 = vmatpush.bf16.msra.mxu2 %v3151_v2 }
  0x7e   :  { %855 = vmatpush.bf16.msra.mxu1 %v3147_v61 }
  0x81   :  { %870 = vmatpush.bf16.msra.mxu2 %v3163_v24 }
  0x82   :  { %856 = vmatpush.bf16.msra.mxu1 %v3159_v16 }
  0x86   :  { %857 = vmatpush.bf16.msra.mxu1 %v3173_v44 }
  0xae   :  { %v269_v47 = vpop.f32.mrf.mxu0 }
  0xaf   :  { %v270_v49 = vadd.f32 %v269_v47, %v3170_v42  ;;  %v298_v51 = vpop.f32.mrf.mxu1 }
  0xb0   :  { %v299_v57 = vadd.f32 %v298_v51, %v3175_v45  ;;  %v3216_v51 = vor.u32 %v2765_v39, %v2528_v38  ;;  %v2456_v38 = vld [vmem:[#allocation6 + $0x84] sm:$0xf]  ;;  %v2747_v39 = vld [vmem:[#allocation6 + $0xb8] sm:$0xf0] }
  0xb1   :  { %v390_v58 = vmul.f32 0.5, %v270_v49 }
  0xb2   :  { %v394_v62 = vmul.f32 0.5, %v299_v57  ;;  %v2516_v57 = vld [vmem:[#allocation6 + $0x2b4] sm:$0xf] }
  0xb3   :  { %2818 = vtanh.f32 %v390_v58  ;;  %v2762_v58 = vld [vmem:[#allocation6 + $0x2e8] sm:$0xf0] }
  0xb4   :  { %2820 = vtanh.f32 %v394_v62  ;;  %v3219_v62 = vor.u32 %v2762_v58, %v2516_v57  ;;  %v3239_v57 = vor.u32 %v2747_v39, %v2456_v38  ;;  %v2444_v58 = vld [vmem:[#allocation6 + $0x14] sm:$0xf] }
  0xb6   :  { %v327_v14 = vpop.f32.mrf.mxu2 }
  0xb7   :  { %v328_v19 = vadd.f32 %v327_v14, %v3191_v63  ;;  %v2492_v14 = vld [vmem:[#allocation6 + $0x1d4] sm:$0xf] }
  0xb9   :  { %v2819_v1 = vpop.eup %2818 }
  0xba   :  { %v2821_v3 = vpop.eup %2820  ;;  %v392_v6 = vmul.f32 0.5, %v2819_v1  ;;  %v2504_v1 = vld [vmem:[#allocation6 + $0x244] sm:$0xf] }
  0xbb   :  { %v396_v20 = vmul.f32 0.5, %v2821_v3  ;;  %v2759_v3 = vld [vmem:[#allocation6 + $0x278] sm:$0xf0] }
  0xbc   :  { %v393_v15 = vadd.f32 0.5, %v392_v6  ;;  %v3223_v6 = vor.u32 %v2759_v3, %v2504_v1  ;;  %v2744_v1 = vld [vmem:[#allocation6 + $0x48] sm:$0xf0] }
  0xbd   :  { %v397_v25 = vadd.f32 0.5, %v396_v20  ;;  %v2480_v20 = vld [vmem:[#allocation6 + $0x164] sm:$0xf]  ;;  %v3243_v3 = vor.u32 %v2744_v1, %v2444_v58 }
  0xbe   :  { %v398_v12 = vmul.f32 %v3195_v7, %v393_v15  ;;  %v2756_v15 = vld [vmem:[#allocation6 + $0x208] sm:$0xf0] }
  0xbf   :  { %v401_v30 = vsub.f32 1.0, %v397_v25  ;;  %v2468_v25 = vld [vmem:[#allocation6 + $0xf4] sm:$0xf]  ;;  %4070 = vst [vmem:[#allocation30_spill] sm:$0xff] %v3243_v3 }
  0xc0   :  { %v399_v22 = vadd.f32 %v398_v12, %v328_v19  ;;  %v3227_v19 = vor.u32 %v2756_v15, %v2492_v14  ;;  %v2753_v12 = vld [vmem:[#allocation6 + $0x198] sm:$0xf0]  ;;  %v3248_v14 = vpop.f32.mrf.mxu0  ;;  %v3250_v15 = vpop.f32.mrf.mxu1 }
  0xc2   :  { %2822 = vtanh.f32 %v399_v22  ;;  %v3231_v22 = vor.u32 %v2753_v12, %v2480_v20  ;;  %v3252_v20 = vpop.f32.mrf.mxu2 }
  0xc8   :  { %v2823_v31 = vpop.eup %2822  ;;  %v3254_v12 = vpop.f32.mrf.mxu0 }
  0xc9   :  { %v3209_v47 = vmul.f32 %v2823_v31, %v401_v30  ;;  %v2750_v30 = vld [vmem:[#allocation6 + $0x128] sm:$0xf0]  ;;  %4071 = vst [vmem:[#allocation31_spill] sm:$0xff] %v3254_v12 }
  0xca   :  { %v3235_v31 = vor.u32 %v2750_v30, %v2468_v25  ;;  %v3256_v25 = vpop.f32.mrf.mxu1  ;;  %v3258_v30 = vpop.f32.mrf.mxu2 }
  0xcb   :  { %v403_v49 = vpack.c.bf16 %v3209_v47, %v3209_v47  ;;  %4072 = vst [vmem:[#allocation32_spill] sm:$0xff] %v3256_v25 }
  0xcc   :  { %4073 = vst [vmem:[#allocation33_spill] sm:$0xff] %v3258_v30  ;;  %v2604_v30 = vld [vmem:[#allocation6 + $0x2c4] sm:$0xf] }
  0xcd   :  { %572 = vmatmul.bf16.vlgmr.msra.gmra.mxu3 %v403_v49  ;;  %598 = vmatmul.bf16.vlgmr.msrb.gmra.mxu0 %v403_v49 }
  0xce   :  { %787 = vmatmul.bf16.vlgmr.msrb.gmra.mxu1 %v403_v49  ;;  %800 = vmatmul.bf16.vlgmr.msrb.gmra.mxu2 %v403_v49 }
  0xcf   :  { %805 = vmatpush.bf16.msra.mxu3 %v3216_v51  ;;  %1097 = vmatpush.bf16.msrb.mxu2 %v3067_v26 }
  0xd0   :  { %v3260_v38 = vpop.f32.mrf.mxu0 }
  0xd1   :  { %4074 = vst [vmem:[#allocation34_spill] sm:$0xff] %v3260_v38  ;;  %v2785_v38 = vld [vmem:[#allocation6 + $0x2f8] sm:$0xf0] }
  0xd2   :  { %v3262_v39 = vpop.f32.mrf.mxu1  ;;  %v3264_v58 = vpop.f32.mrf.mxu2 }
  0xd3   :  { %806 = vmatpush.bf16.msra.mxu3 %v3219_v62  ;;  %1098 = vmatpush.bf16.msrb.mxu2 %v3090_v50  ;;  %4075 = vst [vmem:[#allocation35_spill] sm:$0xff] %v3262_v39  ;;  %v3279_v39 = vor.u32 %v2785_v38, %v2604_v30  ;;  %v2568_v30 = vld [vmem:[#allocation6 + $0x174] sm:$0xf]  ;;  %v2776_v38 = vld [vmem:[#allocation6 + $0x1a8] sm:$0xf0] }
  0xd4   :  { %4076 = vst [vmem:[#allocation36_spill] sm:$0xff] %v3264_v58 }
  0xd5   :  { %4083 = vst [vmem:[#allocation43_spill] sm:$0xff] %v3279_v39 }
  0xd7   :  { %807 = vmatpush.bf16.msra.mxu3 %v3223_v6  ;;  %1099 = vmatpush.bf16.msrb.mxu2 %v3106_v4 }
  0xd8   :  { %v3266_v1 = vpop.f32.mrf.mxu0 }
  0xd9   :  { %4077 = vst [vmem:[#allocation37_spill] sm:$0xff] %v3266_v1  ;;  %v2592_v1 = vld [vmem:[#allocation6 + $0x254] sm:$0xf] }
  0xdb   :  { %808 = vmatpush.bf16.msra.mxu3 %v3227_v19  ;;  %1100 = vmatpush.bf16.msrb.mxu2 %v3118_v17 }
  0xdd   :  { %585 = vmatmul.bf16.vlgmr.msrb.gmra.mxu3 %v403_v49 }
  0xdf   :  { %809 = vmatpush.bf16.msra.mxu3 %v3231_v22  ;;  %1101 = vmatpush.bf16.msrb.mxu2 %v3130_v36 }
  0xe0   :  { %v3275_v12 = vpop.f32.mrf.mxu0 }
  0xe1   :  { %4081 = vst [vmem:[#allocation41_spill] sm:$0xff] %v3275_v12 }
  0xe3   :  { %810 = vmatpush.bf16.msra.mxu3 %v3235_v31  ;;  %1102 = vmatpush.bf16.msrb.mxu2 %v3141_v52  ;;  %v3270_v52 = vpop.f32.mrf.mxu2 }
  0xe4   :  { %4079 = vst [vmem:[#allocation39_spill] sm:$0xff] %v3270_v52 }
  0xe7   :  { %811 = vmatpush.bf16.msra.mxu3 %v3239_v57  ;;  %1103 = vmatpush.bf16.msrb.mxu2 %v3153_v10  ;;  %v2788_v10 = vld [vmem:[#allocation6 + $0x368] sm:$0xf0] }
  0xe8   :  { %v3289_v12 = vpop.f32.mrf.mxu0 }
  0xe9   :  { %4087 = vst [vmem:[#allocation47_spill] sm:$0xff] %v3289_v12  ;;  %v2770_v12 = vld [vmem:[#allocation6 + $0xc8] sm:$0xf0] }
  0xeb   :  { %812 = vmatpush.bf16.msra.mxu3 %v3243_v3  ;;  %1104 = vmatpush.bf16.msrb.mxu2 %v3165_v33  ;;  %v2616_v33 = vld [vmem:[#allocation6 + $0x334] sm:$0xf]  ;;  %v3284_v17 = vpop.f32.mrf.mxu2 }
  0xec   :  { %v3272_v36 = vor.u32 %v2788_v10, %v2616_v33  ;;  %4085 = vst [vmem:[#allocation45_spill] sm:$0xff] %v3284_v17  ;;  %v2580_v10 = vld [vmem:[#allocation6 + $0x1e4] sm:$0xf]  ;;  %v2779_v33 = vld [vmem:[#allocation6 + $0x218] sm:$0xf0] }
  0xed   :  { %v3287_v52 = vor.u32 %v2779_v33, %v2580_v10  ;;  %v2544_v33 = vld [vmem:[#allocation6 + $0x94] sm:$0xf] }
  0xee   :  { %813 = vmatmul.bf16.vlgmr.msra.gmra.mxu3 %v403_v49  ;;  %v3268_v49 = vpop.f32.mrf.mxu1  ;;  %4080 = vst [vmem:[#allocation40_spill] sm:$0xff] %v3272_v36  ;;  %v2789_v3 = vld [vmem:[#allocation6 + $0x370] sm:$0xf0] }
  0xef   :  { %4078 = vst [vmem:[#allocation38_spill] sm:$0xff] %v3268_v49  ;;  %1037 = vmatpush.bf16.msrb.mxu3 %v3272_v36  ;;  %v2782_v49 = vld [vmem:[#allocation6 + $0x288] sm:$0xf0] }
  0xf0   :  { %v3282_v58 = vor.u32 %v2782_v49, %v2592_v1  ;;  %4086 = vst [vmem:[#allocation46_spill] sm:$0xff] %v3287_v52  ;;  %v2556_v1 = vld [vmem:[#allocation6 + $0x104] sm:$0xf]  ;;  %v2773_v49 = vld [vmem:[#allocation6 + $0x138] sm:$0xf0]  ;;  %v3302_v10 = vpop.f32.mrf.mxu0 }
  0xf1   :  { %4092 = vst [vmem:[#allocation52_spill] sm:$0xff] %v3302_v10  ;;  %v2606_v10 = vld [vmem:[#allocation6 + $0x2fc] sm:$0xf0] }
  0xf2   :  { %4084 = vst [vmem:[#allocation44_spill] sm:$0xff] %v3282_v58 }
  0xf3   :  { %1038 = vmatpush.bf16.msrb.mxu3 %v3279_v39  ;;  %v3297_v17 = vpop.f32.mrf.mxu2  ;;  %v2787_v39 = vld [vmem:[#allocation6 + $0x338] sm:$0xf] }
  0xf4   :  { %4090 = vst [vmem:[#allocation50_spill] sm:$0xff] %v3297_v17  ;;  %v2618_v17 = vld [vmem:[#allocation6 + $0x36c] sm:$0xf0] }
  0xf6   :  { %v3277_v25 = vpop.f32.mrf.mxu1 }
  0xf7   :  { %4082 = vst [vmem:[#allocation42_spill] sm:$0xff] %v3277_v25  ;;  %1039 = vmatpush.bf16.msrb.mxu3 %v3282_v58  ;;  %v3294_v25 = vor.u32 %v2776_v38, %v2568_v30  ;;  %v3299_v58 = vor.u32 %v2773_v49, %v2556_v1  ;;  %v2532_v30 = vld [vmem:[#allocation6 + $0x24] sm:$0xf]  ;;  %v2767_v38 = vld [vmem:[#allocation6 + $0x58] sm:$0xf0]  ;;  %v3314_v49 = vor.u32 %v2787_v39, %v2618_v17 }
  0xf8   :  { %v2781_v17 = vld [vmem:[#allocation6 + $0x258] sm:$0xf]  ;;  %v2594_v39 = vld [vmem:[#allocation6 + $0x28c] sm:$0xf0] }
  0xf9   :  { %4089 = vst [vmem:[#allocation49_spill] sm:$0xff] %v3294_v25  ;;  %1050 = vmatpush.bf16.msrb.mxu0 %v3314_v49 }
  0xfa   :  { %4091 = vst [vmem:[#allocation51_spill] sm:$0xff] %v3299_v58 }
  0xfb   :  { %1040 = vmatpush.bf16.msrb.mxu3 %v3287_v52  ;;  %v3306_v52 = vor.u32 %v2770_v12, %v2544_v33  ;;  %v3311_v1 = vpop.f32.mrf.mxu2  ;;  %4097 = vst [vmem:[#allocation57_spill] sm:$0xff] %v3314_v49  ;;  %v2784_v33 = vld [vmem:[#allocation6 + $0x2c8] sm:$0xf]  ;;  %v2582_v49 = vld [vmem:[#allocation6 + $0x21c] sm:$0xf0] }
  0xfc   :  { %4096 = vst [vmem:[#allocation56_spill] sm:$0xff] %v3311_v1  ;;  %v3326_v1 = vor.u32 %v2781_v17, %v2594_v39  ;;  %v2570_v39 = vld [vmem:[#allocation6 + $0x1ac] sm:$0xf0] }
  0xfd   :  { %4094 = vst [vmem:[#allocation54_spill] sm:$0xff] %v3306_v52 }
  0xfe   :  { %v3291_v44 = vpop.f32.mrf.mxu1  ;;  %4100 = vst [vmem:[#allocation60_spill] sm:$0xff] %v3326_v1 }
  0xff   :  { %4088 = vst [vmem:[#allocation48_spill] sm:$0xff] %v3291_v44  ;;  %1041 = vmatpush.bf16.msrb.mxu3 %v3294_v25  ;;  %v3309_v25 = vor.u32 %v2767_v38, %v2532_v30  ;;  %v375_v30 = vld [vmem:[#allocation8 + $0x4] sm:$0x7] }
 0x100   :  { %v3323_v38 = vperm.slane %v375_v30, 0 }
 0x101   :  { %4095 = vst [vmem:[#allocation55_spill] sm:$0xff] %v3309_v25 }
 0x102   :  { %4099 = vst [vmem:[#allocation59_spill] sm:$0xff] %v3323_v38 }
 0x103   :  { %1042 = vmatpush.bf16.msrb.mxu3 %v3299_v58 }
 0x106   :  { %v3304_v44 = vpop.f32.mrf.mxu1 }
 0x107   :  { %4093 = vst [vmem:[#allocation53_spill] sm:$0xff] %v3304_v44  ;;  %1043 = vmatpush.bf16.msrb.mxu3 %v3306_v52  ;;  %v3320_v52 = vor.u32 %v2784_v33, %v2606_v10  ;;  %v2778_v33 = vld [vmem:[#allocation6 + $0x1e8] sm:$0xf] }
 0x108   :  { %v3331_v36 = vor.u32 %v2778_v33, %v2582_v49 }
 0x109   :  { %4098 = vst [vmem:[#allocation58_spill] sm:$0xff] %v3320_v52  ;;  %1051 = vmatpush.bf16.msrb.mxu0 %v3320_v52  ;;  %v2624_v52 = vld [vmem:[#allocation6 + $0x33c] sm:$0xf] }
 0x10a   :  { %4101 = vst [vmem:[#allocation61_spill] sm:$0xff] %v3331_v36  ;;  %v3334_v17 = vor.u32 %v2789_v3, %v2624_v52  ;;  %v2772_v52 = vld [vmem:[#allocation6 + $0x108] sm:$0xf]  ;;  %v2558_v3 = vld [vmem:[#allocation6 + $0x13c] sm:$0xf0] }
 0x10b   :  { %1044 = vmatpush.bf16.msrb.mxu3 %v3309_v25 }
 0x10c   :  { %4102 = vst [vmem:[#allocation62_spill] sm:$0xff] %v3334_v17  ;;  %1063 = vmatpush.bf16.msrb.mxu1 %v3334_v17 }
 0x10d   :  { %1052 = vmatpush.bf16.msrb.mxu0 %v3326_v1 }
 0x10f   :  { %1110 = vmatpush.bf16.msra.mxu3 %v3069_v27 }
 0x111   :  { %1053 = vmatpush.bf16.msrb.mxu0 %v3331_v36 }
 0x113   :  { %1111 = vmatpush.bf16.msra.mxu3 %v3094_v55 }
 0x117   :  { %1112 = vmatpush.bf16.msra.mxu3 %v3108_v5  ;;  %v2783_v5 = vld [vmem:[#allocation6 + $0x290] sm:$0xf0] }
 0x11b   :  { %1113 = vmatpush.bf16.msra.mxu3 %v3120_v18 }
 0x11f   :  { %1114 = vmatpush.bf16.msra.mxu3 %v3132_v37  ;;  %v2588_v37 = vld [vmem:[#allocation6 + $0x1ec] sm:$0xf] }
 0x123   :  { %1115 = vmatpush.bf16.msra.mxu3 %v3143_v54 }
 0x127   :  { %1116 = vmatpush.bf16.msra.mxu3 %v3155_v11 }
 0x12b   :  { %1117 = vmatpush.bf16.msra.mxu3 %v3167_v34 }
 0x14a   :  { %v3318_v12 = vpop.f32.mrf.mxu0 }
 0x14b   :  { %v788_v44 = vpop.f32.mrf.mxu1 }
 0x150   :  { %v573_v27 = vpop.f32.mrf.mxu3 }
 0x151   :  { %v574_v25 = vadd.f32 %v573_v27, %v3323_v38  ;;  %v801_v58 = vpop.f32.mrf.mxu2  ;;  %v2775_v27 = vld [vmem:[#allocation6 + $0x178] sm:$0xf]  ;;  %v2612_v38 = vld [vmem:[#allocation6 + $0x2cc] sm:$0xf] }
 0x152   :  { %v601_v10 = vpop.f32.mrf.mxu0 }
 0x153   :  { %v603_v55 = vmul.f32 0.5, %v574_v25  ;;  %v790_v43 = vpop.f32.mrf.mxu1  ;;  %v3338_v10 = vor.u32 %v2775_v27, %v2570_v39  ;;  %v2786_v25 = vld [vmem:[#allocation6 + $0x300] sm:$0xf0]  ;;  %v3347_v27 = vor.u32 %v2772_v52, %v2558_v3  ;;  %v2600_v39 = vld [vmem:[#allocation6 + $0x25c] sm:$0xf] }
 0x154   :  { %v3341_v49 = vor.u32 %v2786_v25, %v2612_v38  ;;  %v3350_v38 = vor.u32 %v2783_v5, %v2600_v39  ;;  %v3352_v25 = vperm.slane %v375_v30, 1  ;;  %v3363_v39 = vperm.slane %v375_v30, 2  ;;  %v2576_v30 = vld [vmem:[#allocation6 + $0x17c] sm:$0xf] }
 0x155   :  { %2824 = vtanh.f32 %v603_v55  ;;  %4103 = vst [vmem:[#allocation63_spill] sm:$0xff] %v3338_v10  ;;  %1054 = vmatpush.bf16.msrb.mxu0 %v3338_v10  ;;  %v272_v55 = vadd.f32 %v3248_v14, %v3170_v42  ;;  %v3355_v14 = vld [vmem:[#allocation8 + $0x7] ss:$0 sm:$0xff]  ;;  %v2546_v42 = vld [vmem:[#allocation6 + $0xcc] sm:$0xf0] }
 0x156   :  { %4104 = vst [vmem:[#allocation64_spill] sm:$0xff] %v3341_v49  ;;  %1064 = vmatpush.bf16.msrb.mxu1 %v3341_v49 }
 0x157   :  { %4105 = vst [vmem:[#allocation65_spill] sm:$0xff] %v3347_v27 }
 0x158   :  { %v575_v43 = vpop.f32.mrf.mxu3  ;;  %4106 = vst [vmem:[#allocation66_spill] sm:$0xff] %v3350_v38 }
 0x159   :  { %v803_v33 = vpop.f32.mrf.mxu2  ;;  %v818_v43 = vadd.f32 %v788_v44, %v272_v55  ;;  %4107 = vst [vmem:[#allocation67_spill] sm:$0xff] %v3352_v25  ;;  %1055 = vmatpush.bf16.msrb.mxu0 %v3347_v27  ;;  %v2780_v44 = vld [vmem:[#allocation6 + $0x220] sm:$0xf0]  ;;  %v301_v27 = vadd.f32 %v3250_v15, %v3175_v45 }
 0x15a   :  { %4108 = vst [vmem:[#allocation68_spill] sm:$0xff] %v3355_v14  ;;  %1065 = vmatpush.bf16.msrb.mxu1 %v3350_v38  ;;  %v2769_v33 = vld [vmem:[#allocation6 + $0x98] sm:$0xf]  ;;  %v3361_v5 = vor.u32 %v2780_v44, %v2588_v37  ;;  %v2777_v44 = vld [vmem:[#allocation6 + $0x1b0] sm:$0xf0] }
 0x15b   :  { %v2825_v18 = vpop.eup %2824  ;;  %v3358_v3 = vor.u32 %v2769_v33, %v2546_v42  ;;  %4111 = vst [vmem:[#allocation71_spill] sm:$0xff] %v3363_v39  ;;  %v2534_v33 = vld [vmem:[#allocation6 + $0x5c] sm:$0xf0]  ;;  %v823_v11 = vadd.f32 %v801_v58, %v301_v27  ;;  %v3376_v15 = vor.u32 %v2777_v44, %v2576_v30  ;;  %v2540_v44 = vld [vmem:[#allocation6 + $0x2c] sm:$0xf] }
 0x15c   :  { %v605_v36 = vmul.f32 0.5, %v2825_v18  ;;  %v819_v18 = vmul.f32 0.5, %v818_v43  ;;  %4110 = vst [vmem:[#allocation70_spill] sm:$0xff] %v3361_v5  ;;  %v2766_v43 = vld [vmem:[#allocation6 + $0x28] sm:$0xf] }
 0x15d   :  { %4109 = vst [vmem:[#allocation69_spill] sm:$0xff] %v3358_v3  ;;  %1056 = vmatpush.bf16.msrb.mxu0 %v3358_v3  ;;  %v3372_v37 = vor.u32 %v2766_v43, %v2534_v33  ;;  %v824_v58 = vmul.f32 0.5, %v823_v11  ;;  %v2552_v33 = vld [vmem:[#allocation6 + $0x9c] sm:$0xf] }
 0x15e   :  { %v606_v52 = vadd.f32 0.5, %v605_v36  ;;  %1066 = vmatpush.bf16.msrb.mxu1 %v3361_v5  ;;  %2826 = vtanh.f32 %v819_v18  ;;  %4113 = vst [vmem:[#allocation73_spill] sm:$0xff] %v3376_v15  ;;  %v2774_v18 = vld [vmem:[#allocation6 + $0x140] sm:$0xf0] }
 0x15f   :  { %4112 = vst [vmem:[#allocation72_spill] sm:$0xff] %v3372_v37 }
 0x160   :  { %v586_v55 = vpop.f32.mrf.mxu3  ;;  %v611_v36 = vmul.f32 %v3355_v14, %v606_v52  ;;  %v2771_v14 = vld [vmem:[#allocation6 + $0xd0] sm:$0xf0] }
 0x161   :  { %v587_v54 = vadd.f32 %v586_v55, %v3352_v25  ;;  %v600_v55 = vadd.f32 %v3318_v12, %v3363_v39  ;;  %1057 = vmatpush.bf16.msrb.mxu0 %v3372_v37  ;;  %v3383_v12 = vor.u32 %v2771_v14, %v2552_v33 }
 0x162   :  { %1067 = vmatpush.bf16.msrb.mxu1 %v3376_v15 }
 0x163   :  { %v607_v42 = vmul.f32 0.5, %v587_v54  ;;  %v612_v52 = vadd.f32 %v611_v36, %v600_v55  ;;  %v2564_v54 = vld [vmem:[#allocation6 + $0x10c] sm:$0xf]  ;;  %4115 = vst [vmem:[#allocation75_spill] sm:$0xff] %v3383_v12  ;;  %v2768_v55 = vld [vmem:[#allocation6 + $0x60] sm:$0xf0] }
 0x164   :  { %v3380_v45 = vor.u32 %v2774_v18, %v2564_v54  ;;  %v2827_v43 = vpop.eup %2826  ;;  %v3386_v11 = vor.u32 %v2768_v55, %v2540_v44 }
 0x165   :  { %2828 = vtanh.f32 %v607_v42  ;;  %v821_v36 = vmul.f32 0.5, %v2827_v43 }
 0x166   :  { %4114 = vst [vmem:[#allocation74_spill] sm:$0xff] %v3380_v45  ;;  %2830 = vtanh.f32 %v612_v52  ;;  %1068 = vmatpush.bf16.msrb.mxu1 %v3380_v45 }
 0x167   :  { %2832 = vtanh.f32 %v824_v58  ;;  %4116 = vst [vmem:[#allocation76_spill] sm:$0xff] %v3386_v11  ;;  %v822_v34 = vadd.f32 0.5, %v821_v36 }
 0x168   :  { %v588_v27 = vpop.f32.mrf.mxu3 }
 0x16a   :  { %1069 = vmatpush.bf16.msrb.mxu1 %v3383_v12 }
 0x16b   :  { %v2829_v25 = vpop.eup %2828 }
 0x16c   :  { %v609_v42 = vmul.f32 0.5, %v2829_v25  ;;  %v2831_v18 = vpop.eup %2830  ;;  %v330_v25 = vadd.f32 %v3252_v20, %v3191_v63 }
 0x16d   :  { %v2833_v39 = vpop.eup %2832 }
 0x16e   :  { %v610_v30 = vadd.f32 0.5, %v609_v42  ;;  %1070 = vmatpush.bf16.msrb.mxu1 %v3386_v11  ;;  %v826_v33 = vmul.f32 0.5, %v2833_v39  ;;  %v4118_v39 = vld [vmem:[#allocation40_spill] sm:$0xff] }
 0x170   :  { %v614_v54 = vsub.f32 1.0, %v610_v30  ;;  %v827_v36 = vadd.f32 0.5, %v826_v33  ;;  %v4124_v33 = vld [vmem:[#allocation58_spill] sm:$0xff] }
 0x171   :  { %v814_v27 = vpop.f32.mrf.mxu3 }
 0x172   :  { %v3388_v52 = vmul.f32 %v2831_v18, %v614_v54  ;;  %v828_v14 = vadd.f32 %v3195_v7, %v814_v27  ;;  %v832_v44 = vsub.f32 1.0, %v827_v36  ;;  %v834_v54 = vmul.f32 %v827_v36, %v3209_v47  ;;  %v4117_v47 = vld [vmem:[#allocation30_spill] sm:$0xff]  ;;  %v4126_v36 = vld [vmem:[#allocation44_spill] sm:$0xff] }
 0x173   :  { %v4119_v27 = vld [vmem:[#allocation14_spill] sm:$0xff] }
 0x174   :  { %v829_v58 = vmul.f32 %v828_v14, %v822_v34  ;;  %v876_v43 = vpack.c.bf16 %v3388_v52, %v3388_v52  ;;  %v4120_v14 = vld [vmem:[#allocation57_spill] sm:$0xff] }
 0x176   :  { %v830_v42 = vadd.f32 %v829_v58, %v330_v25  ;;  %1045 = vmatmul.bf16.vlgmr.msrb.gmra.mxu3 %v876_v43  ;;  %v4121_v25 = vld [vmem:[#allocation28_spill] sm:$0xff]  ;;  %v4122_v58 = vld [vmem:[#allocation17_spill] sm:$0xff] }
 0x177   :  { %1181 = vmatpush.bf16.msrb.mxu3 %v3083_v40 }
 0x178   :  { %2834 = vtanh.f32 %v830_v42  ;;  %v4125_v42 = vld [vmem:[#allocation19_spill] sm:$0xff] }
 0x179   :  { %v816_v30 = vpop.f32.mrf.mxu3 }
 0x17a   :  { %v4127_v30 = vld [vmem:[#allocation21_spill] sm:$0xff] }
 0x17b   :  { %1182 = vmatpush.bf16.msrb.mxu3 %v3096_v56 }
 0x17e   :  { %v2835_v55 = vpop.eup %2834 }
 0x17f   :  { %v833_v18 = vmul.f32 %v2835_v55, %v832_v44  ;;  %1183 = vmatpush.bf16.msrb.mxu3 %v3103_v0  ;;  %v4128_v44 = vld [vmem:[#allocation46_spill] sm:$0xff]  ;;  %v4129_v55 = vld [vmem:[#allocation61_spill] sm:$0xff] }
 0x181   :  { %v3400_v34 = vadd.f32 %v834_v54, %v833_v18  ;;  %v4130_v54 = vld [vmem:[#allocation23_spill] sm:$0xff]  ;;  %v4131_v18 = vld [vmem:[#allocation49_spill] sm:$0xff] }
 0x183   :  { %v836_v20 = vpack.c.bf16 %v3400_v34, %v3400_v34  ;;  %1184 = vmatpush.bf16.msrb.mxu3 %v3115_v13 }
 0x185   :  { %845 = vmatmul.bf16.vlgmr.msra.gmra.mxu0 %v836_v20  ;;  %858 = vmatmul.bf16.vlgmr.msra.gmra.mxu1 %v836_v20 }
 0x186   :  { %871 = vmatmul.bf16.vlgmr.msra.gmra.mxu2 %v836_v20  ;;  %1123 = vmatpush.bf16.msra.mxu0 %v3216_v51 }
 0x187   :  { %1118 = vmatmul.bf16.vlgmr.msra.gmra.mxu3 %v836_v20  ;;  %1155 = vmatpush.bf16.msra.mxu1 %v3056_v53 }
 0x188   :  { %1168 = vmatpush.bf16.msra.mxu2 %v3088_v48  ;;  %1185 = vmatpush.bf16.msrb.mxu3 %v3127_v28 }
 0x18a   :  { %1124 = vmatpush.bf16.msra.mxu0 %v3219_v62 }
 0x18b   :  { %1156 = vmatpush.bf16.msra.mxu1 %v3059_v59 }
 0x18c   :  { %1169 = vmatpush.bf16.msra.mxu2 %v3101_v60  ;;  %1186 = vmatpush.bf16.msrb.mxu3 %v3139_v46 }
 0x18e   :  { %1125 = vmatpush.bf16.msra.mxu0 %v3223_v6 }
 0x18f   :  { %1157 = vmatpush.bf16.msra.mxu1 %v3062_v9 }
 0x190   :  { %1170 = vmatpush.bf16.msra.mxu2 %v3112_v8  ;;  %1187 = vmatpush.bf16.msrb.mxu3 %v3151_v2 }
 0x192   :  { %1126 = vmatpush.bf16.msra.mxu0 %v3227_v19 }
 0x193   :  { %1158 = vmatpush.bf16.msra.mxu1 %v3065_v21 }
 0x194   :  { %1171 = vmatpush.bf16.msra.mxu2 %v3124_v23  ;;  %1188 = vmatpush.bf16.msrb.mxu3 %v3163_v24 }
 0x195   :  { %1058 = vmatmul.bf16.vlgmr.msrb.gmra.mxu0 %v876_v43  ;;  %1071 = vmatmul.bf16.vlgmr.msrb.gmra.mxu1 %v876_v43  ;;  %v4123_v43 = vld [vmem:[#allocation43_spill] sm:$0xff] }
 0x196   :  { %1105 = vmatmul.bf16.vlgmr.msrb.gmra.mxu2 %v836_v20  ;;  %1127 = vmatpush.bf16.msra.mxu0 %v3231_v22 }
 0x197   :  { %1159 = vmatpush.bf16.msra.mxu1 %v3072_v29 }
 0x198   :  { %1255 = vmatpush.bf16.msra.mxu3 %v3067_v26  ;;  %1172 = vmatpush.bf16.msra.mxu2 %v3135_v41 }
 0x19a   :  { %1128 = vmatpush.bf16.msra.mxu0 %v3235_v31 }
 0x19b   :  { %1160 = vmatpush.bf16.msra.mxu1 %v3077_v32 }
 0x19c   :  { %1256 = vmatpush.bf16.msra.mxu3 %v3090_v50  ;;  %1173 = vmatpush.bf16.msra.mxu2 %v3147_v61 }
 0x19e   :  { %1129 = vmatpush.bf16.msra.mxu0 %v3239_v57 }
 0x19f   :  { %1161 = vmatpush.bf16.msra.mxu1 %v3080_v35 }
 0x1a0   :  { %1257 = vmatpush.bf16.msra.mxu3 %v3106_v4  ;;  %1174 = vmatpush.bf16.msra.mxu2 %v3159_v16 }
 0x1a2   :  { %1130 = vmatpush.bf16.msra.mxu0 %v4117_v47 }
 0x1a3   :  { %1162 = vmatpush.bf16.msra.mxu1 %v4119_v27 }
 0x1a4   :  { %1175 = vmatpush.bf16.msra.mxu2 %v4121_v25  ;;  %1258 = vmatpush.bf16.msra.mxu3 %v4122_v58 }
 0x1a5   :  { %1131 = vmatmul.bf16.vlgmr.msra.gmra.mxu0 %v836_v20  ;;  %v4132_v20 = vld [vmem:[#allocation25_spill] sm:$0xff] }
 0x1a6   :  { %1195 = vmatpush.bf16.msrb.mxu0 %v4118_v39 }
 0x1a7   :  { %1208 = vmatpush.bf16.msrb.mxu1 %v4120_v14 }
 0x1a8   :  { %1221 = vmatpush.bf16.msrb.mxu2 %v3334_v17  ;;  %1259 = vmatpush.bf16.msra.mxu3 %v4125_v42  ;;  %v4147_v42 = vld [vmem:[#allocation68_spill] sm:$0xff] }
 0x1aa   :  { %1196 = vmatpush.bf16.msrb.mxu0 %v4123_v43 }
 0x1ab   :  { %1209 = vmatpush.bf16.msrb.mxu1 %v4124_v33 }
 0x1ac   :  { %1222 = vmatpush.bf16.msrb.mxu2 %v3341_v49  ;;  %1260 = vmatpush.bf16.msra.mxu3 %v4127_v30 }
 0x1ae   :  { %1197 = vmatpush.bf16.msrb.mxu0 %v4126_v36 }
 0x1af   :  { %1210 = vmatpush.bf16.msrb.mxu1 %v3326_v1  ;;  %v4133_v1 = vld [vmem:[#allocation51_spill] sm:$0xff] }
 0x1b0   :  { %1223 = vmatpush.bf16.msrb.mxu2 %v3350_v38  ;;  %1261 = vmatpush.bf16.msra.mxu3 %v4130_v54  ;;  %v4134_v38 = vld [vmem:[#allocation65_spill] sm:$0xff] }
 0x1b2   :  { %1198 = vmatpush.bf16.msrb.mxu0 %v4128_v44  ;;  %v4135_v44 = vld [vmem:[#allocation54_spill] sm:$0xff] }
 0x1b3   :  { %1211 = vmatpush.bf16.msrb.mxu1 %v4129_v55 }
 0x1b4   :  { %1224 = vmatpush.bf16.msrb.mxu2 %v3361_v5  ;;  %1262 = vmatpush.bf16.msra.mxu3 %v4132_v20  ;;  %v4136_v5 = vld [vmem:[#allocation55_spill] sm:$0xff] }
 0x1b5   :  { %v4145_v20 = vld [vmem:[#allocation59_spill] sm:$0xff] }
 0x1b6   :  { %1199 = vmatpush.bf16.msrb.mxu0 %v4131_v18  ;;  %v4137_v18 = vld [vmem:[#allocation13_spill] sm:$0xff] }
 0x1b7   :  { %1212 = vmatpush.bf16.msrb.mxu1 %v3338_v10 }
 0x1b8   :  { %1225 = vmatpush.bf16.msrb.mxu2 %v3376_v15  ;;  %v4138_v15 = vld [vmem:[#allocation15_spill] sm:$0xff] }
 0x1ba   :  { %1200 = vmatpush.bf16.msrb.mxu0 %v4133_v1  ;;  %v4139_v1 = vld [vmem:[#allocation16_spill] sm:$0xff] }
 0x1bb   :  { %1213 = vmatpush.bf16.msrb.mxu1 %v4134_v38  ;;  %v4140_v38 = vld [vmem:[#allocation18_spill] sm:$0xff] }
 0x1bc   :  { %1226 = vmatpush.bf16.msrb.mxu2 %v3380_v45  ;;  %v4141_v45 = vld [vmem:[#allocation20_spill] sm:$0xff] }
 0x1be   :  { %1201 = vmatpush.bf16.msrb.mxu0 %v4135_v44  ;;  %v4142_v44 = vld [vmem:[#allocation22_spill] sm:$0xff] }
 0x1bf   :  { %1214 = vmatpush.bf16.msrb.mxu1 %v3358_v3  ;;  %v4143_v3 = vld [vmem:[#allocation24_spill] sm:$0xff] }
 0x1c0   :  { %1227 = vmatpush.bf16.msrb.mxu2 %v3383_v12  ;;  %v4144_v12 = vld [vmem:[#allocation26_spill] sm:$0xff] }
 0x1c2   :  { %1202 = vmatpush.bf16.msrb.mxu0 %v4136_v5 }
 0x1c3   :  { %1215 = vmatpush.bf16.msrb.mxu1 %v3372_v37 }
 0x1c4   :  { %1228 = vmatpush.bf16.msrb.mxu2 %v3386_v11 }
 0x1c6   :  { %1268 = vmatpush.bf16.msra.mxu0 %v4137_v18 }
 0x1ca   :  { %1269 = vmatpush.bf16.msra.mxu0 %v4138_v15 }
 0x1ce   :  { %1270 = vmatpush.bf16.msra.mxu0 %v4139_v1 }
 0x1d2   :  { %1271 = vmatpush.bf16.msra.mxu0 %v4140_v38 }
 0x1d6   :  { %1272 = vmatpush.bf16.msra.mxu0 %v4141_v45 }
 0x1da   :  { %1273 = vmatpush.bf16.msra.mxu0 %v4142_v44  ;;  %v4146_v44 = vld [vmem:[#allocation67_spill] sm:$0xff] }
 0x1de   :  { %1274 = vmatpush.bf16.msra.mxu0 %v4143_v3 }
 0x1e2   :  { %1275 = vmatpush.bf16.msra.mxu0 %v4144_v12 }
 0x1f9   :  { %v1046_v5 = vpop.f32.mrf.mxu3 }
 0x201   :  { %v1048_v18 = vpop.f32.mrf.mxu3 }
 0x202   :  { %v846_v10 = vpop.f32.mrf.mxu0  ;;  %v859_v37 = vpop.f32.mrf.mxu1 }
 0x203   :  { %v847_v11 = vadd.f32 %v846_v10, %v4145_v20  ;;  %v860_v49 = vadd.f32 %v859_v37, %v4146_v44  ;;  %v4151_v20 = vld [vmem:[#allocation27_spill] sm:$0xff] }
 0x205   :  { %v1076_v55 = vadd.f32 %v1046_v5, %v847_v11  ;;  %v4148_v11 = vld [vmem:[#allocation29_spill] sm:$0xff] }
 0x207   :  { %v1077_v15 = vmul.f32 0.5, %v1076_v55 }
 0x209   :  { %2836 = vtanh.f32 %v1077_v15  ;;  %v872_v1 = vpop.f32.mrf.mxu2  ;;  %v4149_v15 = vld [vmem:[#allocation32_spill] sm:$0xff] }
 0x20a   :  { %v848_v54 = vpop.f32.mrf.mxu0  ;;  %v861_v38 = vpop.f32.mrf.mxu1  ;;  %v304_v55 = vadd.f32 %v4149_v15, %v4148_v11 }
 0x20b   :  { %v1119_v36 = vpop.f32.mrf.mxu3  ;;  %v4150_v54 = vld [vmem:[#allocation71_spill] sm:$0xff] }
 0x20c   :  { %v873_v38 = vadd.f32 %v872_v1, %v4150_v54  ;;  %v1141_v37 = vadd.f32 %v1119_v36, %v304_v55 }
 0x20f   :  { %v2837_v45 = vpop.eup %2836 }
 0x210   :  { %v1079_v30 = vmul.f32 0.5, %v2837_v45  ;;  %v4152_v45 = vld [vmem:[#allocation31_spill] sm:$0xff] }
 0x211   :  { %v874_v3 = vpop.f32.mrf.mxu2  ;;  %v275_v14 = vadd.f32 %v4152_v45, %v4151_v20 }
 0x212   :  { %v1059_v33 = vpop.f32.mrf.mxu0  ;;  %v1072_v12 = vpop.f32.mrf.mxu1  ;;  %v1080_v43 = vadd.f32 0.5, %v1079_v30 }
 0x213   :  { %v1081_v18 = vadd.f32 %v1059_v33, %v860_v49  ;;  %v1086_v17 = vadd.f32 %v4147_v42, %v1072_v12  ;;  %v1121_v25 = vpop.f32.mrf.mxu3 }
 0x214   :  { %v1142_v25 = vmul.f32 0.5, %v1141_v37  ;;  %v4153_v37 = vld [vmem:[#allocation33_spill] sm:$0xff] }
 0x215   :  { %v1082_v10 = vmul.f32 0.5, %v1081_v18  ;;  %v1087_v5 = vmul.f32 %v1086_v17, %v1080_v43 }
 0x217   :  { %2838 = vtanh.f32 %v1082_v10  ;;  %v1088_v3 = vadd.f32 %v1087_v5, %v873_v38 }
 0x219   :  { %v1106_v44 = vpop.f32.mrf.mxu2  ;;  %2840 = vtanh.f32 %v1088_v3  ;;  %v333_v3 = vadd.f32 %v4153_v37, %v3191_v63  ;;  %v4165_v37 = vld [vmem:[#allocation66_spill] sm:$0xff] }
 0x21a   :  { %v1136_v39 = vadd.f32 %v1106_v44, %v275_v14  ;;  %v1061_v30 = vpop.f32.mrf.mxu0  ;;  %v1074_v49 = vpop.f32.mrf.mxu1 }
 0x21c   :  { %v1137_v33 = vmul.f32 0.5, %v1136_v39 }
 0x21d   :  { %v2839_v12 = vpop.eup %2838 }
 0x21e   :  { %v1084_v17 = vmul.f32 0.5, %v2839_v12  ;;  %2842 = vtanh.f32 %v1137_v33 }
 0x21f   :  { %2844 = vtanh.f32 %v1142_v25  ;;  %v2841_v15 = vpop.eup %2840 }
 0x220   :  { %v1085_v43 = vadd.f32 0.5, %v1084_v17 }
 0x221   :  { %v1108_v18 = vpop.f32.mrf.mxu2 }
 0x222   :  { %v1090_v1 = vsub.f32 1.0, %v1085_v43  ;;  %v1132_v10 = vpop.f32.mrf.mxu0  ;;  %v1092_v36 = vmul.f32 %v1085_v43, %v3388_v52 }
 0x223   :  { %v1146_v38 = vadd.f32 %v3195_v7, %v1132_v10  ;;  %v4156_v10 = vld [vmem:[#allocation28_spill] sm:$0xff] }
 0x224   :  { %v2843_v54 = vpop.eup %2842  ;;  %v1091_v5 = vmul.f32 %v2841_v15, %v1090_v1  ;;  %v4155_v1 = vld [vmem:[#allocation57_spill] sm:$0xff]  ;;  %v4157_v15 = vld [vmem:[#allocation62_spill] sm:$0xff] }
 0x225   :  { %v1139_v55 = vmul.f32 0.5, %v2843_v54  ;;  %v2845_v44 = vpop.eup %2844 }
 0x226   :  { %v3482_v14 = vadd.f32 %v1092_v36, %v1091_v5  ;;  %v1144_v49 = vmul.f32 0.5, %v2845_v44  ;;  %v4158_v36 = vld [vmem:[#allocation19_spill] sm:$0xff]  ;;  %v4161_v44 = vld [vmem:[#allocation64_spill] sm:$0xff] }
 0x227   :  { %v1140_v39 = vadd.f32 0.5, %v1139_v55  ;;  %v4159_v5 = vld [vmem:[#allocation43_spill] sm:$0xff]  ;;  %v4160_v55 = vld [vmem:[#allocation58_spill] sm:$0xff] }
 0x228   :  { %v1194_v45 = vpack.c.bf16 %v3482_v14, %v3482_v14  ;;  %v1145_v52 = vadd.f32 0.5, %v1144_v49  ;;  %v4168_v49 = vld [vmem:[#allocation61_spill] sm:$0xff] }
 0x229   :  { %v1147_v30 = vmul.f32 %v1146_v38, %v1140_v39  ;;  %v4162_v39 = vld [vmem:[#allocation21_spill] sm:$0xff]  ;;  %v4163_v38 = vld [vmem:[#allocation44_spill] sm:$0xff] }
 0x22a   :  { %v1134_v33 = vpop.f32.mrf.mxu0  ;;  %1203 = vmatmul.bf16.vlgmr.msrb.gmra.mxu0 %v1194_v45  ;;  %v1150_v54 = vsub.f32 1.0, %v1145_v52  ;;  %v1152_v7 = vmul.f32 %v1145_v52, %v3400_v34  ;;  %v4154_v34 = vld [vmem:[#allocation40_spill] sm:$0xff]  ;;  %v4171_v52 = vld [vmem:[#allocation49_spill] sm:$0xff] }
 0x22b   :  { %v1148_v12 = vadd.f32 %v1147_v30, %v333_v3  ;;  %1339 = vmatpush.bf16.msrb.mxu0 %v3083_v40  ;;  %v4166_v3 = vld [vmem:[#allocation23_spill] sm:$0xff]  ;;  %v4167_v30 = vld [vmem:[#allocation46_spill] sm:$0xff] }
 0x22c   :  { %v4169_v33 = vld [vmem:[#allocation70_spill] sm:$0xff] }
 0x22d   :  { %2846 = vtanh.f32 %v1148_v12  ;;  %v4170_v12 = vld [vmem:[#allocation25_spill] sm:$0xff] }
 0x22f   :  { %1340 = vmatpush.bf16.msrb.mxu0 %v3096_v56 }
 0x233   :  { %v2847_v25 = vpop.eup %2846  ;;  %1341 = vmatpush.bf16.msrb.mxu0 %v3103_v0 }
 0x234   :  { %v1151_v17 = vmul.f32 %v2847_v25, %v1150_v54  ;;  %v4172_v54 = vld [vmem:[#allocation63_spill] sm:$0xff]  ;;  %v4173_v25 = vld [vmem:[#allocation73_spill] sm:$0xff] }
 0x236   :  { %v3493_v43 = vadd.f32 %v1152_v7, %v1151_v17  ;;  %v4174_v7 = vld [vmem:[#allocation51_spill] sm:$0xff]  ;;  %v4175_v17 = vld [vmem:[#allocation65_spill] sm:$0xff] }
 0x237   :  { %1342 = vmatpush.bf16.msrb.mxu0 %v3115_v13 }
 0x238   :  { %v1154_v18 = vpack.c.bf16 %v3493_v43, %v3493_v43 }
 0x23a   :  { %1163 = vmatmul.bf16.vlgmr.msra.gmra.mxu1 %v1154_v18  ;;  %1176 = vmatmul.bf16.vlgmr.msra.gmra.mxu2 %v1154_v18 }
 0x23b   :  { %1189 = vmatmul.bf16.vlgmr.msrb.gmra.mxu3 %v1154_v18  ;;  %1276 = vmatmul.bf16.vlgmr.msra.gmra.mxu0 %v1154_v18 }
 0x23c   :  { %1281 = vmatpush.bf16.msra.mxu1 %v3216_v51  ;;  %1313 = vmatpush.bf16.msra.mxu2 %v3056_v53 }
 0x23d   :  { %1326 = vmatpush.bf16.msrb.mxu3 %v3088_v48  ;;  %1343 = vmatpush.bf16.msrb.mxu0 %v3127_v28 }
 0x240   :  { %1282 = vmatpush.bf16.msra.mxu1 %v3219_v62  ;;  %1314 = vmatpush.bf16.msra.mxu2 %v3059_v59 }
 0x241   :  { %1327 = vmatpush.bf16.msrb.mxu3 %v3101_v60  ;;  %1344 = vmatpush.bf16.msrb.mxu0 %v3139_v46 }
 0x244   :  { %1283 = vmatpush.bf16.msra.mxu1 %v3223_v6  ;;  %1315 = vmatpush.bf16.msra.mxu2 %v3062_v9 }
 0x245   :  { %1328 = vmatpush.bf16.msrb.mxu3 %v3112_v8  ;;  %1345 = vmatpush.bf16.msrb.mxu0 %v3151_v2 }
 0x248   :  { %1284 = vmatpush.bf16.msra.mxu1 %v3227_v19  ;;  %1316 = vmatpush.bf16.msra.mxu2 %v3065_v21 }
 0x249   :  { %1329 = vmatpush.bf16.msrb.mxu3 %v3124_v23  ;;  %1346 = vmatpush.bf16.msrb.mxu0 %v3163_v24 }
 0x24a   :  { %1216 = vmatmul.bf16.vlgmr.msrb.gmra.mxu1 %v1194_v45  ;;  %1229 = vmatmul.bf16.vlgmr.msrb.gmra.mxu2 %v1194_v45  ;;  %v4164_v45 = vld [vmem:[#allocation60_spill] sm:$0xff] }
 0x24b   :  { %1263 = vmatmul.bf16.vlgmr.msra.gmra.mxu3 %v1154_v18 }
 0x24c   :  { %1285 = vmatpush.bf16.msra.mxu1 %v3231_v22  ;;  %1317 = vmatpush.bf16.msra.mxu2 %v3072_v29 }
 0x24d   :  { %1413 = vmatpush.bf16.msra.mxu0 %v3067_v26  ;;  %1330 = vmatpush.bf16.msrb.mxu3 %v3135_v41 }
 0x250   :  { %1286 = vmatpush.bf16.msra.mxu1 %v3235_v31  ;;  %1318 = vmatpush.bf16.msra.mxu2 %v3077_v32 }
 0x251   :  { %1414 = vmatpush.bf16.msra.mxu0 %v3090_v50  ;;  %1331 = vmatpush.bf16.msrb.mxu3 %v3147_v61 }
 0x254   :  { %1287 = vmatpush.bf16.msra.mxu1 %v3239_v57  ;;  %1319 = vmatpush.bf16.msra.mxu2 %v3080_v35 }
 0x255   :  { %1415 = vmatpush.bf16.msra.mxu0 %v3106_v4  ;;  %1332 = vmatpush.bf16.msrb.mxu3 %v3159_v16 }
 0x258   :  { %1288 = vmatpush.bf16.msra.mxu1 %v4117_v47  ;;  %1320 = vmatpush.bf16.msra.mxu2 %v4119_v27 }
 0x259   :  { %1416 = vmatpush.bf16.msra.mxu0 %v4122_v58  ;;  %1333 = vmatpush.bf16.msrb.mxu3 %v4156_v10 }
 0x25b   :  { %1289 = vmatmul.bf16.vlgmr.msra.gmra.mxu1 %v1154_v18  ;;  %v4176_v18 = vld [vmem:[#allocation74_spill] sm:$0xff] }
 0x25c   :  { %1353 = vmatpush.bf16.msrb.mxu1 %v4154_v34  ;;  %1366 = vmatpush.bf16.msrb.mxu2 %v4155_v1 }
 0x25d   :  { %1379 = vmatpush.bf16.msra.mxu3 %v4157_v15  ;;  %1417 = vmatpush.bf16.msra.mxu0 %v4158_v36  ;;  %v4193_v15 = vld [vmem:[#allocation35_spill] sm:$0xff] }
 0x260   :  { %1354 = vmatpush.bf16.msrb.mxu1 %v4159_v5  ;;  %1367 = vmatpush.bf16.msrb.mxu2 %v4160_v55 }
 0x261   :  { %1380 = vmatpush.bf16.msra.mxu3 %v4161_v44  ;;  %1418 = vmatpush.bf16.msra.mxu0 %v4162_v39  ;;  %v4192_v44 = vld [vmem:[#allocation67_spill] sm:$0xff] }
 0x264   :  { %1355 = vmatpush.bf16.msrb.mxu1 %v4163_v38  ;;  %1368 = vmatpush.bf16.msrb.mxu2 %v4164_v45 }
 0x265   :  { %1381 = vmatpush.bf16.msra.mxu3 %v4165_v37  ;;  %1419 = vmatpush.bf16.msra.mxu0 %v4166_v3  ;;  %v4177_v3 = vld [vmem:[#allocation54_spill] sm:$0xff] }
 0x268   :  { %1356 = vmatpush.bf16.msrb.mxu1 %v4167_v30  ;;  %1369 = vmatpush.bf16.msrb.mxu2 %v4168_v49  ;;  %v4178_v30 = vld [vmem:[#allocation69_spill] sm:$0xff]  ;;  %v4179_v49 = vld [vmem:[#allocation75_spill] sm:$0xff] }
 0x269   :  { %1382 = vmatpush.bf16.msra.mxu3 %v4169_v33  ;;  %1420 = vmatpush.bf16.msra.mxu0 %v4170_v12  ;;  %v4180_v33 = vld [vmem:[#allocation55_spill] sm:$0xff]  ;;  %v4181_v12 = vld [vmem:[#allocation72_spill] sm:$0xff] }
 0x26c   :  { %1357 = vmatpush.bf16.msrb.mxu1 %v4171_v52  ;;  %1370 = vmatpush.bf16.msrb.mxu2 %v4172_v54  ;;  %v4182_v52 = vld [vmem:[#allocation13_spill] sm:$0xff]  ;;  %v4183_v54 = vld [vmem:[#allocation76_spill] sm:$0xff] }
 0x26d   :  { %1383 = vmatpush.bf16.msra.mxu3 %v4173_v25  ;;  %v4184_v25 = vld [vmem:[#allocation15_spill] sm:$0xff] }
 0x270   :  { %1358 = vmatpush.bf16.msrb.mxu1 %v4174_v7  ;;  %1371 = vmatpush.bf16.msrb.mxu2 %v4175_v17  ;;  %v4185_v7 = vld [vmem:[#allocation16_spill] sm:$0xff]  ;;  %v4186_v17 = vld [vmem:[#allocation18_spill] sm:$0xff] }
 0x271   :  { %1384 = vmatpush.bf16.msra.mxu3 %v4176_v18  ;;  %v4187_v18 = vld [vmem:[#allocation20_spill] sm:$0xff] }
 0x274   :  { %1359 = vmatpush.bf16.msrb.mxu1 %v4177_v3  ;;  %1372 = vmatpush.bf16.msrb.mxu2 %v4178_v30  ;;  %v4188_v3 = vld [vmem:[#allocation22_spill] sm:$0xff]  ;;  %v4189_v30 = vld [vmem:[#allocation24_spill] sm:$0xff] }
 0x275   :  { %1385 = vmatpush.bf16.msra.mxu3 %v4179_v49  ;;  %v4190_v49 = vld [vmem:[#allocation26_spill] sm:$0xff] }
 0x278   :  { %1360 = vmatpush.bf16.msrb.mxu1 %v4180_v33  ;;  %1373 = vmatpush.bf16.msrb.mxu2 %v4181_v12 }
 0x279   :  { %1386 = vmatpush.bf16.msra.mxu3 %v4183_v54 }
 0x27c   :  { %1426 = vmatpush.bf16.msra.mxu1 %v4182_v52  ;;  %v4191_v52 = vld [vmem:[#allocation59_spill] sm:$0xff] }
 0x280   :  { %1427 = vmatpush.bf16.msra.mxu1 %v4184_v25 }
 0x284   :  { %1428 = vmatpush.bf16.msra.mxu1 %v4185_v7 }
 0x288   :  { %1429 = vmatpush.bf16.msra.mxu1 %v4186_v17 }
 0x28c   :  { %1430 = vmatpush.bf16.msra.mxu1 %v4187_v18 }
 0x290   :  { %1431 = vmatpush.bf16.msra.mxu1 %v4188_v3 }
 0x294   :  { %1432 = vmatpush.bf16.msra.mxu1 %v4189_v30 }
 0x298   :  { %1433 = vmatpush.bf16.msra.mxu1 %v4190_v49 }
 0x2a7   :  { %v1204_v33 = vpop.f32.mrf.mxu0 }
 0x2af   :  { %v1206_v12 = vpop.f32.mrf.mxu0 }
 0x2b7   :  { %v1164_v39 = vpop.f32.mrf.mxu1 }
 0x2b8   :  { %v1165_v37 = vadd.f32 %v1164_v39, %v4191_v52  ;;  %v1277_v54 = vpop.f32.mrf.mxu0  ;;  %v306_v39 = vadd.f32 %v4193_v15, %v4148_v11 }
 0x2ba   :  { %v1234_v45 = vadd.f32 %v1204_v33, %v1165_v37 }
 0x2bc   :  { %v1235_v25 = vmul.f32 0.5, %v1234_v45  ;;  %v4194_v45 = vld [vmem:[#allocation34_spill] sm:$0xff] }
 0x2bd   :  { %v1177_v38 = vpop.f32.mrf.mxu2  ;;  %v277_v37 = vadd.f32 %v4194_v45, %v4151_v20 }
 0x2be   :  { %v1190_v7 = vpop.f32.mrf.mxu3  ;;  %2848 = vtanh.f32 %v1235_v25  ;;  %v1178_v3 = vadd.f32 %v1177_v38, %v4192_v44  ;;  %v4195_v44 = vld [vmem:[#allocation71_spill] sm:$0xff] }
 0x2bf   :  { %v1166_v36 = vpop.f32.mrf.mxu1  ;;  %v1191_v52 = vadd.f32 %v1190_v7, %v4195_v44 }
 0x2c0   :  { %v1279_v17 = vpop.f32.mrf.mxu0  ;;  %v1299_v36 = vadd.f32 %v1277_v54, %v306_v39 }
 0x2c4   :  { %v2849_v30 = vpop.eup %2848 }
 0x2c5   :  { %v1179_v18 = vpop.f32.mrf.mxu2  ;;  %v1237_v12 = vmul.f32 0.5, %v2849_v30 }
 0x2c6   :  { %v1192_v55 = vpop.f32.mrf.mxu3 }
 0x2c7   :  { %v1217_v5 = vpop.f32.mrf.mxu1  ;;  %v1238_v17 = vadd.f32 0.5, %v1237_v12 }
 0x2c8   :  { %v1239_v49 = vadd.f32 %v1217_v5, %v1178_v3 }
 0x2ca   :  { %v1240_v58 = vmul.f32 0.5, %v1239_v49  ;;  %v1300_v49 = vmul.f32 0.5, %v1299_v36 }
 0x2cc   :  { %2850 = vtanh.f32 %v1240_v58 }
 0x2cd   :  { %v1230_v33 = vpop.f32.mrf.mxu2 }
 0x2ce   :  { %v1244_v25 = vadd.f32 %v4147_v42, %v1230_v33  ;;  %v1264_v18 = vpop.f32.mrf.mxu3 }
 0x2cf   :  { %v1294_v38 = vadd.f32 %v1264_v18, %v277_v37  ;;  %v1219_v55 = vpop.f32.mrf.mxu1 }
 0x2d0   :  { %v1245_v5 = vmul.f32 %v1244_v25, %v1238_v17 }
 0x2d1   :  { %v1295_v3 = vmul.f32 0.5, %v1294_v38  ;;  %v3575_v38 = vld [vmem:[#allocation8 + $0x3] ss:$0 sm:$0xff] }
 0x2d2   :  { %v2851_v30 = vpop.eup %2850  ;;  %v1246_v10 = vadd.f32 %v1245_v5, %v1191_v52 }
 0x2d3   :  { %v1242_v15 = vmul.f32 0.5, %v2851_v30  ;;  %2852 = vtanh.f32 %v1295_v3 }
 0x2d4   :  { %2854 = vtanh.f32 %v1246_v10  ;;  %v4196_v10 = vld [vmem:[#allocation36_spill] sm:$0xff] }
 0x2d5   :  { %v1243_v58 = vadd.f32 0.5, %v1242_v15  ;;  %v1232_v45 = vpop.f32.mrf.mxu2  ;;  %2856 = vtanh.f32 %v1300_v49  ;;  %v335_v55 = vadd.f32 %v4196_v10, %v3191_v63  ;;  %v4205_v10 = vld [vmem:[#allocation60_spill] sm:$0xff] }
 0x2d6   :  { %v1266_v54 = vpop.f32.mrf.mxu3 }
 0x2d7   :  { %v1248_v33 = vsub.f32 1.0, %v1243_v58  ;;  %v1250_v18 = vmul.f32 %v1243_v58, %v3482_v14 }
 0x2d8   :  { %v1290_v12 = vpop.f32.mrf.mxu1 }
 0x2d9   :  { %v2853_v39 = vpop.eup %2852  ;;  %v1304_v52 = vadd.f32 %v3575_v38, %v1290_v12 }
 0x2da   :  { %v2855_v42 = vpop.eup %2854  ;;  %v1297_v37 = vmul.f32 0.5, %v2853_v39 }
 0x2db   :  { %v1249_v7 = vmul.f32 %v2855_v42, %v1248_v33  ;;  %v2857_v17 = vpop.eup %2856  ;;  %v4198_v33 = vld [vmem:[#allocation62_spill] sm:$0xff] }
 0x2dc   :  { %v1298_v25 = vadd.f32 0.5, %v1297_v37  ;;  %v1302_v3 = vmul.f32 0.5, %v2857_v17  ;;  %v4199_v37 = vld [vmem:[#allocation17_spill] sm:$0xff]  ;;  %v4202_v17 = vld [vmem:[#allocation64_spill] sm:$0xff] }
 0x2dd   :  { %v3578_v36 = vadd.f32 %v1250_v18, %v1249_v7  ;;  %v4200_v18 = vld [vmem:[#allocation43_spill] sm:$0xff]  ;;  %v4201_v7 = vld [vmem:[#allocation58_spill] sm:$0xff] }
 0x2de   :  { %v1305_v5 = vmul.f32 %v1304_v52, %v1298_v25  ;;  %v1303_v42 = vadd.f32 0.5, %v1302_v3  ;;  %v4203_v25 = vld [vmem:[#allocation19_spill] sm:$0xff]  ;;  %v4204_v52 = vld [vmem:[#allocation44_spill] sm:$0xff]  ;;  %v4208_v3 = vld [vmem:[#allocation46_spill] sm:$0xff] }
 0x2df   :  { %v1352_v30 = vpack.c.bf16 %v3578_v36, %v3578_v36 }
 0x2e0   :  { %v1306_v49 = vadd.f32 %v1305_v5, %v335_v55  ;;  %v1292_v15 = vpop.f32.mrf.mxu1  ;;  %v1308_v14 = vsub.f32 1.0, %v1303_v42  ;;  %v1310_v45 = vmul.f32 %v1303_v42, %v3493_v43  ;;  %v4197_v43 = vld [vmem:[#allocation28_spill] sm:$0xff]  ;;  %v4206_v55 = vld [vmem:[#allocation66_spill] sm:$0xff]  ;;  %v4207_v5 = vld [vmem:[#allocation21_spill] sm:$0xff] }
 0x2e1   :  { %1361 = vmatmul.bf16.vlgmr.msrb.gmra.mxu1 %v1352_v30  ;;  %v4211_v15 = vld [vmem:[#allocation23_spill] sm:$0xff]  ;;  %v4212_v42 = vld [vmem:[#allocation49_spill] sm:$0xff] }
 0x2e2   :  { %2858 = vtanh.f32 %v1306_v49  ;;  %1497 = vmatpush.bf16.msrb.mxu1 %v3083_v40  ;;  %v4210_v49 = vld [vmem:[#allocation70_spill] sm:$0xff] }
 0x2e6   :  { %1498 = vmatpush.bf16.msrb.mxu1 %v3096_v56 }
 0x2e8   :  { %v2859_v58 = vpop.eup %2858 }
 0x2e9   :  { %v1309_v54 = vmul.f32 %v2859_v58, %v1308_v14  ;;  %v4213_v14 = vld [vmem:[#allocation63_spill] sm:$0xff]  ;;  %v4214_v58 = vld [vmem:[#allocation73_spill] sm:$0xff] }
 0x2ea   :  { %1499 = vmatpush.bf16.msrb.mxu1 %v3103_v0 }
 0x2eb   :  { %v3588_v12 = vadd.f32 %v1310_v45, %v1309_v54  ;;  %v4215_v45 = vld [vmem:[#allocation25_spill] sm:$0xff]  ;;  %v4216_v54 = vld [vmem:[#allocation51_spill] sm:$0xff] }
 0x2ed   :  { %v1312_v39 = vpack.c.bf16 %v3588_v12, %v3588_v12 }
 0x2ee   :  { %1500 = vmatpush.bf16.msrb.mxu1 %v3115_v13 }
 0x2ef   :  { %1321 = vmatmul.bf16.vlgmr.msra.gmra.mxu2 %v1312_v39  ;;  %1334 = vmatmul.bf16.vlgmr.msrb.gmra.mxu3 %v1312_v39 }
 0x2f0   :  { %1347 = vmatmul.bf16.vlgmr.msrb.gmra.mxu0 %v1312_v39  ;;  %1439 = vmatpush.bf16.msra.mxu2 %v3216_v51 }
 0x2f1   :  { %1434 = vmatmul.bf16.vlgmr.msra.gmra.mxu1 %v1312_v39  ;;  %1471 = vmatpush.bf16.msrb.mxu3 %v3056_v53 }
 0x2f2   :  { %1484 = vmatpush.bf16.msrb.mxu0 %v3088_v48  ;;  %1501 = vmatpush.bf16.msrb.mxu1 %v3127_v28 }
 0x2f4   :  { %1440 = vmatpush.bf16.msra.mxu2 %v3219_v62 }
 0x2f5   :  { %1472 = vmatpush.bf16.msrb.mxu3 %v3059_v59 }
 0x2f6   :  { %1485 = vmatpush.bf16.msrb.mxu0 %v3101_v60  ;;  %1502 = vmatpush.bf16.msrb.mxu1 %v3139_v46 }
 0x2f8   :  { %1441 = vmatpush.bf16.msra.mxu2 %v3223_v6 }
 0x2f9   :  { %1473 = vmatpush.bf16.msrb.mxu3 %v3062_v9 }
 0x2fa   :  { %1486 = vmatpush.bf16.msrb.mxu0 %v3112_v8  ;;  %1503 = vmatpush.bf16.msrb.mxu1 %v3151_v2 }
 0x2fc   :  { %1442 = vmatpush.bf16.msra.mxu2 %v3227_v19 }
 0x2fd   :  { %1474 = vmatpush.bf16.msrb.mxu3 %v3065_v21 }
 0x2fe   :  { %1487 = vmatpush.bf16.msrb.mxu0 %v3124_v23  ;;  %1504 = vmatpush.bf16.msrb.mxu1 %v3163_v24 }
 0x2ff   :  { %1374 = vmatmul.bf16.vlgmr.msrb.gmra.mxu2 %v1352_v30  ;;  %1387 = vmatmul.bf16.vlgmr.msra.gmra.mxu3 %v1352_v30  ;;  %v4209_v30 = vld [vmem:[#allocation61_spill] sm:$0xff] }
 0x300   :  { %1421 = vmatmul.bf16.vlgmr.msra.gmra.mxu0 %v1312_v39  ;;  %1443 = vmatpush.bf16.msra.mxu2 %v3231_v22 }
 0x301   :  { %1475 = vmatpush.bf16.msrb.mxu3 %v3072_v29 }
 0x302   :  { %1571 = vmatpush.bf16.msra.mxu1 %v3067_v26  ;;  %1488 = vmatpush.bf16.msrb.mxu0 %v3135_v41 }
 0x304   :  { %1444 = vmatpush.bf16.msra.mxu2 %v3235_v31 }
 0x305   :  { %1476 = vmatpush.bf16.msrb.mxu3 %v3077_v32 }
 0x306   :  { %1572 = vmatpush.bf16.msra.mxu1 %v3090_v50  ;;  %1489 = vmatpush.bf16.msrb.mxu0 %v3147_v61 }
 0x308   :  { %1445 = vmatpush.bf16.msra.mxu2 %v3239_v57 }
 0x309   :  { %1477 = vmatpush.bf16.msrb.mxu3 %v3080_v35 }
 0x30a   :  { %1573 = vmatpush.bf16.msra.mxu1 %v3106_v4  ;;  %1490 = vmatpush.bf16.msrb.mxu0 %v3159_v16 }
 0x30c   :  { %1446 = vmatpush.bf16.msra.mxu2 %v4117_v47 }
 0x30d   :  { %1478 = vmatpush.bf16.msrb.mxu3 %v4119_v27 }
 0x30e   :  { %1491 = vmatpush.bf16.msrb.mxu0 %v4197_v43  ;;  %1574 = vmatpush.bf16.msra.mxu1 %v4199_v37 }
 0x30f   :  { %1447 = vmatmul.bf16.vlgmr.msra.gmra.mxu2 %v1312_v39  ;;  %v4217_v39 = vld [vmem:[#allocation65_spill] sm:$0xff] }
 0x310   :  { %1511 = vmatpush.bf16.msrb.mxu2 %v4154_v34 }
 0x311   :  { %1524 = vmatpush.bf16.msra.mxu3 %v4155_v1  ;;  %v4236_v1 = vld [vmem:[#allocation38_spill] sm:$0xff] }
 0x312   :  { %1537 = vmatpush.bf16.msra.mxu0 %v4198_v33  ;;  %1575 = vmatpush.bf16.msra.mxu1 %v4203_v25  ;;  %v4235_v33 = vld [vmem:[#allocation67_spill] sm:$0xff]  ;;  %v309_v27 = vadd.f32 %v4236_v1, %v4148_v11 }
 0x314   :  { %1512 = vmatpush.bf16.msrb.mxu2 %v4200_v18 }
 0x315   :  { %1525 = vmatpush.bf16.msra.mxu3 %v4201_v7 }
 0x316   :  { %1538 = vmatpush.bf16.msra.mxu0 %v4202_v17  ;;  %1576 = vmatpush.bf16.msra.mxu1 %v4207_v5  ;;  %v4218_v5 = vld [vmem:[#allocation74_spill] sm:$0xff] }
 0x318   :  { %1513 = vmatpush.bf16.msrb.mxu2 %v4204_v52  ;;  %v4233_v52 = vld [vmem:[#allocation59_spill] sm:$0xff] }
 0x319   :  { %1526 = vmatpush.bf16.msra.mxu3 %v4205_v10 }
 0x31a   :  { %1539 = vmatpush.bf16.msra.mxu0 %v4206_v55  ;;  %1577 = vmatpush.bf16.msra.mxu1 %v4211_v15  ;;  %v4222_v15 = vld [vmem:[#allocation55_spill] sm:$0xff] }
 0x31c   :  { %1514 = vmatpush.bf16.msrb.mxu2 %v4208_v3  ;;  %v4219_v3 = vld [vmem:[#allocation54_spill] sm:$0xff] }
 0x31d   :  { %1527 = vmatpush.bf16.msra.mxu3 %v4209_v30  ;;  %v4220_v30 = vld [vmem:[#allocation69_spill] sm:$0xff] }
 0x31e   :  { %1540 = vmatpush.bf16.msra.mxu0 %v4210_v49  ;;  %1578 = vmatpush.bf16.msra.mxu1 %v4215_v45  ;;  %v4221_v49 = vld [vmem:[#allocation75_spill] sm:$0xff] }
 0x31f   :  { %v4226_v45 = vld [vmem:[#allocation15_spill] sm:$0xff] }
 0x320   :  { %1515 = vmatpush.bf16.msrb.mxu2 %v4212_v42  ;;  %v4223_v42 = vld [vmem:[#allocation13_spill] sm:$0xff] }
 0x321   :  { %1528 = vmatpush.bf16.msra.mxu3 %v4213_v14  ;;  %v4224_v14 = vld [vmem:[#allocation72_spill] sm:$0xff] }
 0x322   :  { %1541 = vmatpush.bf16.msra.mxu0 %v4214_v58  ;;  %v4225_v58 = vld [vmem:[#allocation76_spill] sm:$0xff] }
 0x324   :  { %1516 = vmatpush.bf16.msrb.mxu2 %v4216_v54  ;;  %v4227_v54 = vld [vmem:[#allocation16_spill] sm:$0xff] }
 0x325   :  { %1529 = vmatpush.bf16.msra.mxu3 %v4217_v39  ;;  %v4228_v39 = vld [vmem:[#allocation18_spill] sm:$0xff] }
 0x326   :  { %1542 = vmatpush.bf16.msra.mxu0 %v4218_v5  ;;  %v4229_v5 = vld [vmem:[#allocation20_spill] sm:$0xff] }
 0x328   :  { %1517 = vmatpush.bf16.msrb.mxu2 %v4219_v3  ;;  %v4230_v3 = vld [vmem:[#allocation22_spill] sm:$0xff] }
 0x329   :  { %1530 = vmatpush.bf16.msra.mxu3 %v4220_v30  ;;  %v4231_v30 = vld [vmem:[#allocation24_spill] sm:$0xff] }
 0x32a   :  { %1543 = vmatpush.bf16.msra.mxu0 %v4221_v49  ;;  %v4232_v49 = vld [vmem:[#allocation26_spill] sm:$0xff] }
 0x32c   :  { %1518 = vmatpush.bf16.msrb.mxu2 %v4222_v15 }
 0x32d   :  { %1531 = vmatpush.bf16.msra.mxu3 %v4224_v14 }
 0x32e   :  { %1544 = vmatpush.bf16.msra.mxu0 %v4225_v58 }
 0x330   :  { %1584 = vmatpush.bf16.msra.mxu2 %v4223_v42 }
 0x334   :  { %1585 = vmatpush.bf16.msra.mxu2 %v4226_v45 }
 0x338   :  { %1586 = vmatpush.bf16.msra.mxu2 %v4227_v54 }
 0x33c   :  { %1587 = vmatpush.bf16.msra.mxu2 %v4228_v39 }
 0x340   :  { %1588 = vmatpush.bf16.msra.mxu2 %v4229_v5 }
 0x344   :  { %1589 = vmatpush.bf16.msra.mxu2 %v4230_v3  ;;  %v4234_v3 = vld [vmem:[#allocation37_spill] sm:$0xff] }
 0x348   :  { %1590 = vmatpush.bf16.msra.mxu2 %v4231_v30  ;;  %v280_v30 = vadd.f32 %v4234_v3, %v4151_v20 }
 0x34c   :  { %1591 = vmatpush.bf16.msra.mxu2 %v4232_v49 }
 0x35e   :  { %v1362_v15 = vpop.f32.mrf.mxu1 }
 0x366   :  { %v1364_v42 = vpop.f32.mrf.mxu1 }
 0x36d   :  { %v1348_v55 = vpop.f32.mrf.mxu0 }
 0x36e   :  { %v1435_v14 = vpop.f32.mrf.mxu1 }
 0x372   :  { %v1322_v10 = vpop.f32.mrf.mxu2  ;;  %v1335_v58 = vpop.f32.mrf.mxu3 }
 0x373   :  { %v1323_v45 = vadd.f32 %v1322_v10, %v4233_v52  ;;  %v1336_v43 = vadd.f32 %v1335_v58, %v4235_v33 }
 0x375   :  { %v1392_v25 = vadd.f32 %v1362_v15, %v1323_v45  ;;  %v1350_v54 = vpop.f32.mrf.mxu0 }
 0x376   :  { %v1437_v17 = vpop.f32.mrf.mxu1  ;;  %v4237_v54 = vld [vmem:[#allocation68_spill] sm:$0xff] }
 0x377   :  { %v1393_v39 = vmul.f32 0.5, %v1392_v25 }
 0x379   :  { %2860 = vtanh.f32 %v1393_v39 }
 0x37a   :  { %v1324_v5 = vpop.f32.mrf.mxu2  ;;  %v1337_v7 = vpop.f32.mrf.mxu3 }
 0x37b   :  { %v1457_v7 = vadd.f32 %v1435_v14, %v309_v27 }
 0x37d   :  { %v1422_v18 = vpop.f32.mrf.mxu0 }
 0x37e   :  { %v1452_v49 = vadd.f32 %v1422_v18, %v280_v30  ;;  %v1349_v18 = vadd.f32 %v1348_v55, %v4195_v44 }
 0x37f   :  { %v2861_v37 = vpop.eup %2860 }
 0x380   :  { %v1395_v42 = vmul.f32 0.5, %v2861_v37  ;;  %v1453_v10 = vmul.f32 0.5, %v1452_v49  ;;  %v1458_v37 = vmul.f32 0.5, %v1457_v7 }
 0x382   :  { %v1375_v15 = vpop.f32.mrf.mxu2  ;;  %v1388_v45 = vpop.f32.mrf.mxu3  ;;  %v1396_v17 = vadd.f32 0.5, %v1395_v42  ;;  %2862 = vtanh.f32 %v1453_v10 }
 0x383   :  { %v1397_v25 = vadd.f32 %v1375_v15, %v1336_v43  ;;  %v1402_v5 = vadd.f32 %v4237_v54, %v1388_v45 }
 0x385   :  { %v1398_v39 = vmul.f32 0.5, %v1397_v25  ;;  %v1403_v52 = vmul.f32 %v1402_v5, %v1396_v17  ;;  %v1424_v3 = vpop.f32.mrf.mxu0 }
 0x387   :  { %2864 = vtanh.f32 %v1398_v39  ;;  %v1404_v30 = vadd.f32 %v1403_v52, %v1349_v18  ;;  %v4238_v52 = vld [vmem:[#allocation39_spill] sm:$0xff] }
 0x388   :  { %v2863_v1 = vpop.eup %2862  ;;  %2866 = vtanh.f32 %v1458_v37 }
 0x389   :  { %2868 = vtanh.f32 %v1404_v30  ;;  %v1455_v43 = vmul.f32 0.5, %v2863_v1 }
 0x38a   :  { %v1377_v58 = vpop.f32.mrf.mxu2  ;;  %v1390_v33 = vpop.f32.mrf.mxu3 }
 0x38b   :  { %v1456_v25 = vadd.f32 0.5, %v1455_v43  ;;  %v338_v33 = vadd.f32 %v4238_v52, %v3191_v63  ;;  %v4249_v52 = vld [vmem:[#allocation60_spill] sm:$0xff] }
 0x38d   :  { %v2865_v49 = vpop.eup %2864 }
 0x38e   :  { %v1400_v42 = vmul.f32 0.5, %v2865_v49  ;;  %v2867_v45 = vpop.eup %2866 }
 0x38f   :  { %v2869_v17 = vpop.eup %2868  ;;  %v1460_v7 = vmul.f32 0.5, %v2867_v45  ;;  %v4241_v45 = vld [vmem:[#allocation28_spill] sm:$0xff] }
 0x390   :  { %v1401_v15 = vadd.f32 0.5, %v1400_v42 }
 0x391   :  { %v1461_v37 = vadd.f32 0.5, %v1460_v7  ;;  %v4252_v7 = vld [vmem:[#allocation46_spill] sm:$0xff] }
 0x392   :  { %v1406_v27 = vsub.f32 1.0, %v1401_v15  ;;  %v1448_v14 = vpop.f32.mrf.mxu2  ;;  %v1408_v55 = vmul.f32 %v1401_v15, %v3578_v36  ;;  %v4240_v15 = vld [vmem:[#allocation57_spill] sm:$0xff] }
 0x393   :  { %v1462_v10 = vadd.f32 %v3575_v38, %v1448_v14  ;;  %v1466_v58 = vsub.f32 1.0, %v1461_v37  ;;  %v1468_v1 = vmul.f32 %v1461_v37, %v3588_v12  ;;  %v4239_v12 = vld [vmem:[#allocation14_spill] sm:$0xff]  ;;  %v4243_v14 = vld [vmem:[#allocation17_spill] sm:$0xff]  ;;  %v4255_v37 = vld [vmem:[#allocation23_spill] sm:$0xff] }
 0x394   :  { %v1407_v54 = vmul.f32 %v2869_v17, %v1406_v27  ;;  %v4242_v27 = vld [vmem:[#allocation62_spill] sm:$0xff]  ;;  %v4244_v17 = vld [vmem:[#allocation43_spill] sm:$0xff] }
 0x395   :  { %v1463_v5 = vmul.f32 %v1462_v10, %v1456_v25  ;;  %v4245_v25 = vld [vmem:[#allocation58_spill] sm:$0xff]  ;;  %v4246_v10 = vld [vmem:[#allocation64_spill] sm:$0xff] }
 0x396   :  { %v3673_v39 = vadd.f32 %v1408_v55, %v1407_v54  ;;  %v4247_v55 = vld [vmem:[#allocation19_spill] sm:$0xff]  ;;  %v4248_v54 = vld [vmem:[#allocation44_spill] sm:$0xff] }
 0x397   :  { %v1464_v3 = vadd.f32 %v1463_v5, %v338_v33  ;;  %v4250_v33 = vld [vmem:[#allocation66_spill] sm:$0xff]  ;;  %v4251_v5 = vld [vmem:[#allocation21_spill] sm:$0xff] }
 0x398   :  { %v1510_v18 = vpack.c.bf16 %v3673_v39, %v3673_v39 }
 0x399   :  { %2870 = vtanh.f32 %v1464_v3  ;;  %v4253_v3 = vld [vmem:[#allocation61_spill] sm:$0xff] }
 0x39a   :  { %v1450_v30 = vpop.f32.mrf.mxu2  ;;  %1519 = vmatmul.bf16.vlgmr.msrb.gmra.mxu2 %v1510_v18 }
 0x39b   :  { %1655 = vmatpush.bf16.msrb.mxu2 %v3083_v40  ;;  %v4256_v30 = vld [vmem:[#allocation49_spill] sm:$0xff] }
 0x39f   :  { %v2871_v36 = vpop.eup %2870  ;;  %1656 = vmatpush.bf16.msrb.mxu2 %v3096_v56 }
 0x3a0   :  { %v1467_v49 = vmul.f32 %v2871_v36, %v1466_v58  ;;  %v4257_v58 = vld [vmem:[#allocation63_spill] sm:$0xff]  ;;  %v4258_v36 = vld [vmem:[#allocation73_spill] sm:$0xff] }
 0x3a2   :  { %v3680_v42 = vadd.f32 %v1468_v1, %v1467_v49  ;;  %v4259_v1 = vld [vmem:[#allocation25_spill] sm:$0xff]  ;;  %v4260_v49 = vld [vmem:[#allocation51_spill] sm:$0xff] }
 0x3a3   :  { %1657 = vmatpush.bf16.msrb.mxu2 %v3103_v0 }
 0x3a4   :  { %v1470_v43 = vpack.c.bf16 %v3680_v42, %v3680_v42 }
 0x3a6   :  { %1479 = vmatmul.bf16.vlgmr.msrb.gmra.mxu3 %v1470_v43  ;;  %1492 = vmatmul.bf16.vlgmr.msrb.gmra.mxu0 %v1470_v43 }
 0x3a7   :  { %1505 = vmatmul.bf16.vlgmr.msrb.gmra.mxu1 %v1470_v43  ;;  %1597 = vmatpush.bf16.msrb.mxu3 %v3216_v51 }
 0x3a8   :  { %1629 = vmatpush.bf16.msrb.mxu0 %v3056_v53  ;;  %1642 = vmatpush.bf16.msrb.mxu1 %v3088_v48 }
 0x3a9   :  { %1658 = vmatpush.bf16.msrb.mxu2 %v3115_v13 }
 0x3aa   :  { %1592 = vmatmul.bf16.vlgmr.msra.gmra.mxu2 %v1470_v43 }
 0x3ab   :  { %1598 = vmatpush.bf16.msrb.mxu3 %v3219_v62 }
 0x3ac   :  { %1630 = vmatpush.bf16.msrb.mxu0 %v3059_v59  ;;  %1643 = vmatpush.bf16.msrb.mxu1 %v3101_v60 }
 0x3ad   :  { %1659 = vmatpush.bf16.msrb.mxu2 %v3127_v28 }
 0x3af   :  { %1599 = vmatpush.bf16.msrb.mxu3 %v3223_v6 }
 0x3b0   :  { %1631 = vmatpush.bf16.msrb.mxu0 %v3062_v9  ;;  %1644 = vmatpush.bf16.msrb.mxu1 %v3112_v8 }
 0x3b1   :  { %1660 = vmatpush.bf16.msrb.mxu2 %v3139_v46 }
 0x3b3   :  { %1600 = vmatpush.bf16.msrb.mxu3 %v3227_v19 }
 0x3b4   :  { %1632 = vmatpush.bf16.msrb.mxu0 %v3065_v21  ;;  %1645 = vmatpush.bf16.msrb.mxu1 %v3124_v23 }
 0x3b5   :  { %1661 = vmatpush.bf16.msrb.mxu2 %v3151_v2 }
 0x3b6   :  { %1532 = vmatmul.bf16.vlgmr.msra.gmra.mxu3 %v1510_v18  ;;  %1545 = vmatmul.bf16.vlgmr.msra.gmra.mxu0 %v1510_v18  ;;  %v4254_v18 = vld [vmem:[#allocation70_spill] sm:$0xff] }
 0x3b7   :  { %1579 = vmatmul.bf16.vlgmr.msra.gmra.mxu1 %v1470_v43  ;;  %1601 = vmatpush.bf16.msrb.mxu3 %v3231_v22 }
 0x3b8   :  { %1633 = vmatpush.bf16.msrb.mxu0 %v3072_v29  ;;  %1646 = vmatpush.bf16.msrb.mxu1 %v3135_v41 }
 0x3b9   :  { %1662 = vmatpush.bf16.msrb.mxu2 %v3163_v24 }
 0x3bb   :  { %1602 = vmatpush.bf16.msrb.mxu3 %v3235_v31 }
 0x3bc   :  { %1634 = vmatpush.bf16.msrb.mxu0 %v3077_v32  ;;  %1647 = vmatpush.bf16.msrb.mxu1 %v3147_v61 }
 0x3bd   :  { %1729 = vmatpush.bf16.msra.mxu2 %v3067_v26 }
 0x3bf   :  { %1603 = vmatpush.bf16.msrb.mxu3 %v3239_v57 }
 0x3c0   :  { %1635 = vmatpush.bf16.msrb.mxu0 %v3080_v35  ;;  %1648 = vmatpush.bf16.msrb.mxu1 %v3159_v16 }
 0x3c1   :  { %1730 = vmatpush.bf16.msra.mxu2 %v3090_v50 }
 0x3c3   :  { %1604 = vmatpush.bf16.msrb.mxu3 %v4117_v47 }
 0x3c4   :  { %1636 = vmatpush.bf16.msrb.mxu0 %v4239_v12  ;;  %1649 = vmatpush.bf16.msrb.mxu1 %v4241_v45 }
 0x3c5   :  { %1731 = vmatpush.bf16.msra.mxu2 %v3106_v4 }
 0x3c6   :  { %1605 = vmatmul.bf16.vlgmr.msrb.gmra.mxu3 %v1470_v43  ;;  %v4261_v43 = vld [vmem:[#allocation65_spill] sm:$0xff] }
 0x3c7   :  { %1669 = vmatpush.bf16.msra.mxu3 %v4154_v34 }
 0x3c8   :  { %1682 = vmatpush.bf16.msra.mxu0 %v4240_v15  ;;  %1695 = vmatpush.bf16.msra.mxu1 %v4242_v27 }
 0x3c9   :  { %1732 = vmatpush.bf16.msra.mxu2 %v4243_v14 }
 0x3cb   :  { %1670 = vmatpush.bf16.msra.mxu3 %v4244_v17 }
 0x3cc   :  { %1683 = vmatpush.bf16.msra.mxu0 %v4245_v25  ;;  %1696 = vmatpush.bf16.msra.mxu1 %v4246_v10 }
 0x3cd   :  { %1733 = vmatpush.bf16.msra.mxu2 %v4247_v55 }
 0x3cf   :  { %1671 = vmatpush.bf16.msra.mxu3 %v4248_v54 }
 0x3d0   :  { %1684 = vmatpush.bf16.msra.mxu0 %v4249_v52  ;;  %1697 = vmatpush.bf16.msra.mxu1 %v4250_v33 }
 0x3d1   :  { %1734 = vmatpush.bf16.msra.mxu2 %v4251_v5  ;;  %v4262_v5 = vld [vmem:[#allocation74_spill] sm:$0xff] }
 0x3d3   :  { %1672 = vmatpush.bf16.msra.mxu3 %v4252_v7  ;;  %v4263_v7 = vld [vmem:[#allocation54_spill] sm:$0xff] }
 0x3d4   :  { %1685 = vmatpush.bf16.msra.mxu0 %v4253_v3  ;;  %1698 = vmatpush.bf16.msra.mxu1 %v4254_v18  ;;  %v4264_v3 = vld [vmem:[#allocation69_spill] sm:$0xff]  ;;  %v4265_v18 = vld [vmem:[#allocation75_spill] sm:$0xff] }
 0x3d5   :  { %1735 = vmatpush.bf16.msra.mxu2 %v4255_v37  ;;  %v4266_v37 = vld [vmem:[#allocation55_spill] sm:$0xff] }
 0x3d7   :  { %1673 = vmatpush.bf16.msra.mxu3 %v4256_v30  ;;  %v4267_v30 = vld [vmem:[#allocation13_spill] sm:$0xff] }
 0x3d8   :  { %1686 = vmatpush.bf16.msra.mxu0 %v4257_v58  ;;  %1699 = vmatpush.bf16.msra.mxu1 %v4258_v36  ;;  %v4268_v58 = vld [vmem:[#allocation72_spill] sm:$0xff] }
 0x3d9   :  { %1736 = vmatpush.bf16.msra.mxu2 %v4259_v1  ;;  %v4269_v36 = vld [vmem:[#allocation76_spill] sm:$0xff]  ;;  %v4270_v1 = vld [vmem:[#allocation15_spill] sm:$0xff] }
 0x3db   :  { %1674 = vmatpush.bf16.msra.mxu3 %v4260_v49  ;;  %v4271_v49 = vld [vmem:[#allocation16_spill] sm:$0xff] }
 0x3dc   :  { %1687 = vmatpush.bf16.msra.mxu0 %v4261_v43  ;;  %1700 = vmatpush.bf16.msra.mxu1 %v4262_v5  ;;  %v4272_v43 = vld [vmem:[#allocation18_spill] sm:$0xff]  ;;  %v4273_v5 = vld [vmem:[#allocation20_spill] sm:$0xff] }
 0x3df   :  { %1675 = vmatpush.bf16.msra.mxu3 %v4263_v7  ;;  %v4274_v7 = vld [vmem:[#allocation22_spill] sm:$0xff] }
 0x3e0   :  { %1688 = vmatpush.bf16.msra.mxu0 %v4264_v3  ;;  %1701 = vmatpush.bf16.msra.mxu1 %v4265_v18  ;;  %v4275_v3 = vld [vmem:[#allocation24_spill] sm:$0xff]  ;;  %v4276_v18 = vld [vmem:[#allocation26_spill] sm:$0xff] }
 0x3e3   :  { %1676 = vmatpush.bf16.msra.mxu3 %v4266_v37 }
 0x3e4   :  { %1689 = vmatpush.bf16.msra.mxu0 %v4268_v58  ;;  %1702 = vmatpush.bf16.msra.mxu1 %v4269_v36  ;;  %v4277_v36 = vld [vmem:[#allocation59_spill] sm:$0xff] }
 0x3e7   :  { %1742 = vmatpush.bf16.msrb.mxu3 %v4267_v30 }
 0x3eb   :  { %1743 = vmatpush.bf16.msrb.mxu3 %v4270_v1 }
 0x3ef   :  { %1744 = vmatpush.bf16.msrb.mxu3 %v4271_v49 }
 0x3f3   :  { %1745 = vmatpush.bf16.msrb.mxu3 %v4272_v43 }
 0x3f7   :  { %1746 = vmatpush.bf16.msrb.mxu3 %v4273_v5 }
 0x3fb   :  { %1747 = vmatpush.bf16.msrb.mxu3 %v4274_v7  ;;  %v4278_v7 = vld [vmem:[#allocation41_spill] sm:$0xff] }
 0x3fc   :  { %v282_v25 = vadd.f32 %v4278_v7, %v4151_v20 }
 0x3ff   :  { %1748 = vmatpush.bf16.msrb.mxu3 %v4275_v3 }
 0x403   :  { %1749 = vmatpush.bf16.msrb.mxu3 %v4276_v18 }
 0x41d   :  { %v1520_v37 = vpop.f32.mrf.mxu2 }
 0x423   :  { %v1493_v30 = vpop.f32.mrf.mxu0 }
 0x424   :  { %v1506_v33 = vpop.f32.mrf.mxu1 }
 0x425   :  { %v1522_v58 = vpop.f32.mrf.mxu2 }
 0x426   :  { %v4279_v58 = vld [vmem:[#allocation67_spill] sm:$0xff] }
 0x427   :  { %v1494_v15 = vadd.f32 %v1493_v30, %v4279_v58 }
 0x429   :  { %v1480_v52 = vpop.f32.mrf.mxu3 }
 0x42a   :  { %v1481_v54 = vadd.f32 %v1480_v52, %v4277_v36  ;;  %v4280_v52 = vld [vmem:[#allocation42_spill] sm:$0xff] }
 0x42b   :  { %v1495_v1 = vpop.f32.mrf.mxu0 }
 0x42c   :  { %v1550_v55 = vadd.f32 %v1520_v37, %v1481_v54  ;;  %v1508_v49 = vpop.f32.mrf.mxu1  ;;  %v311_v1 = vadd.f32 %v4280_v52, %v4148_v11 }
 0x42d   :  { %v1593_v10 = vpop.f32.mrf.mxu2 }
 0x42e   :  { %v1551_v43 = vmul.f32 0.5, %v1550_v55  ;;  %v3760_v55 = vld [vmem:[#allocation8 + $0x7] ss:$0 sm:$0xff]  ;;  %v1615_v7 = vadd.f32 %v1593_v10, %v311_v1 }
 0x430   :  { %2872 = vtanh.f32 %v1551_v43 }
 0x431   :  { %v1482_v5 = vpop.f32.mrf.mxu3 }
 0x433   :  { %v1546_v3 = vpop.f32.mrf.mxu0 }
 0x434   :  { %v1580_v17 = vpop.f32.mrf.mxu1  ;;  %v1560_v5 = vadd.f32 %v3760_v55, %v1546_v3 }
 0x435   :  { %v1610_v18 = vadd.f32 %v1580_v17, %v282_v25  ;;  %v1595_v14 = vpop.f32.mrf.mxu2  ;;  %v1616_v25 = vmul.f32 0.5, %v1615_v7 }
 0x436   :  { %v2873_v27 = vpop.eup %2872 }
 0x437   :  { %v1553_v45 = vmul.f32 0.5, %v2873_v27  ;;  %v1611_v37 = vmul.f32 0.5, %v1610_v18  ;;  %v1507_v27 = vadd.f32 %v1506_v33, %v4195_v44 }
 0x439   :  { %v1554_v54 = vadd.f32 0.5, %v1553_v45  ;;  %v1533_v49 = vpop.f32.mrf.mxu3  ;;  %2874 = vtanh.f32 %v1611_v37 }
 0x43a   :  { %v1555_v43 = vadd.f32 %v1533_v49, %v1494_v15 }
 0x43b   :  { %v1548_v20 = vpop.f32.mrf.mxu0  ;;  %v1561_v36 = vmul.f32 %v1560_v5, %v1554_v54 }
 0x43c   :  { %v1556_v17 = vmul.f32 0.5, %v1555_v43  ;;  %v1582_v14 = vpop.f32.mrf.mxu1 }
 0x43d   :  { %v1562_v30 = vadd.f32 %v1561_v36, %v1507_v27  ;;  %v4281_v36 = vld [vmem:[#allocation45_spill] sm:$0xff] }
 0x43e   :  { %2876 = vtanh.f32 %v1556_v17  ;;  %v340_v5 = vadd.f32 %v4281_v36, %v3191_v63  ;;  %v4295_v36 = vld [vmem:[#allocation61_spill] sm:$0xff] }
 0x43f   :  { %v2875_v45 = vpop.eup %2874  ;;  %2878 = vtanh.f32 %v1616_v25 }
 0x440   :  { %2880 = vtanh.f32 %v1562_v30  ;;  %v1613_v58 = vmul.f32 0.5, %v2875_v45 }
 0x441   :  { %v1535_v52 = vpop.f32.mrf.mxu3 }
 0x442   :  { %v1614_v54 = vadd.f32 0.5, %v1613_v58 }
 0x444   :  { %v2877_v18 = vpop.eup %2876 }
 0x445   :  { %v1558_v11 = vmul.f32 0.5, %v2877_v18  ;;  %v2879_v15 = vpop.eup %2878 }
 0x446   :  { %v2881_v1 = vpop.eup %2880  ;;  %v1618_v7 = vmul.f32 0.5, %v2879_v15  ;;  %v4286_v15 = vld [vmem:[#allocation43_spill] sm:$0xff] }
 0x447   :  { %v1559_v3 = vadd.f32 0.5, %v1558_v11 }
 0x448   :  { %v1619_v27 = vadd.f32 0.5, %v1618_v7  ;;  %v4298_v7 = vld [vmem:[#allocation49_spill] sm:$0xff] }
 0x449   :  { %v1564_v10 = vsub.f32 1.0, %v1559_v3  ;;  %v1606_v20 = vpop.f32.mrf.mxu3  ;;  %v1566_v33 = vmul.f32 %v1559_v3, %v3673_v39  ;;  %v4285_v3 = vld [vmem:[#allocation17_spill] sm:$0xff] }
 0x44a   :  { %v1620_v37 = vadd.f32 %v3575_v38, %v1606_v20  ;;  %v1624_v58 = vsub.f32 1.0, %v1619_v27  ;;  %v1626_v39 = vmul.f32 %v1619_v27, %v3680_v42  ;;  %v4283_v42 = vld [vmem:[#allocation28_spill] sm:$0xff]  ;;  %v4289_v20 = vld [vmem:[#allocation19_spill] sm:$0xff]  ;;  %v4301_v27 = vld [vmem:[#allocation25_spill] sm:$0xff] }
 0x44b   :  { %v1565_v49 = vmul.f32 %v2881_v1, %v1564_v10  ;;  %v4287_v10 = vld [vmem:[#allocation58_spill] sm:$0xff]  ;;  %v4290_v1 = vld [vmem:[#allocation44_spill] sm:$0xff] }
 0x44c   :  { %v1621_v43 = vmul.f32 %v1620_v37, %v1614_v54  ;;  %v4291_v54 = vld [vmem:[#allocation60_spill] sm:$0xff]  ;;  %v4292_v37 = vld [vmem:[#allocation66_spill] sm:$0xff] }
 0x44d   :  { %v3768_v17 = vadd.f32 %v1566_v33, %v1565_v49  ;;  %v4293_v49 = vld [vmem:[#allocation21_spill] sm:$0xff]  ;;  %v4294_v33 = vld [vmem:[#allocation46_spill] sm:$0xff] }
 0x44e   :  { %v1622_v14 = vadd.f32 %v1621_v43, %v340_v5  ;;  %v4296_v5 = vld [vmem:[#allocation70_spill] sm:$0xff]  ;;  %v4297_v43 = vld [vmem:[#allocation23_spill] sm:$0xff] }
 0x44f   :  { %v1668_v11 = vpack.c.bf16 %v3768_v17, %v3768_v17 }
 0x450   :  { %2882 = vtanh.f32 %v1622_v14  ;;  %v4299_v14 = vld [vmem:[#allocation63_spill] sm:$0xff] }
 0x451   :  { %v1608_v25 = vpop.f32.mrf.mxu3  ;;  %1677 = vmatmul.bf16.vlgmr.msra.gmra.mxu3 %v1668_v11 }
 0x452   :  { %1813 = vmatpush.bf16.msra.mxu3 %v3083_v40  ;;  %v4302_v25 = vld [vmem:[#allocation51_spill] sm:$0xff] }
 0x456   :  { %v2883_v30 = vpop.eup %2882  ;;  %1814 = vmatpush.bf16.msra.mxu3 %v3096_v56 }
 0x457   :  { %v1625_v52 = vmul.f32 %v2883_v30, %v1624_v58  ;;  %v4303_v58 = vld [vmem:[#allocation65_spill] sm:$0xff]  ;;  %v4304_v30 = vld [vmem:[#allocation74_spill] sm:$0xff] }
 0x459   :  { %v3775_v45 = vadd.f32 %v1626_v39, %v1625_v52  ;;  %v4305_v39 = vld [vmem:[#allocation54_spill] sm:$0xff]  ;;  %v4306_v52 = vld [vmem:[#allocation69_spill] sm:$0xff] }
 0x45a   :  { %1815 = vmatpush.bf16.msra.mxu3 %v3103_v0 }
 0x45b   :  { %v1628_v18 = vpack.c.bf16 %v3775_v45, %v3775_v45 }
 0x45d   :  { %1637 = vmatmul.bf16.vlgmr.msrb.gmra.mxu0 %v1628_v18  ;;  %1650 = vmatmul.bf16.vlgmr.msrb.gmra.mxu1 %v1628_v18 }
 0x45e   :  { %1663 = vmatmul.bf16.vlgmr.msrb.gmra.mxu2 %v1628_v18  ;;  %1755 = vmatpush.bf16.msrb.mxu0 %v3216_v51 }
 0x45f   :  { %1787 = vmatpush.bf16.msrb.mxu1 %v3056_v53  ;;  %1800 = vmatpush.bf16.msrb.mxu2 %v3088_v48 }
 0x460   :  { %1816 = vmatpush.bf16.msra.mxu3 %v3115_v13 }
 0x461   :  { %1750 = vmatmul.bf16.vlgmr.msrb.gmra.mxu3 %v1628_v18 }
 0x462   :  { %1756 = vmatpush.bf16.msrb.mxu0 %v3219_v62 }
 0x463   :  { %1788 = vmatpush.bf16.msrb.mxu1 %v3059_v59  ;;  %1801 = vmatpush.bf16.msrb.mxu2 %v3101_v60 }
 0x464   :  { %1817 = vmatpush.bf16.msra.mxu3 %v3127_v28 }
 0x466   :  { %1757 = vmatpush.bf16.msrb.mxu0 %v3223_v6 }
 0x467   :  { %1789 = vmatpush.bf16.msrb.mxu1 %v3062_v9  ;;  %1802 = vmatpush.bf16.msrb.mxu2 %v3112_v8 }
 0x468   :  { %1818 = vmatpush.bf16.msra.mxu3 %v3139_v46 }
 0x46a   :  { %1758 = vmatpush.bf16.msrb.mxu0 %v3227_v19 }
 0x46b   :  { %1790 = vmatpush.bf16.msrb.mxu1 %v3065_v21  ;;  %1803 = vmatpush.bf16.msrb.mxu2 %v3124_v23 }
 0x46c   :  { %1819 = vmatpush.bf16.msra.mxu3 %v3151_v2 }
 0x46d   :  { %1690 = vmatmul.bf16.vlgmr.msra.gmra.mxu0 %v1668_v11  ;;  %1703 = vmatmul.bf16.vlgmr.msra.gmra.mxu1 %v1668_v11  ;;  %v4300_v11 = vld [vmem:[#allocation73_spill] sm:$0xff] }
 0x46e   :  { %1737 = vmatmul.bf16.vlgmr.msra.gmra.mxu2 %v1628_v18  ;;  %1759 = vmatpush.bf16.msrb.mxu0 %v3231_v22 }
 0x46f   :  { %1791 = vmatpush.bf16.msrb.mxu1 %v3072_v29  ;;  %1804 = vmatpush.bf16.msrb.mxu2 %v3135_v41 }
 0x470   :  { %1820 = vmatpush.bf16.msra.mxu3 %v3163_v24 }
 0x472   :  { %1760 = vmatpush.bf16.msrb.mxu0 %v3235_v31 }
 0x473   :  { %1792 = vmatpush.bf16.msrb.mxu1 %v3077_v32  ;;  %1805 = vmatpush.bf16.msrb.mxu2 %v3147_v61 }
 0x474   :  { %1887 = vmatpush.bf16.msrb.mxu3 %v3067_v26  ;;  %v4282_v26 = vld [vmem:[#allocation57_spill] sm:$0xff] }
 0x476   :  { %1761 = vmatpush.bf16.msrb.mxu0 %v3239_v57 }
 0x477   :  { %1793 = vmatpush.bf16.msrb.mxu1 %v3080_v35  ;;  %1806 = vmatpush.bf16.msrb.mxu2 %v3159_v16 }
 0x478   :  { %1888 = vmatpush.bf16.msrb.mxu3 %v3090_v50  ;;  %v4284_v50 = vld [vmem:[#allocation62_spill] sm:$0xff] }
 0x47a   :  { %1762 = vmatpush.bf16.msrb.mxu0 %v4117_v47 }
 0x47b   :  { %1794 = vmatpush.bf16.msrb.mxu1 %v4239_v12  ;;  %1807 = vmatpush.bf16.msrb.mxu2 %v4283_v42 }
 0x47c   :  { %1889 = vmatpush.bf16.msrb.mxu3 %v3106_v4  ;;  %v4288_v4 = vld [vmem:[#allocation64_spill] sm:$0xff] }
 0x47d   :  { %1763 = vmatmul.bf16.vlgmr.msrb.gmra.mxu0 %v1628_v18  ;;  %v4307_v18 = vld [vmem:[#allocation75_spill] sm:$0xff] }
 0x47e   :  { %1827 = vmatpush.bf16.msra.mxu0 %v4154_v34 }
 0x47f   :  { %1840 = vmatpush.bf16.msra.mxu1 %v4282_v26  ;;  %1853 = vmatpush.bf16.msra.mxu2 %v4284_v50 }
 0x480   :  { %1890 = vmatpush.bf16.msrb.mxu3 %v4285_v3  ;;  %v4308_v3 = vld [vmem:[#allocation55_spill] sm:$0xff] }
 0x482   :  { %1828 = vmatpush.bf16.msra.mxu0 %v4286_v15 }
 0x483   :  { %1841 = vmatpush.bf16.msra.mxu1 %v4287_v10  ;;  %1854 = vmatpush.bf16.msra.mxu2 %v4288_v4 }
 0x484   :  { %1891 = vmatpush.bf16.msrb.mxu3 %v4289_v20  ;;  %v4309_v20 = vld [vmem:[#allocation13_spill] sm:$0xff] }
 0x486   :  { %1829 = vmatpush.bf16.msra.mxu0 %v4290_v1 }
 0x487   :  { %1842 = vmatpush.bf16.msra.mxu1 %v4291_v54  ;;  %1855 = vmatpush.bf16.msra.mxu2 %v4292_v37 }
 0x488   :  { %1892 = vmatpush.bf16.msrb.mxu3 %v4293_v49  ;;  %v4310_v49 = vld [vmem:[#allocation72_spill] sm:$0xff] }
 0x48a   :  { %1830 = vmatpush.bf16.msra.mxu0 %v4294_v33 }
 0x48b   :  { %1843 = vmatpush.bf16.msra.mxu1 %v4295_v36  ;;  %1856 = vmatpush.bf16.msra.mxu2 %v4296_v5 }
 0x48c   :  { %1893 = vmatpush.bf16.msrb.mxu3 %v4297_v43  ;;  %v4311_v43 = vld [vmem:[#allocation76_spill] sm:$0xff] }
 0x48e   :  { %1831 = vmatpush.bf16.msra.mxu0 %v4298_v7 }
 0x48f   :  { %1844 = vmatpush.bf16.msra.mxu1 %v4299_v14  ;;  %1857 = vmatpush.bf16.msra.mxu2 %v4300_v11 }
 0x490   :  { %1894 = vmatpush.bf16.msrb.mxu3 %v4301_v27  ;;  %v4312_v27 = vld [vmem:[#allocation15_spill] sm:$0xff] }
 0x492   :  { %1832 = vmatpush.bf16.msra.mxu0 %v4302_v25  ;;  %v4313_v25 = vld [vmem:[#allocation16_spill] sm:$0xff] }
 0x493   :  { %1845 = vmatpush.bf16.msra.mxu1 %v4303_v58  ;;  %1858 = vmatpush.bf16.msra.mxu2 %v4304_v30  ;;  %v4314_v58 = vld [vmem:[#allocation18_spill] sm:$0xff]  ;;  %v4315_v30 = vld [vmem:[#allocation20_spill] sm:$0xff] }
 0x496   :  { %1833 = vmatpush.bf16.msra.mxu0 %v4305_v39  ;;  %v4316_v39 = vld [vmem:[#allocation22_spill] sm:$0xff] }
 0x497   :  { %1846 = vmatpush.bf16.msra.mxu1 %v4306_v52  ;;  %1859 = vmatpush.bf16.msra.mxu2 %v4307_v18  ;;  %v4317_v52 = vld [vmem:[#allocation24_spill] sm:$0xff]  ;;  %v4318_v18 = vld [vmem:[#allocation26_spill] sm:$0xff] }
 0x49a   :  { %1834 = vmatpush.bf16.msra.mxu0 %v4308_v3 }
 0x49b   :  { %1847 = vmatpush.bf16.msra.mxu1 %v4310_v49  ;;  %1860 = vmatpush.bf16.msra.mxu2 %v4311_v43  ;;  %v4319_v49 = vld [vmem:[#allocation59_spill] sm:$0xff] }
 0x49e   :  { %1900 = vmatpush.bf16.msrb.mxu0 %v4309_v20 }
 0x4a2   :  { %1901 = vmatpush.bf16.msrb.mxu0 %v4312_v27 }
 0x4a6   :  { %1902 = vmatpush.bf16.msrb.mxu0 %v4313_v25 }
 0x4aa   :  { %1903 = vmatpush.bf16.msrb.mxu0 %v4314_v58 }
 0x4ae   :  { %1904 = vmatpush.bf16.msrb.mxu0 %v4315_v30 }
 0x4b2   :  { %1905 = vmatpush.bf16.msrb.mxu0 %v4316_v39  ;;  %v4320_v39 = vld [vmem:[#allocation67_spill] sm:$0xff] }
 0x4b6   :  { %1906 = vmatpush.bf16.msrb.mxu0 %v4317_v52 }
 0x4ba   :  { %1907 = vmatpush.bf16.msrb.mxu0 %v4318_v18 }
 0x4d4   :  { %v1678_v3 = vpop.f32.mrf.mxu3 }
 0x4da   :  { %v1638_v20 = vpop.f32.mrf.mxu0  ;;  %v1651_v11 = vpop.f32.mrf.mxu1 }
 0x4db   :  { %v1639_v14 = vadd.f32 %v1638_v20, %v4319_v49  ;;  %v1652_v37 = vadd.f32 %v1651_v11, %v4320_v39 }
 0x4dc   :  { %v1680_v43 = vpop.f32.mrf.mxu3 }
 0x4dd   :  { %v1708_v7 = vadd.f32 %v1678_v3, %v1639_v14  ;;  %v4322_v3 = vld [vmem:[#allocation48_spill] sm:$0xff] }
 0x4df   :  { %v1709_v27 = vmul.f32 0.5, %v1708_v7  ;;  %v4321_v7 = vld [vmem:[#allocation29_spill] sm:$0xff] }
 0x4e1   :  { %2884 = vtanh.f32 %v1709_v27  ;;  %v1664_v25 = vpop.f32.mrf.mxu2  ;;  %v314_v27 = vadd.f32 %v4322_v3, %v4321_v7 }
 0x4e2   :  { %v1640_v5 = vpop.f32.mrf.mxu0  ;;  %v1653_v58 = vpop.f32.mrf.mxu1 }
 0x4e3   :  { %v1665_v5 = vadd.f32 %v1664_v25, %v4195_v44  ;;  %v4323_v58 = vld [vmem:[#allocation27_spill] sm:$0xff] }
 0x4e4   :  { %v1751_v36 = vpop.f32.mrf.mxu3 }
 0x4e5   :  { %v1773_v11 = vadd.f32 %v1751_v36, %v314_v27 }
 0x4e7   :  { %v2885_v30 = vpop.eup %2884 }
 0x4e8   :  { %v1711_v33 = vmul.f32 0.5, %v2885_v30  ;;  %v4324_v30 = vld [vmem:[#allocation47_spill] sm:$0xff] }
 0x4e9   :  { %v1666_v52 = vpop.f32.mrf.mxu2  ;;  %v285_v49 = vadd.f32 %v4324_v30, %v4323_v58 }
 0x4ea   :  { %v1691_v54 = vpop.f32.mrf.mxu0  ;;  %v1704_v18 = vpop.f32.mrf.mxu1  ;;  %v1712_v1 = vadd.f32 0.5, %v1711_v33 }
 0x4eb   :  { %v1713_v4 = vadd.f32 %v1691_v54, %v1652_v37  ;;  %v1718_v10 = vadd.f32 %v3760_v55, %v1704_v18 }
 0x4ec   :  { %v1753_v20 = vpop.f32.mrf.mxu3 }
 0x4ed   :  { %v1714_v43 = vmul.f32 0.5, %v1713_v4  ;;  %v1719_v14 = vmul.f32 %v1718_v10, %v1712_v1  ;;  %v1774_v20 = vmul.f32 0.5, %v1773_v11  ;;  %v4325_v11 = vld [vmem:[#allocation50_spill] sm:$0xff] }
 0x4ef   :  { %2886 = vtanh.f32 %v1714_v43  ;;  %v1720_v52 = vadd.f32 %v1719_v14, %v1665_v5 }
 0x4f1   :  { %v1738_v39 = vpop.f32.mrf.mxu2  ;;  %2888 = vtanh.f32 %v1720_v52  ;;  %v343_v52 = vadd.f32 %v4325_v11, %v3191_v63 }
 0x4f2   :  { %v1768_v15 = vadd.f32 %v1738_v39, %v285_v49  ;;  %v1693_v33 = vpop.f32.mrf.mxu0  ;;  %v1706_v54 = vpop.f32.mrf.mxu1 }
 0x4f4   :  { %v1769_v37 = vmul.f32 0.5, %v1768_v15 }
 0x4f5   :  { %v2887_v18 = vpop.eup %2886 }
 0x4f6   :  { %v1716_v10 = vmul.f32 0.5, %v2887_v18  ;;  %2890 = vtanh.f32 %v1769_v37 }
 0x4f7   :  { %2892 = vtanh.f32 %v1774_v20  ;;  %v2889_v3 = vpop.eup %2888 }
 0x4f8   :  { %v1717_v4 = vadd.f32 0.5, %v1716_v10 }
 0x4f9   :  { %v1740_v1 = vpop.f32.mrf.mxu2 }
 0x4fa   :  { %v1722_v25 = vsub.f32 1.0, %v1717_v4  ;;  %v1764_v43 = vpop.f32.mrf.mxu0  ;;  %v1724_v36 = vmul.f32 %v1717_v4, %v3768_v17 }
 0x4fb   :  { %v1778_v5 = vadd.f32 %v3575_v38, %v1764_v43 }
 0x4fc   :  { %v2891_v44 = vpop.eup %2890  ;;  %v1723_v14 = vmul.f32 %v2889_v3, %v1722_v25 }
 0x4fd   :  { %v1771_v27 = vmul.f32 0.5, %v2891_v44  ;;  %v2893_v39 = vpop.eup %2892 }
 0x4fe   :  { %v3858_v49 = vadd.f32 %v1724_v36, %v1723_v14  ;;  %v1776_v54 = vmul.f32 0.5, %v2893_v39  ;;  %v4349_v39 = vld [vmem:[#allocation53_spill] sm:$0xff] }
 0x4ff   :  { %v1772_v15 = vadd.f32 0.5, %v1771_v27 }
 0x500   :  { %v1826_v30 = vpack.c.bf16 %v3858_v49, %v3858_v49  ;;  %v1777_v44 = vadd.f32 0.5, %v1776_v54 }
 0x501   :  { %v1779_v33 = vmul.f32 %v1778_v5, %v1772_v15  ;;  %v316_v15 = vadd.f32 %v4349_v39, %v4321_v7  ;;  %v4350_v5 = vld [vmem:[#allocation52_spill] sm:$0xff] }
 0x502   :  { %v1766_v37 = vpop.f32.mrf.mxu0  ;;  %1835 = vmatmul.bf16.vlgmr.msra.gmra.mxu0 %v1826_v30  ;;  %v1782_v17 = vsub.f32 1.0, %v1777_v44  ;;  %v1784_v38 = vmul.f32 %v1777_v44, %v3775_v45 }
 0x503   :  { %v1780_v18 = vadd.f32 %v1779_v33, %v343_v52  ;;  %1971 = vmatpush.bf16.msra.mxu0 %v3083_v40  ;;  %v4333_v40 = vld [vmem:[#allocation61_spill] sm:$0xff] }
 0x505   :  { %2894 = vtanh.f32 %v1780_v18 }
 0x507   :  { %1972 = vmatpush.bf16.msra.mxu0 %v3096_v56  ;;  %v4335_v56 = vld [vmem:[#allocation49_spill] sm:$0xff] }
 0x50b   :  { %v2895_v20 = vpop.eup %2894  ;;  %1973 = vmatpush.bf16.msra.mxu0 %v3103_v0  ;;  %v4337_v0 = vld [vmem:[#allocation73_spill] sm:$0xff] }
 0x50c   :  { %v1783_v10 = vmul.f32 %v2895_v20, %v1782_v17  ;;  %v4351_v17 = vld [vmem:[#allocation71_spill] sm:$0xff] }
 0x50e   :  { %v3869_v4 = vadd.f32 %v1784_v38, %v1783_v10 }
 0x50f   :  { %1974 = vmatpush.bf16.msra.mxu0 %v3115_v13  ;;  %v4339_v13 = vld [vmem:[#allocation65_spill] sm:$0xff] }
 0x510   :  { %v1786_v1 = vpack.c.bf16 %v3869_v4, %v3869_v4 }
 0x512   :  { %1795 = vmatmul.bf16.vlgmr.msrb.gmra.mxu1 %v1786_v1  ;;  %1808 = vmatmul.bf16.vlgmr.msrb.gmra.mxu2 %v1786_v1 }
 0x513   :  { %1821 = vmatmul.bf16.vlgmr.msra.gmra.mxu3 %v1786_v1  ;;  %1908 = vmatmul.bf16.vlgmr.msrb.gmra.mxu0 %v1786_v1 }
 0x514   :  { %1913 = vmatpush.bf16.msrb.mxu1 %v3216_v51  ;;  %1945 = vmatpush.bf16.msrb.mxu2 %v3056_v53  ;;  %v4326_v53 = vld [vmem:[#allocation43_spill] sm:$0xff] }
 0x515   :  { %1958 = vmatpush.bf16.msra.mxu3 %v3088_v48  ;;  %1975 = vmatpush.bf16.msra.mxu0 %v3127_v28  ;;  %v4334_v48 = vld [vmem:[#allocation70_spill] sm:$0xff] }
 0x516   :  { %v4341_v28 = vld [vmem:[#allocation54_spill] sm:$0xff] }
 0x518   :  { %1914 = vmatpush.bf16.msrb.mxu1 %v3219_v62  ;;  %1946 = vmatpush.bf16.msrb.mxu2 %v3059_v59  ;;  %v4327_v59 = vld [vmem:[#allocation58_spill] sm:$0xff] }
 0x519   :  { %1959 = vmatpush.bf16.msra.mxu3 %v3101_v60  ;;  %1976 = vmatpush.bf16.msra.mxu0 %v3139_v46  ;;  %v4336_v60 = vld [vmem:[#allocation63_spill] sm:$0xff] }
 0x51a   :  { %v4343_v46 = vld [vmem:[#allocation75_spill] sm:$0xff] }
 0x51c   :  { %1915 = vmatpush.bf16.msrb.mxu1 %v3223_v6  ;;  %1947 = vmatpush.bf16.msrb.mxu2 %v3062_v9  ;;  %v4328_v9 = vld [vmem:[#allocation64_spill] sm:$0xff]  ;;  %v4347_v6 = vld [vmem:[#allocation59_spill] sm:$0xff] }
 0x51d   :  { %1960 = vmatpush.bf16.msra.mxu3 %v3112_v8  ;;  %1977 = vmatpush.bf16.msra.mxu0 %v3151_v2  ;;  %v4338_v8 = vld [vmem:[#allocation51_spill] sm:$0xff]  ;;  %v4345_v2 = vld [vmem:[#allocation72_spill] sm:$0xff] }
 0x520   :  { %1916 = vmatpush.bf16.msrb.mxu1 %v3227_v19  ;;  %1948 = vmatpush.bf16.msrb.mxu2 %v3065_v21  ;;  %v4329_v21 = vld [vmem:[#allocation44_spill] sm:$0xff] }
 0x521   :  { %1961 = vmatpush.bf16.msra.mxu3 %v3124_v23  ;;  %1978 = vmatpush.bf16.msra.mxu0 %v3163_v24  ;;  %v4340_v23 = vld [vmem:[#allocation74_spill] sm:$0xff] }
 0x522   :  { %1848 = vmatmul.bf16.vlgmr.msra.gmra.mxu1 %v1826_v30  ;;  %1861 = vmatmul.bf16.vlgmr.msra.gmra.mxu2 %v1826_v30  ;;  %v287_v30 = vadd.f32 %v4350_v5, %v4323_v58  ;;  %v2793_v5 = vld [vmem:[#allocation6 + $0x1b4] sm:$0xf0] }
 0x523   :  { %1895 = vmatmul.bf16.vlgmr.msrb.gmra.mxu3 %v1786_v1 }
 0x524   :  { %1917 = vmatpush.bf16.msrb.mxu1 %v3231_v22  ;;  %1949 = vmatpush.bf16.msrb.mxu2 %v3072_v29  ;;  %v4330_v29 = vld [vmem:[#allocation60_spill] sm:$0xff] }
 0x525   :  { %1962 = vmatpush.bf16.msra.mxu3 %v3135_v41  ;;  %v4342_v41 = vld [vmem:[#allocation69_spill] sm:$0xff] }
 0x528   :  { %1918 = vmatpush.bf16.msrb.mxu1 %v3235_v31  ;;  %1950 = vmatpush.bf16.msrb.mxu2 %v3077_v32  ;;  %v4331_v32 = vld [vmem:[#allocation66_spill] sm:$0xff] }
 0x529   :  { %1963 = vmatpush.bf16.msra.mxu3 %v3147_v61  ;;  %v4344_v61 = vld [vmem:[#allocation55_spill] sm:$0xff] }
 0x52c   :  { %1919 = vmatpush.bf16.msrb.mxu1 %v3239_v57  ;;  %1951 = vmatpush.bf16.msrb.mxu2 %v3080_v35  ;;  %v4332_v35 = vld [vmem:[#allocation46_spill] sm:$0xff] }
 0x52d   :  { %1964 = vmatpush.bf16.msra.mxu3 %v3159_v16  ;;  %v4346_v16 = vld [vmem:[#allocation76_spill] sm:$0xff] }
 0x530   :  { %1920 = vmatpush.bf16.msrb.mxu1 %v4117_v47  ;;  %1952 = vmatpush.bf16.msrb.mxu2 %v4239_v12 }
 0x531   :  { %1965 = vmatpush.bf16.msra.mxu3 %v4283_v42  ;;  %v4348_v42 = vld [vmem:[#allocation67_spill] sm:$0xff] }
 0x533   :  { %1921 = vmatmul.bf16.vlgmr.msrb.gmra.mxu1 %v1786_v1 }
 0x534   :  { %1985 = vmatpush.bf16.msra.mxu1 %v4154_v34  ;;  %1998 = vmatpush.bf16.msra.mxu2 %v4282_v26 }
 0x535   :  { %2011 = vmatpush.bf16.msrb.mxu3 %v4284_v50 }
 0x538   :  { %1986 = vmatpush.bf16.msra.mxu1 %v4326_v53  ;;  %1999 = vmatpush.bf16.msra.mxu2 %v4327_v59 }
 0x539   :  { %2012 = vmatpush.bf16.msrb.mxu3 %v4328_v9 }
 0x53c   :  { %1987 = vmatpush.bf16.msra.mxu1 %v4329_v21  ;;  %2000 = vmatpush.bf16.msra.mxu2 %v4330_v29 }
 0x53d   :  { %2013 = vmatpush.bf16.msrb.mxu3 %v4331_v32 }
 0x540   :  { %1988 = vmatpush.bf16.msra.mxu1 %v4332_v35  ;;  %2001 = vmatpush.bf16.msra.mxu2 %v4333_v40 }
 0x541   :  { %2014 = vmatpush.bf16.msrb.mxu3 %v4334_v48 }
 0x544   :  { %1989 = vmatpush.bf16.msra.mxu1 %v4335_v56  ;;  %2002 = vmatpush.bf16.msra.mxu2 %v4336_v60 }
 0x545   :  { %2015 = vmatpush.bf16.msrb.mxu3 %v4337_v0 }
 0x548   :  { %1990 = vmatpush.bf16.msra.mxu1 %v4338_v8  ;;  %2003 = vmatpush.bf16.msra.mxu2 %v4339_v13  ;;  %v2916_v13 = vld [vmem:[#allocation8 + $0x3] ss:$0 sm:$0xff] }
 0x549   :  { %2016 = vmatpush.bf16.msrb.mxu3 %v4340_v23 }
 0x54c   :  { %1991 = vmatpush.bf16.msra.mxu1 %v4341_v28  ;;  %2004 = vmatpush.bf16.msra.mxu2 %v4342_v41  ;;  %v4352_v41 = vld [vmem:[#allocation56_spill] sm:$0xff] }
 0x54d   :  { %2017 = vmatpush.bf16.msrb.mxu3 %v4343_v46  ;;  %v345_v46 = vadd.f32 %v4352_v41, %v3191_v63  ;;  %v2656_v63 = vld [vmem:[#allocation6 + $0x340] sm:$0xf] }
 0x550   :  { %1992 = vmatpush.bf16.msra.mxu1 %v4344_v61  ;;  %2005 = vmatpush.bf16.msra.mxu2 %v4345_v2 }
 0x551   :  { %2018 = vmatpush.bf16.msrb.mxu3 %v4346_v16 }
 0x57f   :  { %v1836_v24 = vpop.f32.mrf.mxu0 }
 0x587   :  { %v1838_v51 = vpop.f32.mrf.mxu0 }
 0x58f   :  { %v1796_v62 = vpop.f32.mrf.mxu1 }
 0x590   :  { %v1797_v19 = vadd.f32 %v1796_v62, %v4347_v6  ;;  %v1909_v22 = vpop.f32.mrf.mxu0 }
 0x591   :  { %v1931_v52 = vadd.f32 %v1909_v22, %v316_v15  ;;  %v2640_v15 = vld [vmem:[#allocation6 + $0x180] sm:$0xf] }
 0x592   :  { %v1866_v31 = vadd.f32 %v1836_v24, %v1797_v19 }
 0x593   :  { %v1932_v53 = vmul.f32 0.5, %v1931_v52  ;;  %v2636_v52 = vld [vmem:[#allocation6 + $0x110] sm:$0xf] }
 0x594   :  { %v1867_v57 = vmul.f32 0.5, %v1866_v31 }
 0x595   :  { %v1809_v47 = vpop.f32.mrf.mxu2 }
 0x596   :  { %v1822_v34 = vpop.f32.mrf.mxu3  ;;  %2896 = vtanh.f32 %v1867_v57  ;;  %v1810_v50 = vadd.f32 %v1809_v47, %v4348_v42 }
 0x597   :  { %v1798_v12 = vpop.f32.mrf.mxu1  ;;  %v1823_v20 = vadd.f32 %v1822_v34, %v4351_v17  ;;  %v2797_v34 = vld [vmem:[#allocation6 + $0x374] sm:$0xf0] }
 0x598   :  { %v1911_v45 = vpop.f32.mrf.mxu0  ;;  %v2657_v12 = vor.u32 %v2797_v34, %v2656_v63 }
 0x599   :  { %v2652_v45 = vld [vmem:[#allocation6 + $0x2d0] sm:$0xf] }
 0x59a   :  { %2111 = vmatpush.bf16.msrb.mxu0 %v2657_v12 }
 0x59c   :  { %v2897_v43 = vpop.eup %2896 }
 0x59d   :  { %v1811_v26 = vpop.f32.mrf.mxu2  ;;  %v1869_v27 = vmul.f32 0.5, %v2897_v43  ;;  %v2648_v43 = vld [vmem:[#allocation6 + $0x260] sm:$0xf] }
 0x59e   :  { %v1824_v25 = vpop.f32.mrf.mxu3  ;;  %v2796_v26 = vld [vmem:[#allocation6 + $0x304] sm:$0xf0] }
 0x59f   :  { %v1849_v3 = vpop.f32.mrf.mxu1  ;;  %v1870_v33 = vadd.f32 0.5, %v1869_v27 }
 0x5a0   :  { %v1871_v36 = vadd.f32 %v1849_v3, %v1810_v50  ;;  %v2653_v50 = vor.u32 %v2796_v26, %v2652_v45  ;;  %v2795_v3 = vld [vmem:[#allocation6 + $0x294] sm:$0xf0]  ;;  %v2668_v45 = vld [vmem:[#allocation6 + $0x114] sm:$0xf]  ;;  %v2800_v26 = vld [vmem:[#allocation6 + $0x148] sm:$0xf0] }
 0x5a2   :  { %v1872_v14 = vmul.f32 0.5, %v1871_v36  ;;  %2112 = vmatpush.bf16.msrb.mxu0 %v2653_v50  ;;  %v2644_v36 = vld [vmem:[#allocation6 + $0x1f0] sm:$0xf] }
 0x5a4   :  { %2898 = vtanh.f32 %v1872_v14  ;;  %v2794_v14 = vld [vmem:[#allocation6 + $0x224] sm:$0xf0] }
 0x5a5   :  { %v1862_v11 = vpop.f32.mrf.mxu2  ;;  %v2645_v39 = vor.u32 %v2794_v14, %v2644_v36 }
 0x5a6   :  { %v1876_v54 = vadd.f32 %v3760_v55, %v1862_v11  ;;  %v1896_v37 = vpop.f32.mrf.mxu3 }
 0x5a7   :  { %v1926_v18 = vadd.f32 %v1896_v37, %v287_v30  ;;  %v1851_v44 = vpop.f32.mrf.mxu1  ;;  %v2641_v30 = vor.u32 %v2793_v5, %v2640_v15  ;;  %v2632_v37 = vld [vmem:[#allocation6 + $0xa0] sm:$0xf]  ;;  %v2799_v15 = vld [vmem:[#allocation6 + $0xd8] sm:$0xf0] }
 0x5a8   :  { %v1877_v38 = vmul.f32 %v1876_v54, %v1870_v33  ;;  %v2792_v33 = vld [vmem:[#allocation6 + $0x144] sm:$0xf0] }
 0x5a9   :  { %v1927_v10 = vmul.f32 0.5, %v1926_v18  ;;  %v2637_v54 = vor.u32 %v2792_v33, %v2636_v52  ;;  %v2791_v18 = vld [vmem:[#allocation6 + $0xd4] sm:$0xf0]  ;;  %v2816_v33 = vld [vmem:[#allocation8 + $0x8] ss:$0 sm:$0xff] }
 0x5aa   :  { %v2899_v1 = vpop.eup %2898  ;;  %v1878_v59 = vadd.f32 %v1877_v38, %v1823_v20  ;;  %v2633_v38 = vor.u32 %v2791_v18, %v2632_v37 }
 0x5ab   :  { %v1874_v7 = vmul.f32 0.5, %v2899_v1  ;;  %2900 = vtanh.f32 %v1927_v10  ;;  %v2628_v1 = vld [vmem:[#allocation6 + $0x30] sm:$0xf] }
 0x5ac   :  { %2902 = vtanh.f32 %v1878_v59 }
 0x5ad   :  { %v1875_v9 = vadd.f32 0.5, %v1874_v7  ;;  %v1864_v58 = vpop.f32.mrf.mxu2  ;;  %2904 = vtanh.f32 %v1932_v53  ;;  %v2790_v53 = vld [vmem:[#allocation6 + $0x64] sm:$0xf0] }
 0x5ae   :  { %v1898_v21 = vpop.f32.mrf.mxu3 }
 0x5af   :  { %v1880_v35 = vsub.f32 1.0, %v1875_v9  ;;  %v1882_v56 = vmul.f32 %v1875_v9, %v3858_v49  ;;  %v2629_v9 = vor.u32 %v2790_v53, %v2628_v1 }
 0x5b0   :  { %v1922_v29 = vpop.f32.mrf.mxu1 }
 0x5b1   :  { %v2901_v32 = vpop.eup %2900  ;;  %v1936_v23 = vadd.f32 %v2916_v13, %v1922_v29 }
 0x5b2   :  { %v2903_v40 = vpop.eup %2902  ;;  %v1929_v48 = vmul.f32 0.5, %v2901_v32  ;;  %v2688_v32 = vld [vmem:[#allocation6 + $0x344] sm:$0xf] }
 0x5b3   :  { %v1881_v60 = vmul.f32 %v2903_v40, %v1880_v35  ;;  %v2905_v0 = vpop.eup %2904  ;;  %v2805_v35 = vld [vmem:[#allocation6 + $0x378] sm:$0xf0]  ;;  %v2684_v40 = vld [vmem:[#allocation6 + $0x2d4] sm:$0xf] }
 0x5b4   :  { %v1930_v8 = vadd.f32 0.5, %v1929_v48  ;;  %v1934_v2 = vmul.f32 0.5, %v2905_v0  ;;  %v2689_v48 = vor.u32 %v2805_v35, %v2688_v32  ;;  %v2680_v0 = vld [vmem:[#allocation6 + $0x264] sm:$0xf] }
 0x5b5   :  { %v3935_v28 = vadd.f32 %v1882_v56, %v1881_v60  ;;  %v2804_v56 = vld [vmem:[#allocation6 + $0x308] sm:$0xf0] }
 0x5b6   :  { %v1937_v61 = vmul.f32 %v1936_v23, %v1930_v8  ;;  %v1935_v49 = vadd.f32 0.5, %v1934_v2  ;;  %2194 = vmatpush.bf16.msrb.mxu1 %v2689_v48  ;;  %v2685_v60 = vor.u32 %v2804_v56, %v2684_v40 }
 0x5b7   :  { %v1984_v16 = vpack.c.bf16 %v3935_v28, %v3935_v28 }
 0x5b8   :  { %v1938_v24 = vadd.f32 %v1937_v61, %v345_v46  ;;  %v1924_v51 = vpop.f32.mrf.mxu1  ;;  %v1940_v62 = vsub.f32 1.0, %v1935_v49  ;;  %v1942_v22 = vmul.f32 %v1935_v49, %v3869_v4  ;;  %v2649_v4 = vor.u32 %v2795_v3, %v2648_v43 }
 0x5b9   :  { %1993 = vmatmul.bf16.vlgmr.msra.gmra.mxu1 %v1984_v16 }
 0x5ba   :  { %2906 = vtanh.f32 %v1938_v24  ;;  %2113 = vmatpush.bf16.msrb.mxu0 %v2649_v4  ;;  %2195 = vmatpush.bf16.msrb.mxu1 %v2685_v60  ;;  %v2802_v24 = vld [vmem:[#allocation6 + $0x228] sm:$0xf0] }
 0x5be   :  { %2114 = vmatpush.bf16.msrb.mxu0 %v2645_v39  ;;  %v2664_v39 = vld [vmem:[#allocation6 + $0xa4] sm:$0xf] }
 0x5bf   :  { %v2665_v5 = vor.u32 %v2799_v15, %v2664_v39 }
 0x5c0   :  { %v2907_v19 = vpop.eup %2906 }
 0x5c1   :  { %v1941_v31 = vmul.f32 %v2907_v19, %v1940_v62 }
 0x5c2   :  { %2115 = vmatpush.bf16.msrb.mxu0 %v2641_v30  ;;  %v2660_v30 = vld [vmem:[#allocation6 + $0x34] sm:$0xf] }
 0x5c3   :  { %v1943_v57 = vadd.f32 %v1942_v22, %v1941_v31  ;;  %v2672_v31 = vld [vmem:[#allocation6 + $0x184] sm:$0xf] }
 0x5c5   :  { %v1944_v47 = vpack.c.bf16 %v1943_v57, %v1943_v57  ;;  %v2801_v57 = vld [vmem:[#allocation6 + $0x1b8] sm:$0xf0] }
 0x5c6   :  { %2116 = vmatpush.bf16.msrb.mxu0 %v2637_v54  ;;  %v2673_v63 = vor.u32 %v2801_v57, %v2672_v31 }
 0x5c7   :  { %1953 = vmatmul.bf16.vlgmr.msrb.gmra.mxu2 %v1944_v47  ;;  %1966 = vmatmul.bf16.vlgmr.msra.gmra.mxu3 %v1944_v47 }
 0x5c8   :  { %1979 = vmatmul.bf16.vlgmr.msra.gmra.mxu0 %v1944_v47 }
 0x5ca   :  { %2117 = vmatpush.bf16.msrb.mxu0 %v2633_v38 }
 0x5ce   :  { %2118 = vmatpush.bf16.msrb.mxu0 %v2629_v9 }
 0x5d7   :  { %2006 = vmatmul.bf16.vlgmr.msra.gmra.mxu2 %v1984_v16  ;;  %2019 = vmatmul.bf16.vlgmr.msrb.gmra.mxu3 %v1984_v16  ;;  %v2676_v16 = vld [vmem:[#allocation6 + $0x1f4] sm:$0xf] }
 0x5d8   :  { %v2677_v22 = vor.u32 %v2802_v24, %v2676_v16 }
 0x636   :  { %v1994_v25 = vpop.f32.mrf.mxu1 }
 0x63e   :  { %v1996_v27 = vpop.f32.mrf.mxu1 }
 0x645   :  { %v1980_v11 = vpop.f32.mrf.mxu0 }
 0x646   :  { %v1981_v47 = vadd.f32 %v1980_v11, %v4351_v17  ;;  %v2798_v11 = vld [vmem:[#allocation6 + $0x68] sm:$0xf0] }
 0x647   :  { %v2661_v52 = vor.u32 %v2798_v11, %v2660_v30 }
 0x64a   :  { %v1954_v44 = vpop.f32.mrf.mxu2  ;;  %v1967_v20 = vpop.f32.mrf.mxu3 }
 0x64b   :  { %v1955_v10 = vadd.f32 %v1954_v44, %v4347_v6  ;;  %v2803_v6 = vld [vmem:[#allocation6 + $0x298] sm:$0xf0]  ;;  %v1968_v23 = vadd.f32 %v1967_v20, %v4348_v42 }
 0x64c   :  { %v2681_v41 = vor.u32 %v2803_v6, %v2680_v0 }
 0x64d   :  { %v2024_v59 = vadd.f32 %v1994_v25, %v1955_v10  ;;  %v1982_v7 = vpop.f32.mrf.mxu0 }
 0x64e   :  { %2196 = vmatpush.bf16.msrb.mxu1 %v2681_v41 }
 0x64f   :  { %v2025_v58 = vmul.f32 0.5, %v2024_v59 }
 0x651   :  { %2908 = vtanh.f32 %v2025_v58 }
 0x652   :  { %v1956_v21 = vpop.f32.mrf.mxu2  ;;  %v1969_v29 = vpop.f32.mrf.mxu3  ;;  %2197 = vmatpush.bf16.msrb.mxu1 %v2677_v22 }
 0x656   :  { %2198 = vmatpush.bf16.msrb.mxu1 %v2673_v63 }
 0x657   :  { %v2909_v8 = vpop.eup %2908 }
 0x658   :  { %v2027_v13 = vmul.f32 0.5, %v2909_v8 }
 0x65a   :  { %v2007_v46 = vpop.f32.mrf.mxu2  ;;  %v2020_v61 = vpop.f32.mrf.mxu3  ;;  %v2028_v2 = vadd.f32 0.5, %v2027_v13 }
 0x65b   :  { %v2029_v51 = vadd.f32 %v2007_v46, %v1968_v23  ;;  %v2034_v49 = vadd.f32 %v3760_v55, %v2020_v61  ;;  %v2669_v55 = vor.u32 %v2800_v26, %v2668_v45 }
 0x65d   :  { %v2030_v62 = vmul.f32 0.5, %v2029_v51  ;;  %v2035_v19 = vmul.f32 %v2034_v49, %v2028_v2  ;;  %2199 = vmatpush.bf16.msrb.mxu1 %v2669_v55 }
 0x65f   :  { %2910 = vtanh.f32 %v2030_v62  ;;  %v2036_v42 = vadd.f32 %v2035_v19, %v1981_v47 }
 0x661   :  { %2912 = vtanh.f32 %v2036_v42  ;;  %2200 = vmatpush.bf16.msrb.mxu1 %v2665_v5 }
 0x662   :  { %v2009_v34 = vpop.f32.mrf.mxu2  ;;  %v2022_v12 = vpop.f32.mrf.mxu3 }
 0x665   :  { %v2911_v50 = vpop.eup %2910  ;;  %2201 = vmatpush.bf16.msrb.mxu1 %v2661_v52 }
 0x666   :  { %v2032_v25 = vmul.f32 0.5, %v2911_v50 }
 0x667   :  { %v2913_v4 = vpop.eup %2912 }
 0x668   :  { %v2033_v43 = vadd.f32 0.5, %v2032_v25 }
 0x66a   :  { %v2038_v3 = vsub.f32 1.0, %v2033_v43  ;;  %v2040_v36 = vmul.f32 %v2033_v43, %v3935_v28  ;;  %v2817_v28 = vld [vmem:[#allocation8 + $0x9] ss:$0 sm:$0xff] }
 0x66c   :  { %v2039_v17 = vmul.f32 %v2913_v4, %v2038_v3 }
 0x66e   :  { %v2041_v14 = vadd.f32 %v2040_v36, %v2039_v17 }
 0x670   :  { %v2042_v27 = vpack.c.bf16 %v2041_v14, %v2041_v14 }
 0x672   :  { %2119 = vmatmul.bf16.vlgmr.msrb.gmra.mxu0 %v2042_v27 }
 0x6ef   :  { %v2120_v54 = vpop.f32.mrf.mxu0 }
 0x6f0   :  { %v2121_v37 = vadd.f32 %v2816_v33, %v2120_v54 }
 0x6f2   :  { %v2124_v18 = vmax.f32 %v2121_v37, 0.0 }
 0x6f4   :  { %v2125_v44 = vpack.c.bf16 %v2124_v18, %v2124_v18 }
 0x6f6   :  { %2202 = vmatmul.bf16.vlgmr.msrb.gmra.mxu1 %v2125_v44 }
 0x6f7   :  { %v2122_v20 = vpop.f32.mrf.mxu0 }
 0x773   :  { %v2203_v38 = vpop.f32.mrf.mxu1 }
 0x774   :  { %v2204_v10 = vadd.f32 %v2817_v28, %v2203_v38 }
 0x776   :  { %2207 = vst [vmem:[#allocation9] sm:$0xff] %v2204_v10 }
 0x777   :  { %2218 = dma.vmem_to_hbm [thread:$0]  %s2214_s2, 128, %s2216_s5, [#allocation5]  }
 0x77b   :  { %v2205_v1 = vpop.f32.mrf.mxu1 }
 0x77c   :  { %3017 = dma.done.wait [#allocation5], 128  }
 0x77d   :  { %3018 = vsyncadd [#allocation5], 4294967168 }
 0x77e   :  { %2223 = vsyncpa [#allocation4], 1 }
 0x77f   :  { %2224 = vsyncpa [#allocation7], 1 }
 0x780   :  { %2225 = vsyncpa [#allocation5], 1 }

</bundles_post_ra>
